<compile_context>
chip_gen: v7x
topology: tpu7x:2x2x1
jax: 0.10.0
libtpu: 0.0.40
codegen_flags: <defaults>
</compile_context>

<pallas_src>
import math
import functools

import jax
import jax.numpy as jnp
from jax.experimental import pallas as pl
from jax.experimental.pallas import tpu as pltpu

LANES = 128
VMEM_LIMIT = 32 * 1024 * 1024  # fits the scoped default on v5e/v6e and v7x


def _cparams(n_parallel_axes):
    return pltpu.CompilerParams(
        dimension_semantics=("parallel",) * n_parallel_axes,
        vmem_limit_bytes=VMEM_LIMIT,
    )


def _row_tile(m, cap=512):
    """Row tile: multiple of 8 dividing m, <= cap, preferring >=2 grid steps."""
    if m % 8 != 0:
        return m
    if m >= 16 and (m // 2) % 8 == 0:
        t = min(cap, m // 2)          # >=2 steps -> both v7x TensorCores busy
    else:
        t = min(cap, m)
    t -= t % 8
    while m % t != 0:
        t -= 8
    return t


def _seqs_per_step(batch, seq):
    """Sequences per attention grid step: batch rows, but keep >=2 grid steps."""
    if batch < 2:
        return 1
    bb = max(1, min(batch // 2, max(1, 256 // seq)))
    while batch % bb != 0:
        bb -= 1
    return bb


def _ln_f32(x, g, b, eps=1e-5):
    mean = jnp.mean(x, axis=-1, keepdims=True)
    var = jnp.mean((x - mean) ** 2, axis=-1, keepdims=True)
    return (x - mean) * jax.lax.rsqrt(var + eps) * g + b


# --------------------------- Fused per-layer kernel --------------------------

def _layer_kernel(h_ref, bias_ref, lni_g_ref, lni_b_ref,
                  wqkv_ref, bqkv_ref, wo_ref, bo_ref, ln1_g_ref, ln1_b_ref,
                  w1_ref, b1_ref, w2_ref, b2_ref, ln2_g_ref, ln2_b_ref,
                  o_ref, ctx_ref, *, num_heads, input_ln):
    """One full transformer layer (attention + FFN) for BB sequences."""
    BB, S, H = h_ref.shape
    Dh = H // num_heads

    hx = h_ref[...].reshape(BB * S, H).astype(jnp.float32)      # (BB*S, H) f32
    if input_ln:  # embedding LayerNorm folded into the first layer's kernel
        hx = _ln_f32(hx, lni_g_ref[...], lni_b_ref[...])

    h_bf = hx.astype(jnp.bfloat16)

    # Slab-wide fused QKV projection (M = BB*S, K = H); 1/sqrt(Dh) is already
    # folded into the q-columns/bias of wqkv at param-init time.
    qkv = jax.lax.dot_general(
        h_bf, wqkv_ref[...], dimension_numbers=(((1,), (0,)), ((), ())),
        preferred_element_type=jnp.float32) + bqkv_ref[...]     # (BB*S, 3H) f32

    # Per-(sequence, head) masked softmax attention.  Each head's context is
    # written into one (BB*S, H) VMEM buffer so the output projection below is
    # a SINGLE K=H matmul instead of num_heads K=Dh matmuls.
    for b in range(BB):
        r0 = b * S
        bias = bias_ref[b]                                      # (1, S) f32
        for hd in range(num_heads):
            c0 = hd * Dh
            qh = qkv[r0:r0 + S, c0:c0 + Dh].astype(jnp.bfloat16)
            kh = qkv[r0:r0 + S, H + c0:H + c0 + Dh].astype(jnp.bfloat16)
            vh = qkv[r0:r0 + S, 2 * H + c0:2 * H + c0 + Dh].astype(jnp.bfloat16)
            s = jax.lax.dot_general(                            # (S, S) f32
                qh, kh, dimension_numbers=(((1,), (1,)), ((), ())),
                preferred_element_type=jnp.float32) + bias
            m = jnp.max(s, axis=-1, keepdims=True)
            p = jnp.exp(s - m)
            p = p * pl.reciprocal(jnp.sum(p, axis=-1, keepdims=True))
            ctx = jax.lax.dot_general(                          # (S, Dh) f32
                p.astype(jnp.bfloat16), vh,
                dimension_numbers=(((1,), (0,)), ((), ())),
                preferred_element_type=jnp.float32)
            ctx_ref[r0:r0 + S, c0:c0 + Dh] = ctx.astype(jnp.bfloat16)

    # Single output projection over all heads / sequences at once.
    attn = jax.lax.dot_general(
        ctx_ref[...], wo_ref[...], dimension_numbers=(((1,), (0,)), ((), ())),
        preferred_element_type=jnp.float32) + bo_ref[...]
    y1 = _ln_f32(attn + hx, ln1_g_ref[...], ln1_b_ref[...])     # residual + LN1

    # FFN: matmul -> GELU -> matmul -> residual -> LN2 (f32 VPU math, v5e-safe).
    u = jax.lax.dot_general(
        y1.astype(jnp.bfloat16), w1_ref[...],
        dimension_numbers=(((1,), (0,)), ((), ())),
        preferred_element_type=jnp.float32) + b1_ref[...]
    # TODO(synk): HF RoBERTa uses exact erf-GELU; tanh approximation used here.
    u = jax.nn.gelu(u, approximate=True)
    y2 = jax.lax.dot_general(
        u.astype(jnp.bfloat16), w2_ref[...],
        dimension_numbers=(((1,), (0,)), ((), ())),
        preferred_element_type=jnp.float32) + b2_ref[...]
    out = _ln_f32(y2 + y1, ln2_g_ref[...], ln2_b_ref[...])
    o_ref[...] = out.reshape(BB, S, H).astype(o_ref.dtype)


def layer_block(h3d, bias, ln_in_g, ln_in_b, p, *, num_heads, input_ln):
    B, S, H = h3d.shape
    F = p["w1"].shape[1]
    BB = _seqs_per_step(B, S)
    grid = (B // BB,)

    # Resident (constant-index) weights: single-buffered to save VMEM.
    def res(shape):
        return pl.BlockSpec(shape, lambda g: (0,) * len(shape),
                            pipeline_mode=pl.Buffered(1))

    kernel = functools.partial(_layer_kernel, num_heads=num_heads,
                               input_ln=input_ln)
    return pl.pallas_call(
        kernel,
        out_shape=jax.ShapeDtypeStruct((B, S, H), jnp.bfloat16),
        grid=grid,
        in_specs=[
            pl.BlockSpec((BB, S, H), lambda g: (g, 0, 0)),   # hidden states
            pl.BlockSpec((BB, 1, S), lambda g: (g, 0, 0)),   # mask bias (f32)
            res((1, H)), res((1, H)),                        # input-LN (layer 0)
            res((H, 3 * H)), res((1, 3 * H)),                # wqkv, bqkv
            res((H, H)), res((1, H)),                        # wo, bo
            res((1, H)), res((1, H)),                        # ln1 g, b
            res((H, F)), res((1, F)),                        # w1, b1
            res((F, H)), res((1, H)),                        # w2, b2
            res((1, H)), res((1, H)),                        # ln2 g, b
        ],
        out_specs=pl.BlockSpec((BB, S, H), lambda g: (g, 0, 0)),
        scratch_shapes=[pltpu.VMEM((BB * S, H), jnp.bfloat16)],
        compiler_params=_cparams(1),
    )(h3d, bias, ln_in_g, ln_in_b,
      p["wqkv"], p["bqkv"], p["wo"], p["bo"], p["ln1_g"], p["ln1_b"],
      p["w1"], p["b1"], p["w2"], p["b2"], p["ln2_g"], p["ln2_b"])


# ----------------------------- Classification head ---------------------------

def _head_kernel(x_ref, w_ref, b_ref, o_ref):
    y = jax.lax.dot_general(
        x_ref[...], w_ref[...], dimension_numbers=(((1,), (0,)), ((), ())),
        preferred_element_type=jnp.float32) + b_ref[...]
    o_ref[...] = y.astype(o_ref.dtype)


def fc_head(x, w, b):
    """Classification head into a 128-lane padded logits slab (f32)."""
    M, H = x.shape
    C = w.shape[1]                    # padded to a multiple of 128
    tm = _row_tile(M)
    return pl.pallas_call(
        _head_kernel,
        out_shape=jax.ShapeDtypeStruct((M, C), jnp.float32),
        grid=(M // tm,),
        in_specs=[
            pl.BlockSpec((tm, H), lambda i: (i, 0)),
            pl.BlockSpec((H, C), lambda i: (0, 0), pipeline_mode=pl.Buffered(1)),
            pl.BlockSpec((1, C), lambda i: (0, 0), pipeline_mode=pl.Buffered(1)),
        ],
        out_specs=pl.BlockSpec((tm, C), lambda i: (i, 0)),
        compiler_params=_cparams(1),
    )(x, w, b)


# --------------------------- Encoder + head glue ----------------------------

def model_forward(params, input_ids, attention_mask, *, num_heads, num_classes):
    B, S = input_ids.shape
    H = params["word_emb"].shape[1]

    # Embedding lookup (gather) + position embeddings kept as XLA glue; the
    # embedding LayerNorm happens inside the first layer kernel.  Activations
    # travel between kernels in bf16 (half the HBM bytes).
    h = jnp.take(params["word_emb"], input_ids, axis=0) \
        + params["pos_emb"][None, :S, :]
    h = h.astype(jnp.bfloat16)

    # Additive attention-mask bias stays f32 (adding -1e9 in bf16 saturates).
    bias = (1.0 - attention_mask.astype(jnp.float32))[:, None, :] * -1e9

    for li, p in enumerate(params["layers"]):
        h = layer_block(h, bias, params["emb_ln_g"], params["emb_ln_b"], p,
                        num_heads=num_heads, input_ln=(li == 0))

    logits_pad = fc_head(h.reshape(B * S, H), params["fc_w"], params["fc_b"])
    return logits_pad[:, :num_classes].reshape(B, S, num_classes)


# ------------------------------ Param init ----------------------------------

def init_params(key, *, vocab, max_pos, H, ffn, num_heads, num_layers,
                num_classes):
    c_pad = ((num_classes + LANES - 1) // LANES) * LANES
    scale = 1.0 / math.sqrt(H // num_heads)

    def dense_f32(k, shape):
        return jax.random.normal(k, shape, jnp.float32) * 0.02

    keys = jax.random.split(key, 3 + num_layers)

    fc_w = jnp.zeros((H, c_pad), jnp.float32)
    fc_w = fc_w.at[:, :num_classes].set(dense_f32(keys[2], (H, num_classes)))

    params = {
        "word_emb": dense_f32(keys[0], (vocab, H)),
        "pos_emb": dense_f32(keys[1], (max_pos, H)),
        "emb_ln_g": jnp.ones((1, H), jnp.float32),
        "emb_ln_b": jnp.zeros((1, H), jnp.float32),
        "fc_w": fc_w.astype(jnp.bfloat16),
        "fc_b": jnp.zeros((1, c_pad), jnp.float32),
        "layers": [],
    }
    for li in range(num_layers):
        lk = jax.random.split(keys[3 + li], 4)
        wqkv = dense_f32(lk[0], (H, 3 * H))
        wqkv = wqkv.at[:, :H].multiply(scale)        # fold 1/sqrt(Dh) into q-proj
        bqkv = jnp.zeros((1, 3 * H), jnp.float32)
        bqkv = bqkv.at[:, :H].multiply(scale)
        params["layers"].append({
            "wqkv": wqkv.astype(jnp.bfloat16),
            "bqkv": bqkv,
            "wo": dense_f32(lk[1], (H, H)).astype(jnp.bfloat16),
            "bo": jnp.zeros((1, H), jnp.float32),
            "ln1_g": jnp.ones((1, H), jnp.float32),
            "ln1_b": jnp.zeros((1, H), jnp.float32),
            "w1": dense_f32(lk[2], (H, ffn)).astype(jnp.bfloat16),
            "b1": jnp.zeros((1, ffn), jnp.float32),
            "w2": dense_f32(lk[3], (ffn, H)).astype(jnp.bfloat16),
            "b2": jnp.zeros((1, H), jnp.float32),
            "ln2_g": jnp.ones((1, H), jnp.float32),
            "ln2_b": jnp.zeros((1, H), jnp.float32),
        })
    return params


# --------------------------------- Main --------------------------------------

if __name__ == "__main__":
    # Small RoBERTa-style config; num_classes = len(classes) + 1 + 2 = 2+1+2 = 5.
    B, S, H, NUM_HEADS, FFN, LAYERS = 2, 16, 128, 2, 512, 2
    VOCAB, MAX_POS, NUM_CLASSES = 1000, 512, 5

    key = jax.random.PRNGKey(0)
    k_param, k_ids = jax.random.split(key)
    params = init_params(k_param, vocab=VOCAB, max_pos=MAX_POS, H=H, ffn=FFN,
                         num_heads=NUM_HEADS, num_layers=LAYERS,
                         num_classes=NUM_CLASSES)

    input_ids = jax.random.randint(k_ids, (B, S), 0, VOCAB, dtype=jnp.int32)
    attention_mask = jnp.array(
        [[1] * S, [1] * (S - 3) + [0] * 3], dtype=jnp.int32)  # 2nd row padded

    fwd = jax.jit(functools.partial(model_forward, num_heads=NUM_HEADS,
                                    num_classes=NUM_CLASSES))
    logits = fwd(params, input_ids, attention_mask)
    jax.block_until_ready(logits)

    assert logits.shape == (B, S, NUM_CLASSES), logits.shape
    assert bool(jnp.all(jnp.isfinite(logits)))
    print("KERNEL_OK")
</pallas_src>

<mosaic_0001>
module attributes {stable_mosaic.version = 11 : i64} {
  func.func @_head_kernel(%arg0: i32, %arg1: memref<16x128xbf16, #tpu.memory_space<vmem>>, %arg2: memref<128x128xbf16, #tpu.memory_space<vmem>>, %arg3: memref<1x128xf32, #tpu.memory_space<vmem>>, %arg4: memref<16x128xf32, #tpu.memory_space<vmem>>) attributes {dimension_semantics = [#tpu.dimension_semantics<parallel>], iteration_bounds = array<i64: 2>, scalar_prefetch = 0 : i64, scratch_operands = 0 : i64, tpu.core_type = #tpu.core_type<tc>, window_params = [{transform_indices = @transform_0, window_bounds = array<i64: 16, 128>}, {pipeline_mode = #tpu.pipeline_mode<synchronous>, transform_indices = @transform_1, window_bounds = array<i64: 128, 128>}, {pipeline_mode = #tpu.pipeline_mode<synchronous>, transform_indices = @transform_2, window_bounds = array<i64: 1, 128>}, {transform_indices = @transform_3, window_bounds = array<i64: 16, 128>}]} {
    %c0 = arith.constant 0 : index
    %c0_0 = arith.constant 0 : index
    %0 = vector.load %arg1[%c0, %c0_0] : memref<16x128xbf16, #tpu.memory_space<vmem>>, vector<16x128xbf16>
    %c0_1 = arith.constant 0 : index
    %c0_2 = arith.constant 0 : index
    %1 = vector.load %arg2[%c0_1, %c0_2] : memref<128x128xbf16, #tpu.memory_space<vmem>>, vector<128x128xbf16>
    %cst = arith.constant dense<0.000000e+00> : vector<16x128xf32>
    %2 = tpu.matmul %0, %1, %cst {dimension_numbers = #tpu.dot_dimension_numbers<[1], [0], [0], [1], [0, 0, 1, 1], [], []>} : vector<16x128xbf16>, vector<128x128xbf16>, vector<16x128xf32> -> vector<16x128xf32>
    %c0_3 = arith.constant 0 : index
    %c0_4 = arith.constant 0 : index
    %3 = vector.load %arg3[%c0_3, %c0_4] : memref<1x128xf32, #tpu.memory_space<vmem>>, vector<1x128xf32>
    %4 = vector.broadcast %3 : vector<1x128xf32> to vector<16x128xf32>
    %5 = arith.addf %2, %4 : vector<16x128xf32>
    %c0_5 = arith.constant 0 : index
    %c0_6 = arith.constant 0 : index
    %6 = vector.load %arg4[%c0_5, %c0_6] : memref<16x128xf32, #tpu.memory_space<vmem>>, vector<16x128xf32>
    tpu.vector_store %arg4[%c0_5, %c0_6], %5 {strides = array<i32>} : memref<16x128xf32, #tpu.memory_space<vmem>>, vector<16x128xf32>,
    return
  }
  func.func @transform_0(%arg0: i32) -> (i32, i32) {
    %c0_i32 = arith.constant 0 : i32
    %c0_i32_0 = arith.constant 0 : i32
    return %arg0, %c0_i32 : i32, i32
  }
  func.func @transform_1(%arg0: i32) -> (i32, i32) {
    %c0_i32 = arith.constant 0 : i32
    %c0_i32_0 = arith.constant 0 : i32
    %c0_i32_1 = arith.constant 0 : i32
    return %c0_i32, %c0_i32_0 : i32, i32
  }
  func.func @transform_2(%arg0: i32) -> (i32, i32) {
    %c0_i32 = arith.constant 0 : i32
    %c0_i32_0 = arith.constant 0 : i32
    %c0_i32_1 = arith.constant 0 : i32
    return %c0_i32, %c0_i32_0 : i32, i32
  }
  func.func @transform_3(%arg0: i32) -> (i32, i32) {
    %c0_i32 = arith.constant 0 : i32
    %c0_i32_0 = arith.constant 0 : i32
    return %arg0, %c0_i32 : i32, i32
  }
}

module attributes {stable_mosaic.version = 11 : i64} {
  func.func @_layer_kernel(%arg0: i32, %arg1: memref<1x16x128xbf16, #tpu.memory_space<vmem>>, %arg2: memref<1x1x16xf32, #tpu.memory_space<vmem>>, %arg3: memref<1x128xf32, #tpu.memory_space<vmem>>, %arg4: memref<1x128xf32, #tpu.memory_space<vmem>>, %arg5: memref<128x384xbf16, #tpu.memory_space<vmem>>, %arg6: memref<1x384xf32, #tpu.memory_space<vmem>>, %arg7: memref<128x128xbf16, #tpu.memory_space<vmem>>, %arg8: memref<1x128xf32, #tpu.memory_space<vmem>>, %arg9: memref<1x128xf32, #tpu.memory_space<vmem>>, %arg10: memref<1x128xf32, #tpu.memory_space<vmem>>, %arg11: memref<128x512xbf16, #tpu.memory_space<vmem>>, %arg12: memref<1x512xf32, #tpu.memory_space<vmem>>, %arg13: memref<512x128xbf16, #tpu.memory_space<vmem>>, %arg14: memref<1x128xf32, #tpu.memory_space<vmem>>, %arg15: memref<1x128xf32, #tpu.memory_space<vmem>>, %arg16: memref<1x128xf32, #tpu.memory_space<vmem>>, %arg17: memref<1x16x128xbf16, #tpu.memory_space<vmem>>, %arg18: memref<16x128xbf16, #tpu.memory_space<vmem>>) attributes {dimension_semantics = [#tpu.dimension_semantics<parallel>], iteration_bounds = array<i64: 2>, scalar_prefetch = 0 : i64, scratch_operands = 1 : i64, tpu.core_type = #tpu.core_type<tc>, window_params = [{transform_indices = @transform_0, window_bounds = array<i64: 1, 16, 128>}, {transform_indices = @transform_1, window_bounds = array<i64: 1, 1, 16>}, {pipeline_mode = #tpu.pipeline_mode<synchronous>, transform_indices = @transform_2, window_bounds = array<i64: 1, 128>}, {pipeline_mode = #tpu.pipeline_mode<synchronous>, transform_indices = @transform_3, window_bounds = array<i64: 1, 128>}, {pipeline_mode = #tpu.pipeline_mode<synchronous>, transform_indices = @transform_4, window_bounds = array<i64: 128, 384>}, {pipeline_mode = #tpu.pipeline_mode<synchronous>, transform_indices = @transform_5, window_bounds = array<i64: 1, 384>}, {pipeline_mode = #tpu.pipeline_mode<synchronous>, transform_indices = @transform_6, window_bounds = array<i64: 128, 128>}, {pipeline_mode = #tpu.pipeline_mode<synchronous>, transform_indices = @transform_7, window_bounds = array<i64: 1, 128>}, {pipeline_mode = #tpu.pipeline_mode<synchronous>, transform_indices = @transform_8, window_bounds = array<i64: 1, 128>}, {pipeline_mode = #tpu.pipeline_mode<synchronous>, transform_indices = @transform_9, window_bounds = array<i64: 1, 128>}, {pipeline_mode = #tpu.pipeline_mode<synchronous>, transform_indices = @transform_10, window_bounds = array<i64: 128, 512>}, {pipeline_mode = #tpu.pipeline_mode<synchronous>, transform_indices = @transform_11, window_bounds = array<i64: 1, 512>}, {pipeline_mode = #tpu.pipeline_mode<synchronous>, transform_indices = @transform_12, window_bounds = array<i64: 512, 128>}, {pipeline_mode = #tpu.pipeline_mode<synchronous>, transform_indices = @transform_13, window_bounds = array<i64: 1, 128>}, {pipeline_mode = #tpu.pipeline_mode<synchronous>, transform_indices = @transform_14, window_bounds = array<i64: 1, 128>}, {pipeline_mode = #tpu.pipeline_mode<synchronous>, transform_indices = @transform_15, window_bounds = array<i64: 1, 128>}, {transform_indices = @transform_16, window_bounds = array<i64: 1, 16, 128>}]} {
    %c0 = arith.constant 0 : index
    %c0_0 = arith.constant 0 : index
    %c0_1 = arith.constant 0 : index
    %0 = vector.load %arg1[%c0, %c0_0, %c0_1] : memref<1x16x128xbf16, #tpu.memory_space<vmem>>, vector<1x16x128xbf16>
    %1 = vector.shape_cast %0 : vector<1x16x128xbf16> to vector<16x128xbf16>
    %2 = arith.extf %1 : vector<16x128xbf16> to vector<16x128xf32>
    %c0_2 = arith.constant 0 : index
    %c0_3 = arith.constant 0 : index
    %3 = vector.load %arg3[%c0_2, %c0_3] : memref<1x128xf32, #tpu.memory_space<vmem>>, vector<1x128xf32>
    %c0_4 = arith.constant 0 : index
    %c0_5 = arith.constant 0 : index
    %4 = vector.load %arg4[%c0_4, %c0_5] : memref<1x128xf32, #tpu.memory_space<vmem>>, vector<1x128xf32>
    %cst = arith.constant dense<0.000000e+00> : vector<16xf32>
    %5 = vector.multi_reduction <add>, %2, %cst [1] : vector<16x128xf32> to vector<16xf32>
    %6 = vector.shape_cast %5 : vector<16xf32> to vector<16x1xf32>
    %cst_6 = arith.constant 1.280000e+02 : f32
    %7 = vector.broadcast %cst_6 : f32 to vector<16x1xf32>
    %8 = arith.divf %6, %7 : vector<16x1xf32>
    %9 = vector.broadcast %8 : vector<16x1xf32> to vector<16x128xf32>
    %10 = arith.subf %2, %9 : vector<16x128xf32>
    %11 = arith.mulf %10, %10 : vector<16x128xf32>
    %cst_7 = arith.constant dense<0.000000e+00> : vector<16xf32>
    %12 = vector.multi_reduction <add>, %11, %cst_7 [1] : vector<16x128xf32> to vector<16xf32>
    %13 = vector.shape_cast %12 : vector<16xf32> to vector<16x1xf32>
    %cst_8 = arith.constant 1.280000e+02 : f32
    %14 = vector.broadcast %cst_8 : f32 to vector<16x1xf32>
    %15 = arith.divf %13, %14 : vector<16x1xf32>
    %16 = vector.broadcast %8 : vector<16x1xf32> to vector<16x128xf32>
    %17 = arith.subf %2, %16 : vector<16x128xf32>
    %cst_9 = arith.constant 9.99999974E-6 : f32
    %18 = vector.broadcast %cst_9 : f32 to vector<16x1xf32>
    %19 = arith.addf %15, %18 : vector<16x1xf32>
    %20 = math.rsqrt %19 : vector<16x1xf32>
    %21 = vector.broadcast %20 : vector<16x1xf32> to vector<16x128xf32>
    %22 = arith.mulf %17, %21 : vector<16x128xf32>
    %23 = vector.broadcast %3 : vector<1x128xf32> to vector<16x128xf32>
    %24 = arith.mulf %22, %23 : vector<16x128xf32>
    %25 = vector.broadcast %4 : vector<1x128xf32> to vector<16x128xf32>
    %26 = arith.addf %24, %25 : vector<16x128xf32>
    %27 = arith.truncf %26 : vector<16x128xf32> to vector<16x128xbf16>
    %c0_10 = arith.constant 0 : index
    %c0_11 = arith.constant 0 : index
    %28 = vector.load %arg5[%c0_10, %c0_11] : memref<128x384xbf16, #tpu.memory_space<vmem>>, vector<128x384xbf16>
    %cst_12 = arith.constant dense<0.000000e+00> : vector<16x384xf32>
    %29 = tpu.matmul %27, %28, %cst_12 {dimension_numbers = #tpu.dot_dimension_numbers<[1], [0], [0], [1], [0, 0, 1, 1], [], []>} : vector<16x128xbf16>, vector<128x384xbf16>, vector<16x384xf32> -> vector<16x384xf32>
    %c0_13 = arith.constant 0 : index
    %c0_14 = arith.constant 0 : index
    %30 = vector.load %arg6[%c0_13, %c0_14] : memref<1x384xf32, #tpu.memory_space<vmem>>, vector<1x384xf32>
    %31 = vector.broadcast %30 : vector<1x384xf32> to vector<16x384xf32>
    %32 = arith.addf %29, %31 : vector<16x384xf32>
    %c0_15 = arith.constant 0 : index
    %c0_16 = arith.constant 0 : index
    %c0_17 = arith.constant 0 : index
    %33 = vector.load %arg2[%c0_15, %c0_16, %c0_17] : memref<1x1x16xf32, #tpu.memory_space<vmem>>, vector<1x1x16xf32>
    %34 = vector.shape_cast %33 : vector<1x1x16xf32> to vector<1x16xf32>
    %35 = vector.extract_strided_slice %32 {offsets = [0, 0], sizes = [16, 64], strides = [1, 1]} : vector<16x384xf32> to vector<16x64xf32>
    %36 = arith.truncf %35 : vector<16x64xf32> to vector<16x64xbf16>
    %37 = vector.extract_strided_slice %32 {offsets = [0, 128], sizes = [16, 64], strides = [1, 1]} : vector<16x384xf32> to vector<16x64xf32>
    %38 = arith.truncf %37 : vector<16x64xf32> to vector<16x64xbf16>
    %39 = vector.extract_strided_slice %32 {offsets = [0, 256], sizes = [16, 64], strides = [1, 1]} : vector<16x384xf32> to vector<16x64xf32>
    %40 = arith.truncf %39 : vector<16x64xf32> to vector<16x64xbf16>
    %cst_18 = arith.constant dense<0.000000e+00> : vector<16x16xf32>
    %41 = tpu.matmul %36, %38, %cst_18 {dimension_numbers = #tpu.dot_dimension_numbers<[1], [1], [0], [0], [0, 0, 1, 0], [], []>} : vector<16x64xbf16>, vector<16x64xbf16>, vector<16x16xf32> -> vector<16x16xf32>
    %42 = vector.broadcast %34 : vector<1x16xf32> to vector<16x16xf32>
    %43 = arith.addf %41, %42 : vector<16x16xf32>
    %cst_19 = arith.constant dense<0xFF800000> : vector<16xf32>
    %44 = vector.multi_reduction <maximumf>, %43, %cst_19 [1] : vector<16x16xf32> to vector<16xf32>
    %45 = vector.shape_cast %44 : vector<16xf32> to vector<16x1xf32>
    %46 = vector.broadcast %45 : vector<16x1xf32> to vector<16x16xf32>
    %47 = arith.subf %43, %46 : vector<16x16xf32>
    %48 = math.exp %47 : vector<16x16xf32>
    %cst_20 = arith.constant dense<0.000000e+00> : vector<16xf32>
    %49 = vector.multi_reduction <add>, %48, %cst_20 [1] : vector<16x16xf32> to vector<16xf32>
    %50 = vector.shape_cast %49 : vector<16xf32> to vector<16x1xf32>
    %51 = tpu.reciprocal %50 : vector<16x1xf32> -> vector<16x1xf32>
    %52 = vector.broadcast %51 : vector<16x1xf32> to vector<16x16xf32>
    %53 = arith.mulf %48, %52 : vector<16x16xf32>
    %54 = arith.truncf %53 : vector<16x16xf32> to vector<16x16xbf16>
    %cst_21 = arith.constant dense<0.000000e+00> : vector<16x64xf32>
    %55 = tpu.matmul %54, %40, %cst_21 {dimension_numbers = #tpu.dot_dimension_numbers<[1], [0], [0], [1], [0, 0, 1, 1], [], []>} : vector<16x16xbf16>, vector<16x64xbf16>, vector<16x64xf32> -> vector<16x64xf32>
    %56 = arith.truncf %55 : vector<16x64xf32> to vector<16x64xbf16>
    %c0_22 = arith.constant 0 : index
    %c0_23 = arith.constant 0 : index
    %57 = vector.load %arg18[%c0_22, %c0_23] : memref<16x128xbf16, #tpu.memory_space<vmem>>, vector<16x64xbf16>
    tpu.vector_store %arg18[%c0_22, %c0_23], %56 {strides = array<i32>} : memref<16x128xbf16, #tpu.memory_space<vmem>>, vector<16x64xbf16>,
    %58 = vector.extract_strided_slice %32 {offsets = [0, 64], sizes = [16, 64], strides = [1, 1]} : vector<16x384xf32> to vector<16x64xf32>
    %59 = arith.truncf %58 : vector<16x64xf32> to vector<16x64xbf16>
    %60 = vector.extract_strided_slice %32 {offsets = [0, 192], sizes = [16, 64], strides = [1, 1]} : vector<16x384xf32> to vector<16x64xf32>
    %61 = arith.truncf %60 : vector<16x64xf32> to vector<16x64xbf16>
    %62 = vector.extract_strided_slice %32 {offsets = [0, 320], sizes = [16, 64], strides = [1, 1]} : vector<16x384xf32> to vector<16x64xf32>
    %63 = arith.truncf %62 : vector<16x64xf32> to vector<16x64xbf16>
    %cst_24 = arith.constant dense<0.000000e+00> : vector<16x16xf32>
    %64 = tpu.matmul %59, %61, %cst_24 {dimension_numbers = #tpu.dot_dimension_numbers<[1], [1], [0], [0], [0, 0, 1, 0], [], []>} : vector<16x64xbf16>, vector<16x64xbf16>, vector<16x16xf32> -> vector<16x16xf32>
    %65 = vector.broadcast %34 : vector<1x16xf32> to vector<16x16xf32>
    %66 = arith.addf %64, %65 : vector<16x16xf32>
    %cst_25 = arith.constant dense<0xFF800000> : vector<16xf32>
    %67 = vector.multi_reduction <maximumf>, %66, %cst_25 [1] : vector<16x16xf32> to vector<16xf32>
    %68 = vector.shape_cast %67 : vector<16xf32> to vector<16x1xf32>
    %69 = vector.broadcast %68 : vector<16x1xf32> to vector<16x16xf32>
    %70 = arith.subf %66, %69 : vector<16x16xf32>
    %71 = math.exp %70 : vector<16x16xf32>
    %cst_26 = arith.constant dense<0.000000e+00> : vector<16xf32>
    %72 = vector.multi_reduction <add>, %71, %cst_26 [1] : vector<16x16xf32> to vector<16xf32>
    %73 = vector.shape_cast %72 : vector<16xf32> to vector<16x1xf32>
    %74 = tpu.reciprocal %73 : vector<16x1xf32> -> vector<16x1xf32>
    %75 = vector.broadcast %74 : vector<16x1xf32> to vector<16x16xf32>
    %76 = arith.mulf %71, %75 : vector<16x16xf32>
    %77 = arith.truncf %76 : vector<16x16xf32> to vector<16x16xbf16>
    %cst_27 = arith.constant dense<0.000000e+00> : vector<16x64xf32>
    %78 = tpu.matmul %77, %63, %cst_27 {dimension_numbers = #tpu.dot_dimension_numbers<[1], [0], [0], [1], [0, 0, 1, 1], [], []>} : vector<16x16xbf16>, vector<16x64xbf16>, vector<16x64xf32> -> vector<16x64xf32>
    %79 = arith.truncf %78 : vector<16x64xf32> to vector<16x64xbf16>
    %c0_28 = arith.constant 0 : index
    %c64 = arith.constant 64 : index
    %80 = vector.load %arg18[%c0_28, %c64] : memref<16x128xbf16, #tpu.memory_space<vmem>>, vector<16x64xbf16>
    tpu.vector_store %arg18[%c0_28, %c64], %79 {strides = array<i32>} : memref<16x128xbf16, #tpu.memory_space<vmem>>, vector<16x64xbf16>,
    %c0_29 = arith.constant 0 : index
    %c0_30 = arith.constant 0 : index
    %81 = vector.load %arg18[%c0_29, %c0_30] : memref<16x128xbf16, #tpu.memory_space<vmem>>, vector<16x128xbf16>
    %c0_31 = arith.constant 0 : index
    %c0_32 = arith.constant 0 : index
    %82 = vector.load %arg7[%c0_31, %c0_32] : memref<128x128xbf16, #tpu.memory_space<vmem>>, vector<128x128xbf16>
    %cst_33 = arith.constant dense<0.000000e+00> : vector<16x128xf32>
    %83 = tpu.matmul %81, %82, %cst_33 {dimension_numbers = #tpu.dot_dimension_numbers<[1], [0], [0], [1], [0, 0, 1, 1], [], []>} : vector<16x128xbf16>, vector<128x128xbf16>, vector<16x128xf32> -> vector<16x128xf32>
    %c0_34 = arith.constant 0 : index
    %c0_35 = arith.constant 0 : index
    %84 = vector.load %arg8[%c0_34, %c0_35] : memref<1x128xf32, #tpu.memory_space<vmem>>, vector<1x128xf32>
    %85 = vector.broadcast %84 : vector<1x128xf32> to vector<16x128xf32>
    %86 = arith.addf %83, %85 : vector<16x128xf32>
    %87 = arith.addf %86, %26 : vector<16x128xf32>
    %c0_36 = arith.constant 0 : index
    %c0_37 = arith.constant 0 : index
    %88 = vector.load %arg9[%c0_36, %c0_37] : memref<1x128xf32, #tpu.memory_space<vmem>>, vector<1x128xf32>
    %c0_38 = arith.constant 0 : index
    %c0_39 = arith.constant 0 : index
    %89 = vector.load %arg10[%c0_38, %c0_39] : memref<1x128xf32, #tpu.memory_space<vmem>>, vector<1x128xf32>
    %cst_40 = arith.constant dense<0.000000e+00> : vector<16xf32>
    %90 = vector.multi_reduction <add>, %87, %cst_40 [1] : vector<16x128xf32> to vector<16xf32>
    %91 = vector.shape_cast %90 : vector<16xf32> to vector<16x1xf32>
    %cst_41 = arith.constant 1.280000e+02 : f32
    %92 = vector.broadcast %cst_41 : f32 to vector<16x1xf32>
    %93 = arith.divf %91, %92 : vector<16x1xf32>
    %94 = vector.broadcast %93 : vector<16x1xf32> to vector<16x128xf32>
    %95 = arith.subf %87, %94 : vector<16x128xf32>
    %96 = arith.mulf %95, %95 : vector<16x128xf32>
    %cst_42 = arith.constant dense<0.000000e+00> : vector<16xf32>
    %97 = vector.multi_reduction <add>, %96, %cst_42 [1] : vector<16x128xf32> to vector<16xf32>
    %98 = vector.shape_cast %97 : vector<16xf32> to vector<16x1xf32>
    %cst_43 = arith.constant 1.280000e+02 : f32
    %99 = vector.broadcast %cst_43 : f32 to vector<16x1xf32>
    %100 = arith.divf %98, %99 : vector<16x1xf32>
    %101 = vector.broadcast %93 : vector<16x1xf32> to vector<16x128xf32>
    %102 = arith.subf %87, %101 : vector<16x128xf32>
    %cst_44 = arith.constant 9.99999974E-6 : f32
    %103 = vector.broadcast %cst_44 : f32 to vector<16x1xf32>
    %104 = arith.addf %100, %103 : vector<16x1xf32>
    %105 = math.rsqrt %104 : vector<16x1xf32>
    %106 = vector.broadcast %105 : vector<16x1xf32> to vector<16x128xf32>
    %107 = arith.mulf %102, %106 : vector<16x128xf32>
    %108 = vector.broadcast %88 : vector<1x128xf32> to vector<16x128xf32>
    %109 = arith.mulf %107, %108 : vector<16x128xf32>
    %110 = vector.broadcast %89 : vector<1x128xf32> to vector<16x128xf32>
    %111 = arith.addf %109, %110 : vector<16x128xf32>
    %112 = arith.truncf %111 : vector<16x128xf32> to vector<16x128xbf16>
    %c0_45 = arith.constant 0 : index
    %c0_46 = arith.constant 0 : index
    %113 = vector.load %arg11[%c0_45, %c0_46] : memref<128x512xbf16, #tpu.memory_space<vmem>>, vector<128x512xbf16>
    %cst_47 = arith.constant dense<0.000000e+00> : vector<16x512xf32>
    %114 = tpu.matmul %112, %113, %cst_47 {dimension_numbers = #tpu.dot_dimension_numbers<[1], [0], [0], [1], [0, 0, 1, 1], [], []>} : vector<16x128xbf16>, vector<128x512xbf16>, vector<16x512xf32> -> vector<16x512xf32>
    %c0_48 = arith.constant 0 : index
    %c0_49 = arith.constant 0 : index
    %115 = vector.load %arg12[%c0_48, %c0_49] : memref<1x512xf32, #tpu.memory_space<vmem>>, vector<1x512xf32>
    %116 = vector.broadcast %115 : vector<1x512xf32> to vector<16x512xf32>
    %117 = arith.addf %114, %116 : vector<16x512xf32>
    %118 = arith.mulf %117, %117 : vector<16x512xf32>
    %119 = arith.mulf %117, %118 : vector<16x512xf32>
    %cst_50 = arith.constant 4.471500e-02 : f32
    %120 = vector.broadcast %cst_50 : f32 to vector<16x512xf32>
    %121 = arith.mulf %120, %119 : vector<16x512xf32>
    %122 = arith.addf %117, %121 : vector<16x512xf32>
    %cst_51 = arith.constant 0.797884583 : f32
    %123 = vector.broadcast %cst_51 : f32 to vector<16x512xf32>
    %124 = arith.mulf %123, %122 : vector<16x512xf32>
    %125 = math.tanh %124 : vector<16x512xf32>
    %cst_52 = arith.constant 1.000000e+00 : f32
    %126 = vector.broadcast %cst_52 : f32 to vector<16x512xf32>
    %127 = arith.addf %126, %125 : vector<16x512xf32>
    %cst_53 = arith.constant 5.000000e-01 : f32
    %128 = vector.broadcast %cst_53 : f32 to vector<16x512xf32>
    %129 = arith.mulf %128, %127 : vector<16x512xf32>
    %130 = arith.mulf %117, %129 : vector<16x512xf32>
    %131 = arith.truncf %130 : vector<16x512xf32> to vector<16x512xbf16>
    %c0_54 = arith.constant 0 : index
    %c0_55 = arith.constant 0 : index
    %132 = vector.load %arg13[%c0_54, %c0_55] : memref<512x128xbf16, #tpu.memory_space<vmem>>, vector<512x128xbf16>
    %cst_56 = arith.constant dense<0.000000e+00> : vector<16x128xf32>
    %133 = tpu.matmul %131, %132, %cst_56 {dimension_numbers = #tpu.dot_dimension_numbers<[1], [0], [0], [1], [0, 0, 1, 1], [], []>} : vector<16x512xbf16>, vector<512x128xbf16>, vector<16x128xf32> -> vector<16x128xf32>
    %c0_57 = arith.constant 0 : index
    %c0_58 = arith.constant 0 : index
    %134 = vector.load %arg14[%c0_57, %c0_58] : memref<1x128xf32, #tpu.memory_space<vmem>>, vector<1x128xf32>
    %135 = vector.broadcast %134 : vector<1x128xf32> to vector<16x128xf32>
    %136 = arith.addf %133, %135 : vector<16x128xf32>
    %137 = arith.addf %136, %111 : vector<16x128xf32>
    %c0_59 = arith.constant 0 : index
    %c0_60 = arith.constant 0 : index
    %138 = vector.load %arg15[%c0_59, %c0_60] : memref<1x128xf32, #tpu.memory_space<vmem>>, vector<1x128xf32>
    %c0_61 = arith.constant 0 : index
    %c0_62 = arith.constant 0 : index
    %139 = vector.load %arg16[%c0_61, %c0_62] : memref<1x128xf32, #tpu.memory_space<vmem>>, vector<1x128xf32>
    %cst_63 = arith.constant dense<0.000000e+00> : vector<16xf32>
    %140 = vector.multi_reduction <add>, %137, %cst_63 [1] : vector<16x128xf32> to vector<16xf32>
    %141 = vector.shape_cast %140 : vector<16xf32> to vector<16x1xf32>
    %cst_64 = arith.constant 1.280000e+02 : f32
    %142 = vector.broadcast %cst_64 : f32 to vector<16x1xf32>
    %143 = arith.divf %141, %142 : vector<16x1xf32>
    %144 = vector.broadcast %143 : vector<16x1xf32> to vector<16x128xf32>
    %145 = arith.subf %137, %144 : vector<16x128xf32>
    %146 = arith.mulf %145, %145 : vector<16x128xf32>
    %cst_65 = arith.constant dense<0.000000e+00> : vector<16xf32>
    %147 = vector.multi_reduction <add>, %146, %cst_65 [1] : vector<16x128xf32> to vector<16xf32>
    %148 = vector.shape_cast %147 : vector<16xf32> to vector<16x1xf32>
    %cst_66 = arith.constant 1.280000e+02 : f32
    %149 = vector.broadcast %cst_66 : f32 to vector<16x1xf32>
    %150 = arith.divf %148, %149 : vector<16x1xf32>
    %151 = vector.broadcast %143 : vector<16x1xf32> to vector<16x128xf32>
    %152 = arith.subf %137, %151 : vector<16x128xf32>
    %cst_67 = arith.constant 9.99999974E-6 : f32
    %153 = vector.broadcast %cst_67 : f32 to vector<16x1xf32>
    %154 = arith.addf %150, %153 : vector<16x1xf32>
    %155 = math.rsqrt %154 : vector<16x1xf32>
    %156 = vector.broadcast %155 : vector<16x1xf32> to vector<16x128xf32>
    %157 = arith.mulf %152, %156 : vector<16x128xf32>
    %158 = vector.broadcast %138 : vector<1x128xf32> to vector<16x128xf32>
    %159 = arith.mulf %157, %158 : vector<16x128xf32>
    %160 = vector.broadcast %139 : vector<1x128xf32> to vector<16x128xf32>
    %161 = arith.addf %159, %160 : vector<16x128xf32>
    %162 = vector.shape_cast %161 : vector<16x128xf32> to vector<1x16x128xf32>
    %163 = arith.truncf %162 : vector<1x16x128xf32> to vector<1x16x128xbf16>
    %c0_68 = arith.constant 0 : index
    %c0_69 = arith.constant 0 : index
    %c0_70 = arith.constant 0 : index
    %164 = vector.load %arg17[%c0_68, %c0_69, %c0_70] : memref<1x16x128xbf16, #tpu.memory_space<vmem>>, vector<1x16x128xbf16>
    tpu.vector_store %arg17[%c0_68, %c0_69, %c0_70], %163 {strides = array<i32>} : memref<1x16x128xbf16, #tpu.memory_space<vmem>>, vector<1x16x128xbf16>,
    return
  }
  func.func @transform_0(%arg0: i32) -> (i32, i32, i32) {
    %c0_i32 = arith.constant 0 : i32
    %c0_i32_0 = arith.constant 0 : i32
    %c0_i32_1 = arith.constant 0 : i32
    return %arg0, %c0_i32, %c0_i32_0 : i32, i32, i32
  }
  func.func @transform_1(%arg0: i32) -> (i32, i32, i32) {
    %c0_i32 = arith.constant 0 : i32
    %c0_i32_0 = arith.constant 0 : i32
    %c0_i32_1 = arith.constant 0 : i32
    return %arg0, %c0_i32, %c0_i32_0 : i32, i32, i32
  }
  func.func @transform_2(%arg0: i32) -> (i32, i32) {
    %c0_i32 = arith.constant 0 : i32
    %c0_i32_0 = arith.constant 0 : i32
    %c0_i32_1 = arith.constant 0 : i32
    return %c0_i32, %c0_i32_0 : i32, i32
  }
  func.func @transform_3(%arg0: i32) -> (i32, i32) {
    %c0_i32 = arith.constant 0 : i32
    %c0_i32_0 = arith.constant 0 : i32
    %c0_i32_1 = arith.constant 0 : i32
    return %c0_i32, %c0_i32_0 : i32, i32
  }
  func.func @transform_4(%arg0: i32) -> (i32, i32) {
    %c0_i32 = arith.constant 0 : i32
    %c0_i32_0 = arith.constant 0 : i32
    %c0_i32_1 = arith.constant 0 : i32
    return %c0_i32, %c0_i32_0 : i32, i32
  }
  func.func @transform_5(%arg0: i32) -> (i32, i32) {
    %c0_i32 = arith.constant 0 : i32
    %c0_i32_0 = arith.constant 0 : i32
    %c0_i32_1 = arith.constant 0 : i32
    return %c0_i32, %c0_i32_0 : i32, i32
  }
  func.func @transform_6(%arg0: i32) -> (i32, i32) {
    %c0_i32 = arith.constant 0 : i32
    %c0_i32_0 = arith.constant 0 : i32
    %c0_i32_1 = arith.constant 0 : i32
    return %c0_i32, %c0_i32_0 : i32, i32
  }
  func.func @transform_7(%arg0: i32) -> (i32, i32) {
    %c0_i32 = arith.constant 0 : i32
    %c0_i32_0 = arith.constant 0 : i32
    %c0_i32_1 = arith.constant 0 : i32
    return %c0_i32, %c0_i32_0 : i32, i32
  }
  func.func @transform_8(%arg0: i32) -> (i32, i32) {
    %c0_i32 = arith.constant 0 : i32
    %c0_i32_0 = arith.constant 0 : i32
    %c0_i32_1 = arith.constant 0 : i32
    return %c0_i32, %c0_i32_0 : i32, i32
  }
  func.func @transform_9(%arg0: i32) -> (i32, i32) {
    %c0_i32 = arith.constant 0 : i32
    %c0_i32_0 = arith.constant 0 : i32
    %c0_i32_1 = arith.constant 0 : i32
    return %c0_i32, %c0_i32_0 : i32, i32
  }
  func.func @transform_10(%arg0: i32) -> (i32, i32) {
    %c0_i32 = arith.constant 0 : i32
    %c0_i32_0 = arith.constant 0 : i32
    %c0_i32_1 = arith.constant 0 : i32
    return %c0_i32, %c0_i32_0 : i32, i32
  }
  func.func @transform_11(%arg0: i32) -> (i32, i32) {
    %c0_i32 = arith.constant 0 : i32
    %c0_i32_0 = arith.constant 0 : i32
    %c0_i32_1 = arith.constant 0 : i32
    return %c0_i32, %c0_i32_0 : i32, i32
  }
  func.func @transform_12(%arg0: i32) -> (i32, i32) {
    %c0_i32 = arith.constant 0 : i32
    %c0_i32_0 = arith.constant 0 : i32
    %c0_i32_1 = arith.constant 0 : i32
    return %c0_i32, %c0_i32_0 : i32, i32
  }
  func.func @transform_13(%arg0: i32) -> (i32, i32) {
    %c0_i32 = arith.constant 0 : i32
    %c0_i32_0 = arith.constant 0 : i32
    %c0_i32_1 = arith.constant 0 : i32
    return %c0_i32, %c0_i32_0 : i32, i32
  }
  func.func @transform_14(%arg0: i32) -> (i32, i32) {
    %c0_i32 = arith.constant 0 : i32
    %c0_i32_0 = arith.constant 0 : i32
    %c0_i32_1 = arith.constant 0 : i32
    return %c0_i32, %c0_i32_0 : i32, i32
  }
  func.func @transform_15(%arg0: i32) -> (i32, i32) {
    %c0_i32 = arith.constant 0 : i32
    %c0_i32_0 = arith.constant 0 : i32
    %c0_i32_1 = arith.constant 0 : i32
    return %c0_i32, %c0_i32_0 : i32, i32
  }
  func.func @transform_16(%arg0: i32) -> (i32, i32, i32) {
    %c0_i32 = arith.constant 0 : i32
    %c0_i32_0 = arith.constant 0 : i32
    %c0_i32_1 = arith.constant 0 : i32
    return %arg0, %c0_i32, %c0_i32_0 : i32, i32, i32
  }
}

module attributes {stable_mosaic.version = 11 : i64} {
  func.func @_layer_kernel(%arg0: i32, %arg1: memref<1x16x128xbf16, #tpu.memory_space<vmem>>, %arg2: memref<1x1x16xf32, #tpu.memory_space<vmem>>, %arg3: memref<1x128xf32, #tpu.memory_space<vmem>>, %arg4: memref<1x128xf32, #tpu.memory_space<vmem>>, %arg5: memref<128x384xbf16, #tpu.memory_space<vmem>>, %arg6: memref<1x384xf32, #tpu.memory_space<vmem>>, %arg7: memref<128x128xbf16, #tpu.memory_space<vmem>>, %arg8: memref<1x128xf32, #tpu.memory_space<vmem>>, %arg9: memref<1x128xf32, #tpu.memory_space<vmem>>, %arg10: memref<1x128xf32, #tpu.memory_space<vmem>>, %arg11: memref<128x512xbf16, #tpu.memory_space<vmem>>, %arg12: memref<1x512xf32, #tpu.memory_space<vmem>>, %arg13: memref<512x128xbf16, #tpu.memory_space<vmem>>, %arg14: memref<1x128xf32, #tpu.memory_space<vmem>>, %arg15: memref<1x128xf32, #tpu.memory_space<vmem>>, %arg16: memref<1x128xf32, #tpu.memory_space<vmem>>, %arg17: memref<1x16x128xbf16, #tpu.memory_space<vmem>>, %arg18: memref<16x128xbf16, #tpu.memory_space<vmem>>) attributes {dimension_semantics = [#tpu.dimension_semantics<parallel>], iteration_bounds = array<i64: 2>, scalar_prefetch = 0 : i64, scratch_operands = 1 : i64, tpu.core_type = #tpu.core_type<tc>, window_params = [{transform_indices = @transform_0, window_bounds = array<i64: 1, 16, 128>}, {transform_indices = @transform_1, window_bounds = array<i64: 1, 1, 16>}, {pipeline_mode = #tpu.pipeline_mode<synchronous>, transform_indices = @transform_2, window_bounds = array<i64: 1, 128>}, {pipeline_mode = #tpu.pipeline_mode<synchronous>, transform_indices = @transform_3, window_bounds = array<i64: 1, 128>}, {pipeline_mode = #tpu.pipeline_mode<synchronous>, transform_indices = @transform_4, window_bounds = array<i64: 128, 384>}, {pipeline_mode = #tpu.pipeline_mode<synchronous>, transform_indices = @transform_5, window_bounds = array<i64: 1, 384>}, {pipeline_mode = #tpu.pipeline_mode<synchronous>, transform_indices = @transform_6, window_bounds = array<i64: 128, 128>}, {pipeline_mode = #tpu.pipeline_mode<synchronous>, transform_indices = @transform_7, window_bounds = array<i64: 1, 128>}, {pipeline_mode = #tpu.pipeline_mode<synchronous>, transform_indices = @transform_8, window_bounds = array<i64: 1, 128>}, {pipeline_mode = #tpu.pipeline_mode<synchronous>, transform_indices = @transform_9, window_bounds = array<i64: 1, 128>}, {pipeline_mode = #tpu.pipeline_mode<synchronous>, transform_indices = @transform_10, window_bounds = array<i64: 128, 512>}, {pipeline_mode = #tpu.pipeline_mode<synchronous>, transform_indices = @transform_11, window_bounds = array<i64: 1, 512>}, {pipeline_mode = #tpu.pipeline_mode<synchronous>, transform_indices = @transform_12, window_bounds = array<i64: 512, 128>}, {pipeline_mode = #tpu.pipeline_mode<synchronous>, transform_indices = @transform_13, window_bounds = array<i64: 1, 128>}, {pipeline_mode = #tpu.pipeline_mode<synchronous>, transform_indices = @transform_14, window_bounds = array<i64: 1, 128>}, {pipeline_mode = #tpu.pipeline_mode<synchronous>, transform_indices = @transform_15, window_bounds = array<i64: 1, 128>}, {transform_indices = @transform_16, window_bounds = array<i64: 1, 16, 128>}]} {
    %c0 = arith.constant 0 : index
    %c0_0 = arith.constant 0 : index
    %c0_1 = arith.constant 0 : index
    %0 = vector.load %arg1[%c0, %c0_0, %c0_1] : memref<1x16x128xbf16, #tpu.memory_space<vmem>>, vector<1x16x128xbf16>
    %1 = vector.shape_cast %0 : vector<1x16x128xbf16> to vector<16x128xbf16>
    %2 = arith.extf %1 : vector<16x128xbf16> to vector<16x128xf32>
    %3 = arith.truncf %2 : vector<16x128xf32> to vector<16x128xbf16>
    %c0_2 = arith.constant 0 : index
    %c0_3 = arith.constant 0 : index
    %4 = vector.load %arg5[%c0_2, %c0_3] : memref<128x384xbf16, #tpu.memory_space<vmem>>, vector<128x384xbf16>
    %cst = arith.constant dense<0.000000e+00> : vector<16x384xf32>
    %5 = tpu.matmul %3, %4, %cst {dimension_numbers = #tpu.dot_dimension_numbers<[1], [0], [0], [1], [0, 0, 1, 1], [], []>} : vector<16x128xbf16>, vector<128x384xbf16>, vector<16x384xf32> -> vector<16x384xf32>
    %c0_4 = arith.constant 0 : index
    %c0_5 = arith.constant 0 : index
    %6 = vector.load %arg6[%c0_4, %c0_5] : memref<1x384xf32, #tpu.memory_space<vmem>>, vector<1x384xf32>
    %7 = vector.broadcast %6 : vector<1x384xf32> to vector<16x384xf32>
    %8 = arith.addf %5, %7 : vector<16x384xf32>
    %c0_6 = arith.constant 0 : index
    %c0_7 = arith.constant 0 : index
    %c0_8 = arith.constant 0 : index
    %9 = vector.load %arg2[%c0_6, %c0_7, %c0_8] : memref<1x1x16xf32, #tpu.memory_space<vmem>>, vector<1x1x16xf32>
    %10 = vector.shape_cast %9 : vector<1x1x16xf32> to vector<1x16xf32>
    %11 = vector.extract_strided_slice %8 {offsets = [0, 0], sizes = [16, 64], strides = [1, 1]} : vector<16x384xf32> to vector<16x64xf32>
    %12 = arith.truncf %11 : vector<16x64xf32> to vector<16x64xbf16>
    %13 = vector.extract_strided_slice %8 {offsets = [0, 128], sizes = [16, 64], strides = [1, 1]} : vector<16x384xf32> to vector<16x64xf32>
    %14 = arith.truncf %13 : vector<16x64xf32> to vector<16x64xbf16>
    %15 = vector.extract_strided_slice %8 {offsets = [0, 256], sizes = [16, 64], strides = [1, 1]} : vector<16x384xf32> to vector<16x64xf32>
    %16 = arith.truncf %15 : vector<16x64xf32> to vector<16x64xbf16>
    %cst_9 = arith.constant dense<0.000000e+00> : vector<16x16xf32>
    %17 = tpu.matmul %12, %14, %cst_9 {dimension_numbers = #tpu.dot_dimension_numbers<[1], [1], [0], [0], [0, 0, 1, 0], [], []>} : vector<16x64xbf16>, vector<16x64xbf16>, vector<16x16xf32> -> vector<16x16xf32>
    %18 = vector.broadcast %10 : vector<1x16xf32> to vector<16x16xf32>
    %19 = arith.addf %17, %18 : vector<16x16xf32>
    %cst_10 = arith.constant dense<0xFF800000> : vector<16xf32>
    %20 = vector.multi_reduction <maximumf>, %19, %cst_10 [1] : vector<16x16xf32> to vector<16xf32>
    %21 = vector.shape_cast %20 : vector<16xf32> to vector<16x1xf32>
    %22 = vector.broadcast %21 : vector<16x1xf32> to vector<16x16xf32>
    %23 = arith.subf %19, %22 : vector<16x16xf32>
    %24 = math.exp %23 : vector<16x16xf32>
    %cst_11 = arith.constant dense<0.000000e+00> : vector<16xf32>
    %25 = vector.multi_reduction <add>, %24, %cst_11 [1] : vector<16x16xf32> to vector<16xf32>
    %26 = vector.shape_cast %25 : vector<16xf32> to vector<16x1xf32>
    %27 = tpu.reciprocal %26 : vector<16x1xf32> -> vector<16x1xf32>
    %28 = vector.broadcast %27 : vector<16x1xf32> to vector<16x16xf32>
    %29 = arith.mulf %24, %28 : vector<16x16xf32>
    %30 = arith.truncf %29 : vector<16x16xf32> to vector<16x16xbf16>
    %cst_12 = arith.constant dense<0.000000e+00> : vector<16x64xf32>
    %31 = tpu.matmul %30, %16, %cst_12 {dimension_numbers = #tpu.dot_dimension_numbers<[1], [0], [0], [1], [0, 0, 1, 1], [], []>} : vector<16x16xbf16>, vector<16x64xbf16>, vector<16x64xf32> -> vector<16x64xf32>
    %32 = arith.truncf %31 : vector<16x64xf32> to vector<16x64xbf16>
    %c0_13 = arith.constant 0 : index
    %c0_14 = arith.constant 0 : index
    %33 = vector.load %arg18[%c0_13, %c0_14] : memref<16x128xbf16, #tpu.memory_space<vmem>>, vector<16x64xbf16>
    tpu.vector_store %arg18[%c0_13, %c0_14], %32 {strides = array<i32>} : memref<16x128xbf16, #tpu.memory_space<vmem>>, vector<16x64xbf16>,
    %34 = vector.extract_strided_slice %8 {offsets = [0, 64], sizes = [16, 64], strides = [1, 1]} : vector<16x384xf32> to vector<16x64xf32>
    %35 = arith.truncf %34 : vector<16x64xf32> to vector<16x64xbf16>
    %36 = vector.extract_strided_slice %8 {offsets = [0, 192], sizes = [16, 64], strides = [1, 1]} : vector<16x384xf32> to vector<16x64xf32>
    %37 = arith.truncf %36 : vector<16x64xf32> to vector<16x64xbf16>
    %38 = vector.extract_strided_slice %8 {offsets = [0, 320], sizes = [16, 64], strides = [1, 1]} : vector<16x384xf32> to vector<16x64xf32>
    %39 = arith.truncf %38 : vector<16x64xf32> to vector<16x64xbf16>
    %cst_15 = arith.constant dense<0.000000e+00> : vector<16x16xf32>
    %40 = tpu.matmul %35, %37, %cst_15 {dimension_numbers = #tpu.dot_dimension_numbers<[1], [1], [0], [0], [0, 0, 1, 0], [], []>} : vector<16x64xbf16>, vector<16x64xbf16>, vector<16x16xf32> -> vector<16x16xf32>
    %41 = vector.broadcast %10 : vector<1x16xf32> to vector<16x16xf32>
    %42 = arith.addf %40, %41 : vector<16x16xf32>
    %cst_16 = arith.constant dense<0xFF800000> : vector<16xf32>
    %43 = vector.multi_reduction <maximumf>, %42, %cst_16 [1] : vector<16x16xf32> to vector<16xf32>
    %44 = vector.shape_cast %43 : vector<16xf32> to vector<16x1xf32>
    %45 = vector.broadcast %44 : vector<16x1xf32> to vector<16x16xf32>
    %46 = arith.subf %42, %45 : vector<16x16xf32>
    %47 = math.exp %46 : vector<16x16xf32>
    %cst_17 = arith.constant dense<0.000000e+00> : vector<16xf32>
    %48 = vector.multi_reduction <add>, %47, %cst_17 [1] : vector<16x16xf32> to vector<16xf32>
    %49 = vector.shape_cast %48 : vector<16xf32> to vector<16x1xf32>
    %50 = tpu.reciprocal %49 : vector<16x1xf32> -> vector<16x1xf32>
    %51 = vector.broadcast %50 : vector<16x1xf32> to vector<16x16xf32>
    %52 = arith.mulf %47, %51 : vector<16x16xf32>
    %53 = arith.truncf %52 : vector<16x16xf32> to vector<16x16xbf16>
    %cst_18 = arith.constant dense<0.000000e+00> : vector<16x64xf32>
    %54 = tpu.matmul %53, %39, %cst_18 {dimension_numbers = #tpu.dot_dimension_numbers<[1], [0], [0], [1], [0, 0, 1, 1], [], []>} : vector<16x16xbf16>, vector<16x64xbf16>, vector<16x64xf32> -> vector<16x64xf32>
    %55 = arith.truncf %54 : vector<16x64xf32> to vector<16x64xbf16>
    %c0_19 = arith.constant 0 : index
    %c64 = arith.constant 64 : index
    %56 = vector.load %arg18[%c0_19, %c64] : memref<16x128xbf16, #tpu.memory_space<vmem>>, vector<16x64xbf16>
    tpu.vector_store %arg18[%c0_19, %c64], %55 {strides = array<i32>} : memref<16x128xbf16, #tpu.memory_space<vmem>>, vector<16x64xbf16>,
    %c0_20 = arith.constant 0 : index
    %c0_21 = arith.constant 0 : index
    %57 = vector.load %arg18[%c0_20, %c0_21] : memref<16x128xbf16, #tpu.memory_space<vmem>>, vector<16x128xbf16>
    %c0_22 = arith.constant 0 : index
    %c0_23 = arith.constant 0 : index
    %58 = vector.load %arg7[%c0_22, %c0_23] : memref<128x128xbf16, #tpu.memory_space<vmem>>, vector<128x128xbf16>
    %cst_24 = arith.constant dense<0.000000e+00> : vector<16x128xf32>
    %59 = tpu.matmul %57, %58, %cst_24 {dimension_numbers = #tpu.dot_dimension_numbers<[1], [0], [0], [1], [0, 0, 1, 1], [], []>} : vector<16x128xbf16>, vector<128x128xbf16>, vector<16x128xf32> -> vector<16x128xf32>
    %c0_25 = arith.constant 0 : index
    %c0_26 = arith.constant 0 : index
    %60 = vector.load %arg8[%c0_25, %c0_26] : memref<1x128xf32, #tpu.memory_space<vmem>>, vector<1x128xf32>
    %61 = vector.broadcast %60 : vector<1x128xf32> to vector<16x128xf32>
    %62 = arith.addf %59, %61 : vector<16x128xf32>
    %63 = arith.addf %62, %2 : vector<16x128xf32>
    %c0_27 = arith.constant 0 : index
    %c0_28 = arith.constant 0 : index
    %64 = vector.load %arg9[%c0_27, %c0_28] : memref<1x128xf32, #tpu.memory_space<vmem>>, vector<1x128xf32>
    %c0_29 = arith.constant 0 : index
    %c0_30 = arith.constant 0 : index
    %65 = vector.load %arg10[%c0_29, %c0_30] : memref<1x128xf32, #tpu.memory_space<vmem>>, vector<1x128xf32>
    %cst_31 = arith.constant dense<0.000000e+00> : vector<16xf32>
    %66 = vector.multi_reduction <add>, %63, %cst_31 [1] : vector<16x128xf32> to vector<16xf32>
    %67 = vector.shape_cast %66 : vector<16xf32> to vector<16x1xf32>
    %cst_32 = arith.constant 1.280000e+02 : f32
    %68 = vector.broadcast %cst_32 : f32 to vector<16x1xf32>
    %69 = arith.divf %67, %68 : vector<16x1xf32>
    %70 = vector.broadcast %69 : vector<16x1xf32> to vector<16x128xf32>
    %71 = arith.subf %63, %70 : vector<16x128xf32>
    %72 = arith.mulf %71, %71 : vector<16x128xf32>
    %cst_33 = arith.constant dense<0.000000e+00> : vector<16xf32>
    %73 = vector.multi_reduction <add>, %72, %cst_33 [1] : vector<16x128xf32> to vector<16xf32>
    %74 = vector.shape_cast %73 : vector<16xf32> to vector<16x1xf32>
    %cst_34 = arith.constant 1.280000e+02 : f32
    %75 = vector.broadcast %cst_34 : f32 to vector<16x1xf32>
    %76 = arith.divf %74, %75 : vector<16x1xf32>
    %77 = vector.broadcast %69 : vector<16x1xf32> to vector<16x128xf32>
    %78 = arith.subf %63, %77 : vector<16x128xf32>
    %cst_35 = arith.constant 9.99999974E-6 : f32
    %79 = vector.broadcast %cst_35 : f32 to vector<16x1xf32>
    %80 = arith.addf %76, %79 : vector<16x1xf32>
    %81 = math.rsqrt %80 : vector<16x1xf32>
    %82 = vector.broadcast %81 : vector<16x1xf32> to vector<16x128xf32>
    %83 = arith.mulf %78, %82 : vector<16x128xf32>
    %84 = vector.broadcast %64 : vector<1x128xf32> to vector<16x128xf32>
    %85 = arith.mulf %83, %84 : vector<16x128xf32>
    %86 = vector.broadcast %65 : vector<1x128xf32> to vector<16x128xf32>
    %87 = arith.addf %85, %86 : vector<16x128xf32>
    %88 = arith.truncf %87 : vector<16x128xf32> to vector<16x128xbf16>
    %c0_36 = arith.constant 0 : index
    %c0_37 = arith.constant 0 : index
    %89 = vector.load %arg11[%c0_36, %c0_37] : memref<128x512xbf16, #tpu.memory_space<vmem>>, vector<128x512xbf16>
    %cst_38 = arith.constant dense<0.000000e+00> : vector<16x512xf32>
    %90 = tpu.matmul %88, %89, %cst_38 {dimension_numbers = #tpu.dot_dimension_numbers<[1], [0], [0], [1], [0, 0, 1, 1], [], []>} : vector<16x128xbf16>, vector<128x512xbf16>, vector<16x512xf32> -> vector<16x512xf32>
    %c0_39 = arith.constant 0 : index
    %c0_40 = arith.constant 0 : index
    %91 = vector.load %arg12[%c0_39, %c0_40] : memref<1x512xf32, #tpu.memory_space<vmem>>, vector<1x512xf32>
    %92 = vector.broadcast %91 : vector<1x512xf32> to vector<16x512xf32>
    %93 = arith.addf %90, %92 : vector<16x512xf32>
    %94 = arith.mulf %93, %93 : vector<16x512xf32>
    %95 = arith.mulf %93, %94 : vector<16x512xf32>
    %cst_41 = arith.constant 4.471500e-02 : f32
    %96 = vector.broadcast %cst_41 : f32 to vector<16x512xf32>
    %97 = arith.mulf %96, %95 : vector<16x512xf32>
    %98 = arith.addf %93, %97 : vector<16x512xf32>
    %cst_42 = arith.constant 0.797884583 : f32
    %99 = vector.broadcast %cst_42 : f32 to vector<16x512xf32>
    %100 = arith.mulf %99, %98 : vector<16x512xf32>
    %101 = math.tanh %100 : vector<16x512xf32>
    %cst_43 = arith.constant 1.000000e+00 : f32
    %102 = vector.broadcast %cst_43 : f32 to vector<16x512xf32>
    %103 = arith.addf %102, %101 : vector<16x512xf32>
    %cst_44 = arith.constant 5.000000e-01 : f32
    %104 = vector.broadcast %cst_44 : f32 to vector<16x512xf32>
    %105 = arith.mulf %104, %103 : vector<16x512xf32>
    %106 = arith.mulf %93, %105 : vector<16x512xf32>
    %107 = arith.truncf %106 : vector<16x512xf32> to vector<16x512xbf16>
    %c0_45 = arith.constant 0 : index
    %c0_46 = arith.constant 0 : index
    %108 = vector.load %arg13[%c0_45, %c0_46] : memref<512x128xbf16, #tpu.memory_space<vmem>>, vector<512x128xbf16>
    %cst_47 = arith.constant dense<0.000000e+00> : vector<16x128xf32>
    %109 = tpu.matmul %107, %108, %cst_47 {dimension_numbers = #tpu.dot_dimension_numbers<[1], [0], [0], [1], [0, 0, 1, 1], [], []>} : vector<16x512xbf16>, vector<512x128xbf16>, vector<16x128xf32> -> vector<16x128xf32>
    %c0_48 = arith.constant 0 : index
    %c0_49 = arith.constant 0 : index
    %110 = vector.load %arg14[%c0_48, %c0_49] : memref<1x128xf32, #tpu.memory_space<vmem>>, vector<1x128xf32>
    %111 = vector.broadcast %110 : vector<1x128xf32> to vector<16x128xf32>
    %112 = arith.addf %109, %111 : vector<16x128xf32>
    %113 = arith.addf %112, %87 : vector<16x128xf32>
    %c0_50 = arith.constant 0 : index
    %c0_51 = arith.constant 0 : index
    %114 = vector.load %arg15[%c0_50, %c0_51] : memref<1x128xf32, #tpu.memory_space<vmem>>, vector<1x128xf32>
    %c0_52 = arith.constant 0 : index
    %c0_53 = arith.constant 0 : index
    %115 = vector.load %arg16[%c0_52, %c0_53] : memref<1x128xf32, #tpu.memory_space<vmem>>, vector<1x128xf32>
    %cst_54 = arith.constant dense<0.000000e+00> : vector<16xf32>
    %116 = vector.multi_reduction <add>, %113, %cst_54 [1] : vector<16x128xf32> to vector<16xf32>
    %117 = vector.shape_cast %116 : vector<16xf32> to vector<16x1xf32>
    %cst_55 = arith.constant 1.280000e+02 : f32
    %118 = vector.broadcast %cst_55 : f32 to vector<16x1xf32>
    %119 = arith.divf %117, %118 : vector<16x1xf32>
    %120 = vector.broadcast %119 : vector<16x1xf32> to vector<16x128xf32>
    %121 = arith.subf %113, %120 : vector<16x128xf32>
    %122 = arith.mulf %121, %121 : vector<16x128xf32>
    %cst_56 = arith.constant dense<0.000000e+00> : vector<16xf32>
    %123 = vector.multi_reduction <add>, %122, %cst_56 [1] : vector<16x128xf32> to vector<16xf32>
    %124 = vector.shape_cast %123 : vector<16xf32> to vector<16x1xf32>
    %cst_57 = arith.constant 1.280000e+02 : f32
    %125 = vector.broadcast %cst_57 : f32 to vector<16x1xf32>
    %126 = arith.divf %124, %125 : vector<16x1xf32>
    %127 = vector.broadcast %119 : vector<16x1xf32> to vector<16x128xf32>
    %128 = arith.subf %113, %127 : vector<16x128xf32>
    %cst_58 = arith.constant 9.99999974E-6 : f32
    %129 = vector.broadcast %cst_58 : f32 to vector<16x1xf32>
    %130 = arith.addf %126, %129 : vector<16x1xf32>
    %131 = math.rsqrt %130 : vector<16x1xf32>
    %132 = vector.broadcast %131 : vector<16x1xf32> to vector<16x128xf32>
    %133 = arith.mulf %128, %132 : vector<16x128xf32>
    %134 = vector.broadcast %114 : vector<1x128xf32> to vector<16x128xf32>
    %135 = arith.mulf %133, %134 : vector<16x128xf32>
    %136 = vector.broadcast %115 : vector<1x128xf32> to vector<16x128xf32>
    %137 = arith.addf %135, %136 : vector<16x128xf32>
    %138 = vector.shape_cast %137 : vector<16x128xf32> to vector<1x16x128xf32>
    %139 = arith.truncf %138 : vector<1x16x128xf32> to vector<1x16x128xbf16>
    %c0_59 = arith.constant 0 : index
    %c0_60 = arith.constant 0 : index
    %c0_61 = arith.constant 0 : index
    %140 = vector.load %arg17[%c0_59, %c0_60, %c0_61] : memref<1x16x128xbf16, #tpu.memory_space<vmem>>, vector<1x16x128xbf16>
    tpu.vector_store %arg17[%c0_59, %c0_60, %c0_61], %139 {strides = array<i32>} : memref<1x16x128xbf16, #tpu.memory_space<vmem>>, vector<1x16x128xbf16>,
    return
  }
  func.func @transform_0(%arg0: i32) -> (i32, i32, i32) {
    %c0_i32 = arith.constant 0 : i32
    %c0_i32_0 = arith.constant 0 : i32
    %c0_i32_1 = arith.constant 0 : i32
    return %arg0, %c0_i32, %c0_i32_0 : i32, i32, i32
  }
  func.func @transform_1(%arg0: i32) -> (i32, i32, i32) {
    %c0_i32 = arith.constant 0 : i32
    %c0_i32_0 = arith.constant 0 : i32
    %c0_i32_1 = arith.constant 0 : i32
    return %arg0, %c0_i32, %c0_i32_0 : i32, i32, i32
  }
  func.func @transform_2(%arg0: i32) -> (i32, i32) {
    %c0_i32 = arith.constant 0 : i32
    %c0_i32_0 = arith.constant 0 : i32
    %c0_i32_1 = arith.constant 0 : i32
    return %c0_i32, %c0_i32_0 : i32, i32
  }
  func.func @transform_3(%arg0: i32) -> (i32, i32) {
    %c0_i32 = arith.constant 0 : i32
    %c0_i32_0 = arith.constant 0 : i32
    %c0_i32_1 = arith.constant 0 : i32
    return %c0_i32, %c0_i32_0 : i32, i32
  }
  func.func @transform_4(%arg0: i32) -> (i32, i32) {
    %c0_i32 = arith.constant 0 : i32
    %c0_i32_0 = arith.constant 0 : i32
    %c0_i32_1 = arith.constant 0 : i32
    return %c0_i32, %c0_i32_0 : i32, i32
  }
  func.func @transform_5(%arg0: i32) -> (i32, i32) {
    %c0_i32 = arith.constant 0 : i32
    %c0_i32_0 = arith.constant 0 : i32
    %c0_i32_1 = arith.constant 0 : i32
    return %c0_i32, %c0_i32_0 : i32, i32
  }
  func.func @transform_6(%arg0: i32) -> (i32, i32) {
    %c0_i32 = arith.constant 0 : i32
    %c0_i32_0 = arith.constant 0 : i32
    %c0_i32_1 = arith.constant 0 : i32
    return %c0_i32, %c0_i32_0 : i32, i32
  }
  func.func @transform_7(%arg0: i32) -> (i32, i32) {
    %c0_i32 = arith.constant 0 : i32
    %c0_i32_0 = arith.constant 0 : i32
    %c0_i32_1 = arith.constant 0 : i32
    return %c0_i32, %c0_i32_0 : i32, i32
  }
  func.func @transform_8(%arg0: i32) -> (i32, i32) {
    %c0_i32 = arith.constant 0 : i32
    %c0_i32_0 = arith.constant 0 : i32
    %c0_i32_1 = arith.constant 0 : i32
    return %c0_i32, %c0_i32_0 : i32, i32
  }
  func.func @transform_9(%arg0: i32) -> (i32, i32) {
    %c0_i32 = arith.constant 0 : i32
    %c0_i32_0 = arith.constant 0 : i32
    %c0_i32_1 = arith.constant 0 : i32
    return %c0_i32, %c0_i32_0 : i32, i32
  }
  func.func @transform_10(%arg0: i32) -> (i32, i32) {
    %c0_i32 = arith.constant 0 : i32
    %c0_i32_0 = arith.constant 0 : i32
    %c0_i32_1 = arith.constant 0 : i32
    return %c0_i32, %c0_i32_0 : i32, i32
  }
  func.func @transform_11(%arg0: i32) -> (i32, i32) {
    %c0_i32 = arith.constant 0 : i32
    %c0_i32_0 = arith.constant 0 : i32
    %c0_i32_1 = arith.constant 0 : i32
    return %c0_i32, %c0_i32_0 : i32, i32
  }
  func.func @transform_12(%arg0: i32) -> (i32, i32) {
    %c0_i32 = arith.constant 0 : i32
    %c0_i32_0 = arith.constant 0 : i32
    %c0_i32_1 = arith.constant 0 : i32
    return %c0_i32, %c0_i32_0 : i32, i32
  }
  func.func @transform_13(%arg0: i32) -> (i32, i32) {
    %c0_i32 = arith.constant 0 : i32
    %c0_i32_0 = arith.constant 0 : i32
    %c0_i32_1 = arith.constant 0 : i32
    return %c0_i32, %c0_i32_0 : i32, i32
  }
  func.func @transform_14(%arg0: i32) -> (i32, i32) {
    %c0_i32 = arith.constant 0 : i32
    %c0_i32_0 = arith.constant 0 : i32
    %c0_i32_1 = arith.constant 0 : i32
    return %c0_i32, %c0_i32_0 : i32, i32
  }
  func.func @transform_15(%arg0: i32) -> (i32, i32) {
    %c0_i32 = arith.constant 0 : i32
    %c0_i32_0 = arith.constant 0 : i32
    %c0_i32_1 = arith.constant 0 : i32
    return %c0_i32, %c0_i32_0 : i32, i32
  }
  func.func @transform_16(%arg0: i32) -> (i32, i32, i32) {
    %c0_i32 = arith.constant 0 : i32
    %c0_i32_0 = arith.constant 0 : i32
    %c0_i32_1 = arith.constant 0 : i32
    return %arg0, %c0_i32, %c0_i32_0 : i32, i32, i32
  }
}

</mosaic_0001>

<bundles_post_ra>
// kernel: model_forward.5
= control target key start
LH: loop header
LB: loop body
LE: loop exit
PB: predicated region body
PF: predicated region fallthrough
CT: control target
= control target key end

     0   :  { %s452_s12 = smov 0   ;;  %s496_s0 = inlined_call_operand.vmem [shape: bf16[32,128], index: 0, kind: input, shape index: {}]   ;;  %s497_s1 = inlined_call_operand.vmem [shape: bf16[128,128], index: 1, kind: input, shape index: {}]   ;;  %s498_s2 = inlined_call_operand.vmem [shape: f32[1,128], index: 2, kind: input, shape index: {}]   ;;  %s499_s3 = inlined_call_operand.vmem [shape: f32[32,128], index: 3, kind: output, shape index: {}]  }
   0x1 LB: > { %s353_s13 = sadd.s32 4294967295, %s428_s12   ;;  %p357_p0 = scmp.ge.s32.totalorder %s428_s12, 1  ;;  %s428_s12 = sphi %s452_s12, %s13_s12  }
   0x2   : > { %p138_p1 = scmp.lt.s32.totalorder %s428_s12, 3 }
   0x4   : > { %p139_p2 = pnand %p357_p0, %p138_p1 }
   0x5   : > { %v413_v0 = vld [vmem:[%s497_s1] sm:$0xff] (!%p139_p2)   ;;  %v430_v1 = vmov (!%p139_p2), 0.0   ;;  %v414_v2 = vld [vmem:[%s497_s1 + $0x8] sm:$0xff] (!%p139_p2)   ;;  %vm431_vm0 = vmmov (!%p139_p2), 0   ;;  %s358_s18 = sshll.u32 (!%p139_p2), %s353_s13, 1  ;;  %v415_v3 = vld [vmem:[%s497_s1 + $0x10] sm:$0xff] (!%p139_p2)  }
   0x6   : > { %142 = sbr.rel (%p139_p2) target bundleno = 255 (0xff), region = 32  ;;  %383 = vmatprep.subr.bf16.mxu0 (!%p139_p2), %v430_v1  ;;  %399 = vmatprep.mubr.msk.bf16.mxu0 (!%p139_p2), %vm431_vm0, %v430_v1  ;;  %p163_p3 = scmp.lt.s32.totalorder (!%p139_p2), %s358_s18, 3  ;;  %v416_v4 = vld [vmem:[%s497_s1 + $0x18] sm:$0xff] (!%p139_p2)   ;;  %v417_v5 = vld [vmem:[%s497_s1 + $0x20] sm:$0xff] (!%p139_p2)   ;;  %v418_v6 = vld [vmem:[%s497_s1 + $0x28] sm:$0xff] (!%p139_p2)  }
   0x7   : > { %384 = vmatpush3.bf16.msra.mxu0 (!%p139_p2), %v413_v0  ;;  %v419_v7 = vld [vmem:[%s497_s1 + $0x30] sm:$0xff] (!%p139_p2)   ;;  %v420_v8 = vld [vmem:[%s497_s1 + $0x38] sm:$0xff] (!%p139_p2)   ;;  %v362_v10 = vld [vmem:[%s498_s2] ss:$0 sm:$0xff] (!%p139_p2) }
   0x8   : > { %385 = vmatprep.subr.bf16.mxu0 (!%p139_p2), %v430_v1 }
   0xb   : > { %386 = vmatpush3.bf16.msra.mxu0 (!%p139_p2), %v414_v2 }
   0xc   : > { %387 = vmatprep.subr.bf16.mxu0 (!%p139_p2), %v430_v1 }
   0xd   : > { %s501_s18 = smov (!%p163_p3, %s358_s18), 3 }
   0xe   : > { %s359_s21 = sshll.u32 %s501_s18, 2  ;;  %s361_s8 = sshll.u32 %s501_s18, 3 }
   0xf   : > { %s166_s24 = scalar_lea.vmem %s496_s0, %s359_s21  ;;  %388 = vmatpush3.bf16.msra.mxu0 %v415_v3  ;;  %s172_s14 = scalar_lea.vmem %s499_s3, %s361_s8 }
  0x10   : > { %389 = vmatprep.subr.bf16.mxu0 %v430_v1  ;;  %v421_v9 = vld [vmem:[%s166_s24] sm:$0xff]  }
  0x13   : > { %390 = vmatpush3.bf16.msra.mxu0 %v416_v4 }
  0x14   : > { %391 = vmatprep.subr.bf16.mxu0 %v430_v1 }
  0x17   : > { %392 = vmatpush3.bf16.msra.mxu0 %v417_v5 }
  0x18   : > { %393 = vmatprep.subr.bf16.mxu0 %v430_v1 }
  0x1b   : > { %394 = vmatpush3.bf16.msra.mxu0 %v418_v6 }
  0x1c   : > { %395 = vmatprep.subr.bf16.mxu0 %v430_v1 }
  0x1f   : > { %396 = vmatpush3.bf16.msra.mxu0 %v419_v7 }
  0x20   : > { %397 = vmatprep.subr.bf16.mxu0 %v430_v1 }
  0x23   : > { %398 = vmatpush3.bf16.msra.mxu0 %v420_v8 }
  0x26   : > { %400 = vmatmul.mubr.bf16.vlgmr.msra.gmra.mrb[0].mxu0 %v421_v9 }
  0xf9   : > { %v288_v11 = vpop.f32.mrb[0].mxu0 }
  0xfa   : > { %v289_v12 = vadd.f32 %v362_v10, %v288_v11  ;;  %v401_v13 = vpop.f32.mrb[1].mxu0 }
  0xfb   : > { %v291_v14 = vpop.f32.mrb[2].mxu0 }
  0xfc   : > { %295 = vst [vmem:[%s172_s14] sm:$0xff] %v289_v12  ;;  %v292_v15 = vadd.f32 %v362_v10, %v291_v14  ;;  %v402_v16 = vpop.f32.mrb[3].mxu0 }
  0xfe   : > { %296 = vst [vmem:[%s172_s14 + $0x8] sm:$0xff] %v292_v15 }
  0xff PF: > { %s13_s12 = sadd.s32 1, %s428_s12  }
 0x100   : > { %p10_p4 = scmp.ge.s32.totalorder %s13_s12, 4  }
 0x102   :  { %12 = sbr.rel (!%p10_p4) target bundleno = 1 (0x1), region = 62 }

// kernel: model_forward.4
= control target key start
LH: loop header
LB: loop body
LE: loop exit
PB: predicated region body
PF: predicated region fallthrough
CT: control target
= control target key end

     0   :  { %s2596_s19 = smov 0   ;;  %s3092_s0 = inlined_call_operand.vmem [shape: bf16[2,16,128], index: 0, kind: input, shape index: {}]   ;;  %s3093_s1 = inlined_call_operand.vmem [shape: f32[2,1,16], index: 1, kind: input, shape index: {}]   ;;  %s3094_s2 = inlined_call_operand.vmem [shape: f32[1,128], index: 2, kind: input, shape index: {}]   ;;  %s3095_s3 = inlined_call_operand.vmem [shape: f32[1,128], index: 3, kind: input, shape index: {}]   ;;  %s3096_s4 = inlined_call_operand.vmem [shape: bf16[128,384], index: 4, kind: input, shape index: {}]   ;;  %s3097_s5 = inlined_call_operand.vmem [shape: f32[1,384], index: 5, kind: input, shape index: {}]   ;;  %s3098_s6 = inlined_call_operand.vmem [shape: bf16[128,128], index: 6, kind: input, shape index: {}]   ;;  %s3099_s7 = inlined_call_operand.vmem [shape: f32[1,128], index: 7, kind: input, shape index: {}]   ;;  %s3100_s8 = inlined_call_operand.vmem [shape: f32[1,128], index: 8, kind: input, shape index: {}]   ;;  %s3101_s9 = inlined_call_operand.vmem [shape: f32[1,128], index: 9, kind: input, shape index: {}]   ;;  %s3102_s10 = inlined_call_operand.vmem [shape: bf16[128,512], index: 10, kind: input, shape index: {}]   ;;  %s3103_s11 = inlined_call_operand.vmem [shape: f32[1,512], index: 11, kind: input, shape index: {}]   ;;  %s3104_s12 = inlined_call_operand.vmem [shape: bf16[512,128], index: 12, kind: input, shape index: {}]   ;;  %s3105_s13 = inlined_call_operand.vmem [shape: f32[1,128], index: 13, kind: input, shape index: {}]   ;;  %s3106_s14 = inlined_call_operand.vmem [shape: f32[1,128], index: 14, kind: input, shape index: {}]   ;;  %s3107_s15 = inlined_call_operand.vmem [shape: f32[1,128], index: 15, kind: input, shape index: {}]   ;;  %s3108_s16 = inlined_call_operand.vmem [shape: bf16[2,16,128], index: 16, kind: output, shape index: {}]  }
   0x1   :  { %3109 = sst [smem:[#allocation3_spill]] %s3092_s0 }
   0x2 LB: > { %s2061_s20 = sadd.s32 4294967295, %s2505_s19   ;;  %p2065_p0 = scmp.ge.s32.totalorder %s2505_s19, 1  ;;  %s2505_s19 = sphi %s2596_s19, %s26_s19  }
   0x3   : > { %p470_p1 = scmp.lt.s32.totalorder %s2505_s19, 3 }
   0x5   : > { %p471_p2 = pnand %p2065_p0, %p470_p1 }
   0x6   : > { %v2337_v0 = vld [vmem:[%s3096_s4 + $0x4] ss:$12 sps:$4 sm:$0xff] (!%p471_p2)   ;;  %v2339_v1 = vld [vmem:[%s3096_s4] ss:$12 sps:$4 sm:$0xff] (!%p471_p2)   ;;  %v2507_v2 = vmov (!%p471_p2), 0   ;;  %v2508_v4 = vmov (!%p471_p2), 0.0   ;;  %v575_v27 = vlaneseq (!%p471_p2) }
   0x7   : > { %474 = sbr.rel (%p471_p2) target bundleno = 2997 (0xbb5), region = 84  ;;  %756 = vmatprep.mubr.bf16.mxu0 (!%p471_p2), %v2507_v2  ;;  %724 = vmatprep.subr.bf16.mxu0 (!%p471_p2), %v2337_v0  ;;  %v2340_v3 = vld [vmem:[%s3096_s4 + $0x1c] ss:$12 sps:$4 sm:$0xff] (!%p471_p2)   ;;  %v2342_v5 = vld [vmem:[%s3096_s4 + $0x18] ss:$12 sps:$4 sm:$0xff] (!%p471_p2)   ;;  %p523_p3 = scmp.lt.s32.totalorder (!%p471_p2), %s2061_s20, 1 }
   0x8   : > { %2261 = vmatprep.subr.bf16.mxu1 (!%p471_p2), %v2508_v4  ;;  %725 = vmatpush1.bf16.msra.mxu0 (!%p471_p2), %v2339_v1  ;;  %v2343_v6 = vld [vmem:[%s3096_s4 + $0x34] ss:$12 sps:$4 sm:$0xff] (!%p471_p2)   ;;  %v2345_v7 = vld [vmem:[%s3096_s4 + $0x30] ss:$12 sps:$4 sm:$0xff] (!%p471_p2)   ;;  %v2346_v8 = vld [vmem:[%s3096_s4 + $0x4c] ss:$12 sps:$4 sm:$0xff] (!%p471_p2)  }
   0x9   : > { %726 = vmatprep.subr.bf16.mxu0 (!%p471_p2), %v2340_v3  ;;  %v2348_v9 = vld [vmem:[%s3096_s4 + $0x48] ss:$12 sps:$4 sm:$0xff] (!%p471_p2)   ;;  %v2349_v11 = vld [vmem:[%s3096_s4 + $0x64] ss:$12 sps:$4 sm:$0xff] (!%p471_p2)   ;;  %v2363_v12 = vld [vmem:[%s3096_s4 + $0x20] ss:$12 sps:$4 sm:$0xff] (!%p471_p2)  }
   0xa   : > { %v2362_v10 = vld [vmem:[%s3096_s4 + $0x8] ss:$12 sps:$4 sm:$0xff] (!%p471_p2)   ;;  %v2351_v13 = vld [vmem:[%s3096_s4 + $0x60] ss:$12 sps:$4 sm:$0xff] (!%p471_p2)   ;;  %v2354_v15 = vld [vmem:[%s3096_s4 + $0x78] ss:$12 sps:$4 sm:$0xff] (!%p471_p2)  }
   0xb   : > { %2262 = vmatpush3.bf16.msra.mxu1 (!%p471_p2), %v2362_v10  ;;  %v2352_v14 = vld [vmem:[%s3096_s4 + $0x7c] ss:$12 sps:$4 sm:$0xff] (!%p471_p2)   ;;  %v2364_v16 = vld [vmem:[%s3096_s4 + $0x38] ss:$12 sps:$4 sm:$0xff] (!%p471_p2)   ;;  %v2355_v17 = vld [vmem:[%s3096_s4 + $0x94] ss:$12 sps:$4 sm:$0xff] (!%p471_p2)  }
   0xc   : > { %727 = vmatpush1.bf16.msra.mxu0 (!%p471_p2), %v2342_v5  ;;  %2263 = vmatprep.subr.bf16.mxu1 (!%p471_p2), %v2508_v4  ;;  %v2365_v18 = vld [vmem:[%s3096_s4 + $0x50] ss:$12 sps:$4 sm:$0xff] (!%p471_p2)   ;;  %v2358_v20 = vld [vmem:[%s3096_s4 + $0xac] ss:$12 sps:$4 sm:$0xff] (!%p471_p2)   ;;  %s3110_s30 = sld [smem:[#allocation3_spill]] (!%p471_p2)  ;;  %vm2509_vm0 = vmmov (!%p471_p2), 0  }
   0xd   : > { %728 = vmatprep.subr.bf16.mxu0 (!%p471_p2), %v2343_v6  ;;  %v2357_v19 = vld [vmem:[%s3096_s4 + $0x90] ss:$12 sps:$4 sm:$0xff] (!%p471_p2)   ;;  %v2366_v21 = vld [vmem:[%s3096_s4 + $0x68] ss:$12 sps:$4 sm:$0xff] (!%p471_p2)   ;;  %v2367_v24 = vld [vmem:[%s3096_s4 + $0x80] ss:$12 sps:$4 sm:$0xff] (!%p471_p2)   ;;  %2277 = vmatprep.mubr.msk.bf16.mxu1 (!%p471_p2), %vm2509_vm0, %v2508_v4 }
   0xe   : > { %s3112_s20 = smov (!%p523_p3, %s2061_s20), 1  ;;  %v2360_v22 = vld [vmem:[%s3096_s4 + $0xa8] ss:$12 sps:$4 sm:$0xff]   ;;  %v2368_v25 = vld [vmem:[%s3096_s4 + $0x98] ss:$12 sps:$4 sm:$0xff]   ;;  %v2705_v28 = vshrl.u32 %v575_v27, 7 }
   0xf   : > { %s2182_s26 = sshll.u32 %s3112_s20, 3  ;;  %2264 = vmatpush3.bf16.msra.mxu1 %v2363_v12  ;;  %v2369_v26 = vld [vmem:[%s3096_s4 + $0xb0] ss:$12 sps:$4 sm:$0xff]   ;;  %v573_v30 = vld [vmem:[%s3097_s5] sm:$0x7]  ;;  %vm818_vm1 = vcmask 523264   ;;  %s530_s18 = scalar_lea.vmem %s3093_s1, %s3112_s20 }
  0x10   : > { %729 = vmatpush1.bf16.msra.mxu0 %v2345_v7  ;;  %2265 = vmatprep.subr.bf16.mxu1 %v2508_v4  ;;  %v577_v29 = vsub.s32 0, %v2705_v28  ;;  %v581_v31 = vsub.s32 1, %v2705_v28  ;;  %v585_v45 = vsub.s32 2, %v2705_v28  ;;  %v2095_v54 = vld [vmem:[%s530_s18] ss:$0 sm:$0xff]  ;;  %vm866_vm2 = vcmask 130048   ;;  %s535_s27 = scalar_lea.vmem %s3108_s16, %s2182_s26 }
  0x11   : > { %730 = vmatprep.subr.bf16.mxu0 %v2346_v8  ;;  %s2510_s2 = smov 64   ;;  %vm1065_vm3 = vcmask 1048064  }
  0x12   : > { %s527_s17 = scalar_lea.vmem %s3110_s30, %s2182_s26  ;;  %v578_v32 = vrot.slane %v573_v30, %v577_v29  ;;  %v582_v34 = vrot.slane %v573_v30, %v581_v31  ;;  %v586_v46 = vrot.slane %v573_v30, %v585_v45 }
  0x13   : > { %2266 = vmatpush3.bf16.msra.mxu1 %v2364_v16  ;;  %v2680_v23 = vld [vmem:[%s527_s17] sm:$0xff]  }
  0x14   : > { %731 = vmatpush1.bf16.msra.mxu0 %v2348_v9  ;;  %2267 = vmatprep.subr.bf16.mxu1 %v2508_v4 }
  0x15   : > { %732 = vmatprep.subr.bf16.mxu0 %v2349_v11 }
  0x17   : > { %2268 = vmatpush3.bf16.msra.mxu1 %v2365_v18 }
  0x18   : > { %733 = vmatpush1.bf16.msra.mxu0 %v2351_v13  ;;  %2269 = vmatprep.subr.bf16.mxu1 %v2508_v4 }
  0x19   : > { %734 = vmatprep.subr.bf16.mxu0 %v2352_v14 }
  0x1b   : > { %2270 = vmatpush3.bf16.msra.mxu1 %v2366_v21 }
  0x1c   : > { %735 = vmatpush1.bf16.msra.mxu0 %v2354_v15  ;;  %2271 = vmatprep.subr.bf16.mxu1 %v2508_v4 }
  0x1d   : > { %736 = vmatprep.subr.bf16.mxu0 %v2355_v17 }
  0x1f   : > { %2272 = vmatpush3.bf16.msra.mxu1 %v2367_v24 }
  0x20   : > { %737 = vmatpush1.bf16.msra.mxu0 %v2357_v19  ;;  %2273 = vmatprep.subr.bf16.mxu1 %v2508_v4 }
  0x21   : > { %738 = vmatprep.subr.bf16.mxu0 %v2358_v20 }
  0x23   : > { %2274 = vmatpush3.bf16.msra.mxu1 %v2368_v25 }
  0x24   : > { %739 = vmatpush1.bf16.msra.mxu0 %v2360_v22  ;;  %2275 = vmatprep.subr.bf16.mxu1 %v2508_v4 }
  0x25   : > { %2305 = vmatprep.subr.bf16.mxu0 %v2508_v4 }
  0x27   : > { %757 = vmatmul.mubr.bf16.vlgmr.msra.gmra.mrb[0].mxu0 %v2680_v23  ;;  %2276 = vmatpush3.bf16.msra.mxu1 %v2369_v26 }
  0x28   : > { %2281 = vmatprep.subr.bf16.mxu1 %v2508_v4  ;;  %2321 = vmatprep.mubr.msk.bf16.mxu0 %vm2509_vm0, %v2508_v4 }
  0x2a   : > { %2278 = vmatmul.mubr.bf16.vlgmr.msra.gmra.mrb[0].mxu1 %v2680_v23 }
  0x2b   : > { %2283 = vmatprep.mubr.msk.bf16.mxu1 %vm2509_vm0, %v2508_v4 }
  0xfa   : > { %v758_v33 = vpop.f32.mrb[0].mxu0 }
  0xfb   : > { %v760_v35 = vpop.f32.mrb[1].mxu0  ;;  %v759_v37 = vadd.f32 %v758_v33, %v578_v32 }
  0xfc   : > { %v762_v36 = vpop.f32.mrb[2].mxu0  ;;  %v761_v40 = vadd.f32 %v760_v35, %v582_v34 }
  0xfd   : > { %v763_v38 = vadd.f32 %v762_v36, %v578_v32  ;;  %v764_v39 = vpop.f32.mrb[3].mxu0  ;;  %v801_v47 = vpop.f32.mrb[0].mxu1 }
  0xfe   : > { %v765_v41 = vadd.f32 %v764_v39, %v582_v34  ;;  %v802_v48 = vadd.f32 %v801_v47, %v586_v46  ;;  %v2279_v49 = vpop.f32.mrb[1].mxu1 }
  0xff   : > { %v809_v42 = vpack.c.bf16 %v763_v38, %v759_v37  ;;  %v804_v50 = vpop.f32.mrb[2].mxu1 }
 0x100   : > { %v810_v43 = vpack.c.bf16 %v765_v41, %v761_v40  ;;  %v805_v51 = vadd.f32 %v804_v50, %v586_v46  ;;  %v2280_v52 = vpop.f32.mrb[3].mxu1 }
 0x102   : > { %v823_v44 = vsel %vm818_vm1, %v810_v43, 0  ;;  %v2724_v53 = vpack.c.bf16 %v805_v51, %v802_v48 }
 0x103   : > { %2282 = vmatpush3.bf16.xpose.msra.mxu1 %v823_v44 }
 0x104   : > { %2287 = vmatprep.subr.bf16.mxu1 %v2508_v4 }
 0x10a   : > { %2284 = vmatmul.mubr.msk.bf16.vlgmr.msra.gmra.mrb[4].mxu1 %vm818_vm1, %v809_v42 }
 0x10b   : > { %2289 = vmatprep.mubr.msk.bf16.mxu1 %vm2509_vm0, %v2508_v4  ;;  %2288 = vmatpush3.bf16.msra.mxu1 %v2724_v53 }
 0x10c   : > { %2293 = vmatprep.subr.bf16.mxu1 %v2508_v4 }
 0x1dd   : > { %v859_v55 = vpop.f32.mrb[4].mxu1 }
 0x1de   : > { %v860_v56 = vadd.f32 %v2095_v54, %v859_v55  ;;  %v2285_v57 = vpop.f32.mrb[5].mxu1 }
 0x1df   : > { %v862_v58 = vpop.f32.mrb[6].mxu1 }
 0x1e0   : > { %v863_v59 = vadd.f32 %v2095_v54, %v862_v58  ;;  %v2286_v60 = vpop.f32.mrb[7].mxu1  ;;  %v867_v61 = vsel %vm866_vm2, %v860_v56, -inf  ;;  %v2370_v58 = vld [vmem:[%s3098_s6] sm:$0xff]  }
 0x1e1   : > { %868 = vmax.xlane.f32.xlu0 %v867_v61  ;;  %2306 = vmatpush3.bf16.msra.mxu0 %v2370_v58  ;;  %v2373_v60 = vld [vmem:[%s3098_s6 + $0x18] sm:$0xff]   ;;  %v2374_v61 = vld [vmem:[%s3098_s6 + $0x20] sm:$0xff]  }
 0x1e2   : > { %v870_v62 = vsel %vm866_vm2, %v863_v59, -inf  ;;  %2307 = vmatprep.subr.bf16.mxu0 %v2508_v4  ;;  %v2414_v58 = vld [vmem:[%s3102_s10 + $0xc0] ss:$16 sps:$4 sm:$0xff]  }
 0x1e5   : > { %871 = vmax.xlane.f32.xlu0 %v870_v62  ;;  %v2375_v62 = vld [vmem:[%s3098_s6 + $0x28] sm:$0xff]  }
 0x1fb   : > { %940 = vrot.lane.b32.xlu0 %v810_v43, %s2510_s2 }
 0x26e   : > { %v869_v63 = vpop.xlane.xlu0 %868 }
 0x26f   : > { %v873_v0 = vsub.f32 %v860_v56, %v869_v63  ;;  %v2376_v63 = vld [vmem:[%s3098_s6 + $0x30] sm:$0xff]  }
 0x271   : > { %v875_v1 = vmul.f32 1.442695, %v873_v0  ;;  %v2377_v0 = vld [vmem:[%s3098_s6 + $0x38] sm:$0xff]  }
 0x272   : > { %v872_v3 = vpop.xlane.xlu0 %871 }
 0x273   : > { %2459 = vpow2.f32 %v875_v1  ;;  %v874_v5 = vsub.f32 %v863_v59, %v872_v3  ;;  %v2372_v59 = vld [vmem:[%s3098_s6 + $0x10] sm:$0xff]  }
 0x275   : > { %v877_v6 = vmul.f32 1.442695, %v874_v5 }
 0x276   : > { %v941_v17 = vpop.permute.xlu0 %940 }
 0x277   : > { %2461 = vpow2.f32 %v877_v6  ;;  %v946_v19 = vsel %vm818_vm1, %v941_v17, 0 }
 0x27d   : > { %v2460_v7 = vpop.eup %2459 }
 0x27e   : > { %v879_v8 = vsel %vm866_vm2, %v2460_v7, 0.0 }
 0x27f   : > { %880 = vadd.xlane.f32.xlu1 %v879_v8 }
 0x281   : > { %v2462_v9 = vpop.eup %2461 }
 0x282   : > { %v882_v10 = vsel %vm866_vm2, %v2462_v9, 0.0 }
 0x283   : > { %883 = vadd.xlane.f32.xlu1 %v882_v10  ;;  %v2100_v10 = vld [vmem:[%s3099_s7] ss:$0 sm:$0xff] }
 0x294   : > { %937 = vrot.lane.b32.xlu1 %v809_v42, %s2510_s2 }
 0x30c   : > { %v881_v11 = vpop.xlane.xlu1 %880 }
 0x30d   : > { %2463 = vrcp.f32 %v881_v11 }
 0x310   : > { %v884_v12 = vpop.xlane.xlu1 %883 }
 0x311   : > { %2465 = vrcp.f32 %v884_v12 }
 0x314   : > { %v938_v20 = vpop.permute.xlu1 %937 }
 0x317   : > { %v2464_v13 = vpop.eup %2463 }
 0x318   : > { %v887_v15 = vmul.f32 %v2464_v13, %v2460_v7 }
 0x31b   : > { %v2466_v14 = vpop.eup %2465 }
 0x31c   : > { %v888_v16 = vmul.f32 %v2466_v14, %v2462_v9  ;;  %v540_v14 = vunpack.c.h.bf16 %v2680_v23 }
 0x31e   : > { %v889_v18 = vpack.c.bf16 %v888_v16, %v887_v15 }
 0x320   : > { %2290 = vmatmul.mubr.msk.bf16.vlgmr.msra.gmra.mrb[8].mxu1 %vm866_vm2, %v889_v18 }
 0x321   : > { %2294 = vmatpush3.bf16.xpose.msra.mxu1 %v946_v19  ;;  %2295 = vmatprep.mubr.msk.bf16.mxu1 %vm2509_vm0, %v2508_v4 }
 0x322   : > { %2299 = vmatprep.subr.bf16.mxu1 %v2508_v4 }
 0x328   : > { %2296 = vmatmul.mubr.msk.bf16.vlgmr.msra.gmra.mrb[12].mxu1 %vm818_vm1, %v938_v20  ;;  %v2380_v20 = vld [vmem:[%s3102_s10 + $0x4] ss:$16 sps:$4 sm:$0xff]  }
 0x329   : > { %2301 = vmatprep.mubr.msk.bf16.mxu1 %vm2509_vm0, %v2508_v4 }
 0x3f3   : > { %v927_v21 = vpop.f32.mrb[8].mxu1 }
 0x3f4   : > { %v2291_v22 = vpop.f32.mrb[9].mxu1 }
 0x3f5   : > { %v930_v24 = vpop.f32.mrb[10].mxu1  ;;  %v2386_v22 = vld [vmem:[%s3102_s10 + $0x24] ss:$16 sps:$4 sm:$0xff]  }
 0x3f6   : > { %v934_v25 = vpack.c.bf16 %v930_v24, %v927_v21  ;;  %v2292_v26 = vpop.f32.mrb[11].mxu1  ;;  %v2381_v21 = vld [vmem:[%s3102_s10 + $0x8] ss:$16 sps:$4 sm:$0xff]   ;;  %v2389_v24 = vld [vmem:[%s3102_s10 + $0x2c] ss:$16 sps:$4 sm:$0xff]  }
 0x3f7   : > { %v2387_v26 = vld [vmem:[%s3102_s10 + $0x28] ss:$16 sps:$4 sm:$0xff]  }
 0x3f8   : > { %935 = vst.msk [vmem:[#allocation2] sm:$0xff] %vm818_vm1, %v934_v25  ;;  %v2384_v25 = vld [vmem:[%s3102_s10 + $0x20] ss:$16 sps:$4 sm:$0xff]  }
 0x3fb   : > { %v982_v27 = vpop.f32.mrb[12].mxu1 }
 0x3fc   : > { %v983_v30 = vadd.f32 %v2095_v54, %v982_v27  ;;  %v2297_v32 = vpop.f32.mrb[13].mxu1 }
 0x3fd   : > { %v985_v33 = vpop.f32.mrb[14].mxu1 }
 0x3fe   : > { %v986_v34 = vadd.f32 %v2095_v54, %v985_v33  ;;  %v2298_v35 = vpop.f32.mrb[15].mxu1  ;;  %v989_v36 = vsel %vm866_vm2, %v983_v30, -inf }
 0x3ff   : > { %990 = vmax.xlane.f32.xlu1 %v989_v36 }
 0x400   : > { %v992_v37 = vsel %vm866_vm2, %v986_v34, -inf }
 0x401   : > { %993 = vmax.xlane.f32.xlu0 %v992_v37 }
 0x48c   : > { %v991_v38 = vpop.xlane.xlu1 %990 }
 0x48d   : > { %v995_v39 = vsub.f32 %v983_v30, %v991_v38  ;;  %v2392_v38 = vld [vmem:[%s3102_s10 + $0x44] ss:$16 sps:$4 sm:$0xff]  }
 0x48e   : > { %v994_v40 = vpop.xlane.xlu0 %993 }
 0x48f   : > { %v997_v41 = vmul.f32 1.442695, %v995_v39  ;;  %v996_v42 = vsub.f32 %v986_v34, %v994_v40  ;;  %v2395_v39 = vld [vmem:[%s3102_s10 + $0x4c] ss:$16 sps:$4 sm:$0xff]   ;;  %v2390_v40 = vld [vmem:[%s3102_s10 + $0x40] ss:$16 sps:$4 sm:$0xff]  }
 0x491   : > { %2467 = vpow2.f32 %v997_v41  ;;  %v999_v43 = vmul.f32 1.442695, %v996_v42  ;;  %v2393_v41 = vld [vmem:[%s3102_s10 + $0x48] ss:$16 sps:$4 sm:$0xff]   ;;  %v2398_v42 = vld [vmem:[%s3102_s10 + $0x64] ss:$16 sps:$4 sm:$0xff]  }
 0x493   : > { %2469 = vpow2.f32 %v999_v43  ;;  %v2401_v43 = vld [vmem:[%s3102_s10 + $0x6c] ss:$16 sps:$4 sm:$0xff]  }
 0x49b   : > { %v2468_v44 = vpop.eup %2467 }
 0x49c   : > { %v1001_v46 = vsel %vm866_vm2, %v2468_v44, 0.0 }
 0x49d   : > { %v2470_v47 = vpop.eup %2469  ;;  %1002 = vadd.xlane.f32.xlu0 %v1001_v46  ;;  %v2399_v46 = vld [vmem:[%s3102_s10 + $0x68] ss:$16 sps:$4 sm:$0xff]  }
 0x49e   : > { %v1004_v48 = vsel %vm866_vm2, %v2470_v47, 0.0 }
 0x49f   : > { %1005 = vadd.xlane.f32.xlu1 %v1004_v48  ;;  %v2407_v48 = vld [vmem:[%s3102_s10 + $0x8c] ss:$16 sps:$4 sm:$0xff]  }
 0x4b3   : > { %1013 = vrot.lane.b32.xlu0 %v2724_v53, %s2510_s2  ;;  %v2371_v53 = vld [vmem:[%s3098_s6 + $0x8] sm:$0xff]  }
 0x4b4   : > { %2308 = vmatpush3.bf16.msra.mxu0 %v2371_v53  ;;  %v2417_v53 = vld [vmem:[%s3102_s10 + $0xc8] ss:$16 sps:$4 sm:$0xff]  }
 0x4b5   : > { %2309 = vmatprep.subr.bf16.mxu0 %v2508_v4 }
 0x4b8   : > { %2310 = vmatpush3.bf16.msra.mxu0 %v2372_v59  ;;  %v2422_v59 = vld [vmem:[%s3102_s10 + $0xe4] ss:$16 sps:$4 sm:$0xff]  }
 0x4b9   : > { %2311 = vmatprep.subr.bf16.mxu0 %v2508_v4 }
 0x4bc   : > { %2312 = vmatpush3.bf16.msra.mxu0 %v2373_v60  ;;  %v2425_v60 = vld [vmem:[%s3102_s10 + $0xec] ss:$16 sps:$4 sm:$0xff]  }
 0x4bd   : > { %2313 = vmatprep.subr.bf16.mxu0 %v2508_v4 }
 0x4c0   : > { %2314 = vmatpush3.bf16.msra.mxu0 %v2374_v61  ;;  %v2420_v61 = vld [vmem:[%s3102_s10 + $0xe0] ss:$16 sps:$4 sm:$0xff]  }
 0x4c1   : > { %2315 = vmatprep.subr.bf16.mxu0 %v2508_v4 }
 0x4c4   : > { %2316 = vmatpush3.bf16.msra.mxu0 %v2375_v62  ;;  %v2423_v62 = vld [vmem:[%s3102_s10 + $0xe8] ss:$16 sps:$4 sm:$0xff]  }
 0x4c5   : > { %2317 = vmatprep.subr.bf16.mxu0 %v2508_v4 }
 0x4c8   : > { %2318 = vmatpush3.bf16.msra.mxu0 %v2376_v63 }
 0x4c9   : > { %2319 = vmatprep.subr.bf16.mxu0 %v2508_v4  ;;  %v539_v4 = vunpack.c.l.bf16 %v2680_v23  ;;  %v2383_v23 = vld [vmem:[%s3102_s10 + $0xc] ss:$16 sps:$4 sm:$0xff]  }
 0x4cc   : > { %2320 = vmatpush3.bf16.msra.mxu0 %v2377_v0 }
 0x4cd   : > { %1481 = vmatprep.subr.bf16.mxu0 %v2383_v23  ;;  %v2432_v23 = vld [vmem:[%s3104_s12 + $0x8] sm:$0xff]  }
 0x52a   : > { %v1003_v49 = vpop.xlane.xlu0 %1002 }
 0x52b   : > { %2471 = vrcp.f32 %v1003_v49  ;;  %v2402_v49 = vld [vmem:[%s3102_s10 + $0x80] ss:$16 sps:$4 sm:$0xff]  }
 0x52c   : > { %v1006_v50 = vpop.xlane.xlu1 %1005 }
 0x52d   : > { %2473 = vrcp.f32 %v1006_v50  ;;  %v2405_v50 = vld [vmem:[%s3102_s10 + $0x88] ss:$16 sps:$4 sm:$0xff]  }
 0x52e   : > { %v1014_v51 = vpop.permute.xlu0 %1013 }
 0x52f   : > { %2300 = vmatpush3.bf16.msra.mxu1 %v1014_v51  ;;  %v2410_v51 = vld [vmem:[%s3102_s10 + $0xa4] ss:$16 sps:$4 sm:$0xff]  }
 0x530   : > { %1438 = vmatprep.subr.bf16.mxu1 %v2380_v20  ;;  %v2430_v20 = vld [vmem:[%s3104_s12 + $0x48] sm:$0xff]  }
 0x535   : > { %v2472_v52 = vpop.eup %2471 }
 0x536   : > { %v1009_v55 = vmul.f32 %v2472_v52, %v2468_v44  ;;  %v2396_v44 = vld [vmem:[%s3102_s10 + $0x60] ss:$16 sps:$4 sm:$0xff]   ;;  %v2413_v52 = vld [vmem:[%s3102_s10 + $0xac] ss:$16 sps:$4 sm:$0xff]  }
 0x537   : > { %v2474_v54 = vpop.eup %2473 }
 0x538   : > { %v1010_v56 = vmul.f32 %v2474_v54, %v2470_v47  ;;  %v2404_v47 = vld [vmem:[%s3102_s10 + $0x84] ss:$16 sps:$4 sm:$0xff]   ;;  %v2408_v54 = vld [vmem:[%s3102_s10 + $0xa0] ss:$16 sps:$4 sm:$0xff]  }
 0x53a   : > { %v1011_v57 = vpack.c.bf16 %v1010_v56, %v1009_v55  ;;  %v2411_v55 = vld [vmem:[%s3102_s10 + $0xa8] ss:$16 sps:$4 sm:$0xff]   ;;  %v2416_v56 = vld [vmem:[%s3102_s10 + $0xc4] ss:$16 sps:$4 sm:$0xff]  }
 0x53c   : > { %2302 = vmatmul.mubr.msk.bf16.vlgmr.msra.gmra.mrb[16].mxu1 %vm866_vm2, %v1011_v57  ;;  %v2419_v57 = vld [vmem:[%s3102_s10 + $0xcc] ss:$16 sps:$4 sm:$0xff]  }
 0x53d   : > { %1470 = vmatprep.mubr.bf16.mxu1 %v2507_v2 }
 0x60f   : > { %v1053_v1 = vpop.f32.mrb[16].mxu1 }
 0x610   : > { %v2303_v3 = vpop.f32.mrb[17].mxu1 }
 0x611   : > { %v1056_v5 = vpop.f32.mrb[18].mxu1 }
 0x612   : > { %v1060_v6 = vpack.c.bf16 %v1056_v5, %v1053_v1  ;;  %v2304_v7 = vpop.f32.mrb[19].mxu1 }
 0x614   : > { %1062 = vrot.lane.b32.xlu1 %v1060_v6, %s2510_s2 }
 0x686   : > { %v1063_v8 = vpop.permute.xlu1 %1062 }
 0x687   : > { %1066 = vst.msk [vmem:[#allocation2] sm:$0xff] %vm1065_vm3, %v1063_v8  ;;  %v2109_v8 = vld [vmem:[%s3100_s8] ss:$0 sm:$0xff] }
 0x68e   : > { %v1067_v9 = vld [vmem:[#allocation2] sm:$0xff] }
 0x68f   : > { %2322 = vmatmul.mubr.bf16.vlgmr.msra.gmra.mrb[4].mxu0 %v1067_v9 }
 0x690   : > { %1513 = vmatprep.mubr.bf16.mxu0 %v2507_v2  ;;  %v2378_v2 = vld [vmem:[%s3102_s10] ss:$16 sps:$4 sm:$0xff]   ;;  %1482 = vmatpush1.bf16.msra.mxu0 %v2381_v21  ;;  %v2431_v21 = vld [vmem:[%s3104_s12 + $0xc8] sm:$0xff]  }
 0x691   : > { %1439 = vmatpush1.bf16.msra.mxu1 %v2378_v2  ;;  %1483 = vmatprep.subr.bf16.mxu0 %v2389_v24  ;;  %v2429_v2 = vld [vmem:[%s3104_s12 + $0x80] sm:$0xff]   ;;  %v2434_v24 = vld [vmem:[%s3104_s12 + $0x50] sm:$0xff]  }
 0x692   : > { %1440 = vmatprep.subr.bf16.mxu1 %v2386_v22  ;;  %v2433_v22 = vld [vmem:[%s3104_s12 + $0x88] sm:$0xff]  }
 0x694   : > { %1484 = vmatpush1.bf16.msra.mxu0 %v2387_v26  ;;  %v2436_v26 = vld [vmem:[%s3104_s12 + $0x10] sm:$0xff]  }
 0x695   : > { %1441 = vmatpush1.bf16.msra.mxu1 %v2384_v25  ;;  %1485 = vmatprep.subr.bf16.mxu0 %v2395_v39  ;;  %v2435_v25 = vld [vmem:[%s3104_s12 + $0xd0] sm:$0xff]   ;;  %v2446_v39 = vld [vmem:[%s3104_s12 + $0x68] sm:$0xff]  }
 0x696   : > { %1442 = vmatprep.subr.bf16.mxu1 %v2392_v38  ;;  %v2445_v38 = vld [vmem:[%s3104_s12 + $0xa0] sm:$0xff]  }
 0x698   : > { %1486 = vmatpush1.bf16.msra.mxu0 %v2393_v41  ;;  %v2448_v41 = vld [vmem:[%s3104_s12 + $0x28] sm:$0xff]  }
 0x699   : > { %1443 = vmatpush1.bf16.msra.mxu1 %v2390_v40  ;;  %1487 = vmatprep.subr.bf16.mxu0 %v2401_v43  ;;  %v2447_v40 = vld [vmem:[%s3104_s12 + $0xe8] sm:$0xff]   ;;  %v2450_v43 = vld [vmem:[%s3104_s12 + $0x70] sm:$0xff]  }
 0x69a   : > { %1444 = vmatprep.subr.bf16.mxu1 %v2398_v42  ;;  %v2449_v42 = vld [vmem:[%s3104_s12 + $0xa8] sm:$0xff]  }
 0x69c   : > { %1488 = vmatpush1.bf16.msra.mxu0 %v2399_v46  ;;  %v2452_v46 = vld [vmem:[%s3104_s12 + $0x30] sm:$0xff]  }
 0x69d   : > { %1445 = vmatpush1.bf16.msra.mxu1 %v2396_v44  ;;  %1489 = vmatprep.subr.bf16.mxu0 %v2407_v48  ;;  %v2451_v44 = vld [vmem:[%s3104_s12 + $0xf0] sm:$0xff]   ;;  %v2454_v48 = vld [vmem:[%s3104_s12 + $0x78] sm:$0xff]  }
 0x69e   : > { %1446 = vmatprep.subr.bf16.mxu1 %v2404_v47  ;;  %v2453_v47 = vld [vmem:[%s3104_s12 + $0xb0] sm:$0xff]  }
 0x6a0   : > { %1490 = vmatpush1.bf16.msra.mxu0 %v2405_v50  ;;  %v2456_v50 = vld [vmem:[%s3104_s12 + $0x38] sm:$0xff]  }
 0x6a1   : > { %1447 = vmatpush1.bf16.msra.mxu1 %v2402_v49  ;;  %1491 = vmatprep.subr.bf16.mxu0 %v2413_v52  ;;  %v2455_v49 = vld [vmem:[%s3104_s12 + $0xf8] sm:$0xff]   ;;  %v1256_v52 = vld [vmem:[%s3103_s11] sm:$0xf] }
 0x6a2   : > { %1448 = vmatprep.subr.bf16.mxu1 %v2410_v51  ;;  %v2457_v51 = vld [vmem:[%s3104_s12 + $0xb8] sm:$0xff]  }
 0x6a4   : > { %1492 = vmatpush1.bf16.msra.mxu0 %v2411_v55  ;;  %v1261_v55 = vrot.slane %v1256_v52, %v577_v29 }
 0x6a5   : > { %1449 = vmatpush1.bf16.msra.mxu1 %v2408_v54  ;;  %1493 = vmatprep.subr.bf16.mxu0 %v2419_v57  ;;  %v1272_v54 = vsub.s32 3, %v2705_v28  ;;  %v1265_v57 = vrot.slane %v1256_v52, %v581_v31 }
 0x6a6   : > { %1450 = vmatprep.subr.bf16.mxu1 %v2416_v56  ;;  %v1269_v56 = vrot.slane %v1256_v52, %v585_v45 }
 0x6a8   : > { %1494 = vmatpush1.bf16.msra.mxu0 %v2417_v53 }
 0x6a9   : > { %1451 = vmatpush1.bf16.msra.mxu1 %v2414_v58  ;;  %1495 = vmatprep.subr.bf16.mxu0 %v2425_v60  ;;  %v1273_v58 = vrot.slane %v1256_v52, %v1272_v54 }
 0x6aa   : > { %1452 = vmatprep.subr.bf16.mxu1 %v2422_v59 }
 0x6ac   : > { %1496 = vmatpush1.bf16.msra.mxu0 %v2423_v62 }
 0x6ad   : > { %1453 = vmatpush1.bf16.msra.mxu1 %v2420_v61 }
 0x762   : > { %v1173_v11 = vpop.f32.mrb[4].mxu0 }
 0x763   : > { %v1174_v12 = vadd.f32 %v2100_v10, %v1173_v11  ;;  %v2323_v13 = vpop.f32.mrb[5].mxu0 }
 0x764   : > { %v1176_v15 = vpop.f32.mrb[6].mxu0 }
 0x765   : > { %v1177_v16 = vadd.f32 %v2100_v10, %v1176_v15  ;;  %v2324_v17 = vpop.f32.mrb[7].mxu0  ;;  %v1180_v18 = vadd.f32 %v1174_v12, %v539_v4  ;;  %v2110_v12 = vld [vmem:[%s3101_s9] ss:$0 sm:$0xff] }
 0x766   : > { %v2426_v17 = vld [vmem:[%s3104_s12 + $0x40] sm:$0xff]  }
 0x767   : > { %1184 = vadd.xlane.f32.xlu1 %v1180_v18  ;;  %v1181_v19 = vadd.f32 %v1177_v16, %v540_v14  ;;  %2217 = vmatprep.subr.bf16.mxu1 %v2426_v17 }
 0x769   : > { %1186 = vadd.xlane.f32.xlu0 %v1181_v19 }
 0x7f4   : > { %v1185_v27 = vpop.xlane.xlu1 %1184 }
 0x7f5   : > { %v1189_v30 = vmul.f32 0.0078125, %v1185_v27  ;;  %v2437_v27 = vld [vmem:[%s3104_s12 + $0x90] sm:$0xff]  }
 0x7f6   : > { %v1187_v32 = vpop.xlane.xlu0 %1186 }
 0x7f7   : > { %v2817_v33 = vsub.f32 %v1180_v18, %v1189_v30  ;;  %v1190_v34 = vmul.f32 0.0078125, %v1187_v32  ;;  %v2427_v18 = vld [vmem:[%s3104_s12 + $0xc0] sm:$0xff]   ;;  %v2438_v30 = vld [vmem:[%s3104_s12 + $0x58] sm:$0xff]  }
 0x7f8   : > { %2239 = vmatprep.subr.bf16.mxu0 %v2427_v18  ;;  %v2439_v32 = vld [vmem:[%s3104_s12 + $0xd8] sm:$0xff]  }
 0x7f9   : > { %v2819_v35 = vsub.f32 %v1181_v19, %v1190_v34  ;;  %v1193_v36 = vmul.f32 %v2817_v33, %v2817_v33  ;;  %v2428_v19 = vld [vmem:[%s3104_s12] sm:$0xff]   ;;  %v2441_v34 = vld [vmem:[%s3104_s12 + $0x98] sm:$0xff]  }
 0x7fb   : > { %1195 = vadd.xlane.f32.xlu0 %v1193_v36  ;;  %v1194_v37 = vmul.f32 %v2819_v35, %v2819_v35  ;;  %v2443_v36 = vld [vmem:[%s3104_s12 + $0xe0] sm:$0xff]  }
 0x7fd   : > { %1197 = vadd.xlane.f32.xlu1 %v1194_v37  ;;  %v2444_v37 = vld [vmem:[%s3104_s12 + $0x20] sm:$0xff]  }
 0x888   : > { %v1196_v63 = vpop.xlane.xlu0 %1195 }
 0x889   : > { %v1199_v0 = vmul.f32 0.0078125, %v1196_v63 }
 0x88a   : > { %v1198_v1 = vpop.xlane.xlu1 %1197 }
 0x88b   : > { %v1201_v3 = vadd.f32 1e-05, %v1199_v0  ;;  %v1200_v5 = vmul.f32 0.0078125, %v1198_v1 }
 0x88d   : > { %2475 = vrsqrt.f32 %v1201_v3  ;;  %v1202_v6 = vadd.f32 1e-05, %v1200_v5 }
 0x88f   : > { %2477 = vrsqrt.f32 %v1202_v6 }
 0x897   : > { %v2476_v7 = vpop.eup %2475 }
 0x898   : > { %v1205_v9 = vmul.f32 %v2476_v7, %v2817_v33  ;;  %v2440_v33 = vld [vmem:[%s3104_s12 + $0x18] sm:$0xff]  }
 0x899   : > { %v2478_v10 = vpop.eup %2477 }
 0x89a   : > { %v1206_v4 = vmul.f32 %v2478_v10, %v2819_v35  ;;  %v1213_v11 = vmul.f32 %v2109_v8, %v1205_v9  ;;  %v2442_v35 = vld [vmem:[%s3104_s12 + $0x60] sm:$0xff]  }
 0x89c   : > { %v1214_v13 = vmul.f32 %v2109_v8, %v1206_v4  ;;  %v2905_v14 = vadd.f32 %v2110_v12, %v1213_v11 }
 0x89e   : > { %v2907_v15 = vadd.f32 %v2110_v12, %v1214_v13 }
 0x8a0   : > { %v1223_v16 = vpack.c.bf16 %v2907_v15, %v2905_v14 }
 0x8a2   : > { %1471 = vmatmul.mubr.bf16.vlgmr.msra.gmra.mrb[20].mxu1 %v1223_v16  ;;  %1514 = vmatmul.mubr.bf16.vlgmr.msra.gmra.mrb[8].mxu0 %v1223_v16 }
 0x8a3   : > { %2218 = vmatpush3.bf16.msra.mxu1 %v2428_v19  ;;  %2240 = vmatpush3.bf16.msra.mxu0 %v2429_v2 }
 0x8a4   : > { %2219 = vmatprep.subr.bf16.mxu1 %v2430_v20  ;;  %2241 = vmatprep.subr.bf16.mxu0 %v2431_v21 }
 0x8a7   : > { %2220 = vmatpush3.bf16.msra.mxu1 %v2432_v23  ;;  %2242 = vmatpush3.bf16.msra.mxu0 %v2433_v22 }
 0x8a8   : > { %2221 = vmatprep.subr.bf16.mxu1 %v2434_v24  ;;  %2243 = vmatprep.subr.bf16.mxu0 %v2435_v25 }
 0x8ab   : > { %2222 = vmatpush3.bf16.msra.mxu1 %v2436_v26  ;;  %2244 = vmatpush3.bf16.msra.mxu0 %v2437_v27 }
 0x8ac   : > { %2223 = vmatprep.subr.bf16.mxu1 %v2438_v30  ;;  %2245 = vmatprep.subr.bf16.mxu0 %v2439_v32 }
 0x8af   : > { %2224 = vmatpush3.bf16.msra.mxu1 %v2440_v33  ;;  %2246 = vmatpush3.bf16.msra.mxu0 %v2441_v34 }
 0x8b0   : > { %2225 = vmatprep.subr.bf16.mxu1 %v2442_v35  ;;  %2247 = vmatprep.subr.bf16.mxu0 %v2443_v36 }
 0x8b3   : > { %2226 = vmatpush3.bf16.msra.mxu1 %v2444_v37  ;;  %2248 = vmatpush3.bf16.msra.mxu0 %v2445_v38 }
 0x8b4   : > { %2227 = vmatprep.subr.bf16.mxu1 %v2446_v39  ;;  %2249 = vmatprep.subr.bf16.mxu0 %v2447_v40 }
 0x8b7   : > { %2228 = vmatpush3.bf16.msra.mxu1 %v2448_v41  ;;  %2250 = vmatpush3.bf16.msra.mxu0 %v2449_v42 }
 0x8b8   : > { %2229 = vmatprep.subr.bf16.mxu1 %v2450_v43  ;;  %2251 = vmatprep.subr.bf16.mxu0 %v2451_v44 }
 0x8bb   : > { %2230 = vmatpush3.bf16.msra.mxu1 %v2452_v46  ;;  %2252 = vmatpush3.bf16.msra.mxu0 %v2453_v47 }
 0x8bc   : > { %2231 = vmatprep.subr.bf16.mxu1 %v2454_v48  ;;  %2253 = vmatprep.subr.bf16.mxu0 %v2455_v49 }
 0x8bf   : > { %2232 = vmatpush3.bf16.msra.mxu1 %v2456_v50  ;;  %2254 = vmatpush3.bf16.msra.mxu0 %v2457_v51 }
 0x975   : > { %v1472_v53 = vpop.f32.mrb[20].mxu1  ;;  %v1515_v59 = vpop.f32.mrb[8].mxu0 }
 0x976   : > { %v3017_v60 = vadd.f32 %v1472_v53, %v1261_v55  ;;  %v3019_v61 = vadd.f32 %v1515_v59, %v1269_v56  ;;  %v1474_v62 = vpop.f32.mrb[21].mxu1  ;;  %v1517_v63 = vpop.f32.mrb[9].mxu0 }
 0x977   : > { %v3021_v0 = vadd.f32 %v1474_v62, %v1265_v57  ;;  %v3023_v1 = vadd.f32 %v1517_v63, %v1273_v58  ;;  %v1476_v29 = vpop.f32.mrb[22].mxu1  ;;  %v1519_v3 = vpop.f32.mrb[10].mxu0 }
 0x978   : > { %v1524_v45 = vmul.f32 %v3017_v60, %v3017_v60  ;;  %v1526_v28 = vmul.f32 %v3019_v61, %v3019_v61  ;;  %v3029_v31 = vadd.f32 %v1476_v29, %v1261_v55  ;;  %v3031_v5 = vadd.f32 %v1519_v3, %v1269_v56  ;;  %v1478_v6 = vpop.f32.mrb[23].mxu1  ;;  %v1521_v7 = vpop.f32.mrb[11].mxu0 }
 0x979   : > { %v1525_v8 = vmul.f32 %v3021_v0, %v3021_v0  ;;  %v1527_v9 = vmul.f32 %v3023_v1, %v3023_v1  ;;  %v3037_v10 = vadd.f32 %v1478_v6, %v1265_v57  ;;  %v3039_v4 = vadd.f32 %v1521_v7, %v1273_v58 }
 0x97a   : > { %v1532_v11 = vmul.f32 %v1524_v45, %v3017_v60  ;;  %v1534_v12 = vmul.f32 %v1526_v28, %v3019_v61  ;;  %v1528_v13 = vmul.f32 %v3029_v31, %v3029_v31  ;;  %v1530_v16 = vmul.f32 %v3031_v5, %v3031_v5 }
 0x97b   : > { %v1533_v17 = vmul.f32 %v1525_v8, %v3021_v0  ;;  %v1535_v18 = vmul.f32 %v1527_v9, %v3023_v1  ;;  %v1529_v19 = vmul.f32 %v3037_v10, %v3037_v10  ;;  %v1531_v2 = vmul.f32 %v3039_v4, %v3039_v4 }
 0x97c   : > { %v1540_v20 = vmul.f32 0.044715, %v1532_v11  ;;  %v1542_v21 = vmul.f32 0.044715, %v1534_v12  ;;  %v1536_v23 = vmul.f32 %v1528_v13, %v3029_v31  ;;  %v1538_v22 = vmul.f32 %v1530_v16, %v3031_v5 }
 0x97d   : > { %v1541_v24 = vmul.f32 0.044715, %v1533_v17  ;;  %v1543_v25 = vmul.f32 0.044715, %v1535_v18  ;;  %v1537_v26 = vmul.f32 %v1529_v19, %v3037_v10  ;;  %v1539_v27 = vmul.f32 %v1531_v2, %v3039_v4 }
 0x97e   : > { %v1548_v30 = vadd.f32 %v1540_v20, %v3017_v60  ;;  %v1550_v32 = vadd.f32 %v1542_v21, %v3019_v61  ;;  %v1544_v33 = vmul.f32 0.044715, %v1536_v23  ;;  %v1546_v34 = vmul.f32 0.044715, %v1538_v22 }
 0x97f   : > { %v1549_v35 = vadd.f32 %v1541_v24, %v3021_v0  ;;  %v1551_v36 = vadd.f32 %v1543_v25, %v3023_v1  ;;  %v1545_v37 = vmul.f32 0.044715, %v1537_v26  ;;  %v1547_v38 = vmul.f32 0.044715, %v1539_v27 }
 0x980   : > { %v1556_v39 = vmul.f32 0.7978846, %v1548_v30  ;;  %v1558_v40 = vmul.f32 0.7978846, %v1550_v32  ;;  %v1552_v41 = vadd.f32 %v1544_v33, %v3029_v31  ;;  %v1554_v42 = vadd.f32 %v1546_v34, %v3031_v5 }
 0x981   : > { %v1557_v43 = vmul.f32 0.7978846, %v1549_v35  ;;  %v1559_v44 = vmul.f32 0.7978846, %v1551_v36  ;;  %v1553_v46 = vadd.f32 %v1545_v37, %v3037_v10  ;;  %v1555_v47 = vadd.f32 %v1547_v38, %v3039_v4 }
 0x982   : > { %2479 = vtanh.f32 %v1556_v39  ;;  %v1560_v48 = vmul.f32 0.7978846, %v1552_v41  ;;  %v1562_v49 = vmul.f32 0.7978846, %v1554_v42 }
 0x983   : > { %2481 = vtanh.f32 %v1558_v40  ;;  %v1561_v50 = vmul.f32 0.7978846, %v1553_v46  ;;  %v1563_v51 = vmul.f32 0.7978846, %v1555_v47 }
 0x984   : > { %2483 = vtanh.f32 %v1557_v43 }
 0x985   : > { %2485 = vtanh.f32 %v1559_v44 }
 0x986   : > { %2487 = vtanh.f32 %v1560_v48 }
 0x987   : > { %2489 = vtanh.f32 %v1562_v49 }
 0x988   : > { %2491 = vtanh.f32 %v1561_v50 }
 0x989   : > { %2493 = vtanh.f32 %v1563_v51 }
 0x98c   : > { %v2480_v52 = vpop.eup %2479 }
 0x98d   : > { %v2482_v54 = vpop.eup %2481  ;;  %v1572_v55 = vadd.f32 1.0, %v2480_v52 }
 0x98e   : > { %v2484_v56 = vpop.eup %2483  ;;  %v1574_v57 = vadd.f32 1.0, %v2482_v54 }
 0x98f   : > { %v2486_v58 = vpop.eup %2485  ;;  %v1573_v53 = vadd.f32 1.0, %v2484_v56  ;;  %v1580_v29 = vmul.f32 0.5, %v1572_v55 }
 0x990   : > { %v2488_v59 = vpop.eup %2487  ;;  %v1575_v62 = vadd.f32 1.0, %v2486_v58  ;;  %v1582_v28 = vmul.f32 0.5, %v1574_v57 }
 0x991   : > { %v2490_v63 = vpop.eup %2489  ;;  %v1576_v3 = vadd.f32 1.0, %v2488_v59  ;;  %v1581_v11 = vmul.f32 0.5, %v1573_v53  ;;  %v1588_v17 = vmul.f32 %v1580_v29, %v3017_v60  ;;  %v2176_v53 = vld [vmem:[%s3106_s14] ss:$0 sm:$0xff] }
 0x992   : > { %v2492_v45 = vpop.eup %2491  ;;  %v1578_v6 = vadd.f32 1.0, %v2490_v63  ;;  %v1583_v16 = vmul.f32 0.5, %v1575_v62  ;;  %v1590_v2 = vmul.f32 %v1582_v28, %v3019_v61 }
 0x993   : > { %v2494_v7 = vpop.eup %2493  ;;  %v1584_v8 = vmul.f32 0.5, %v1576_v3  ;;  %v1577_v9 = vadd.f32 1.0, %v2492_v45  ;;  %v1589_v23 = vmul.f32 %v1581_v11, %v3021_v0  ;;  %v2143_v0 = vld [vmem:[%s3105_s13] ss:$0 sm:$0xff] }
 0x994   : > { %v1586_v12 = vmul.f32 0.5, %v1578_v6  ;;  %v1579_v13 = vadd.f32 1.0, %v2494_v7  ;;  %v1591_v25 = vmul.f32 %v1583_v16, %v3023_v1  ;;  %v2177_v3 = vld [vmem:[%s3107_s15] ss:$0 sm:$0xff] }
 0x995   : > { %v1592_v18 = vmul.f32 %v1584_v8, %v3029_v31  ;;  %v1585_v19 = vmul.f32 0.5, %v1577_v9 }
 0x996   : > { %v1594_v20 = vmul.f32 %v1586_v12, %v3031_v5  ;;  %v1587_v21 = vmul.f32 0.5, %v1579_v13 }
 0x997   : > { %v1593_v22 = vmul.f32 %v1585_v19, %v3037_v10  ;;  %v1596_v24 = vpack.c.bf16 %v1592_v18, %v1588_v17 }
 0x998   : > { %v1595_v26 = vmul.f32 %v1587_v21, %v3039_v4  ;;  %v1598_v27 = vpack.c.bf16 %v1594_v20, %v1590_v2 }
 0x999   : > { %v1597_v30 = vpack.c.bf16 %v1593_v22, %v1589_v23 }
 0x99a   : > { %v1599_v60 = vpack.c.bf16 %v1595_v26, %v1591_v25 }
 0x99b   : > { %1895 = vmatprep.mubr.bf16.mxu1 %v1597_v30 }
 0x99c   : > { %1936 = vmatprep.mubr.bf16.mxu0 %v1599_v60  ;;  %1896 = vmatmul.mubr.bf16.vlgmr.msra.gmra.mrb[24].mxu1 %v1596_v24 }
 0x99d   : > { %1937 = vmatmul.mubr.bf16.vlgmr.msra.gmra.mrb[12].mxu0 %v1598_v27 }
 0xa6f   : > { %v2233_v61 = vpop.f32.mrb[24].mxu1 }
 0xa70   : > { %v2255_v31 = vpop.f32.mrb[12].mxu0  ;;  %v2234_v5 = vpop.f32.mrb[25].mxu1 }
 0xa71   : > { %v2235_v10 = vadd.f32 %v2234_v5, %v2233_v61  ;;  %v2256_v32 = vpop.f32.mrb[13].mxu0  ;;  %v2236_v33 = vpop.f32.mrb[26].mxu1 }
 0xa72   : > { %v2257_v1 = vadd.f32 %v2256_v32, %v2255_v31  ;;  %v2258_v34 = vpop.f32.mrb[14].mxu0  ;;  %v2237_v4 = vpop.f32.mrb[27].mxu1 }
 0xa73   : > { %v1898_v35 = vadd.f32 %v2235_v10, %v2143_v0  ;;  %v2238_v36 = vadd.f32 %v2237_v4, %v2236_v33  ;;  %v2259_v37 = vpop.f32.mrb[15].mxu0 }
 0xa74   : > { %v2260_v38 = vadd.f32 %v2259_v37, %v2258_v34 }
 0xa75   : > { %v1939_v39 = vadd.f32 %v2257_v1, %v1898_v35  ;;  %v1901_v40 = vadd.f32 %v2238_v36, %v2143_v0 }
 0xa77   : > { %v1942_v41 = vadd.f32 %v2260_v38, %v1901_v40  ;;  %v1945_v42 = vadd.f32 %v1939_v39, %v2905_v14 }
 0xa79   : > { %1949 = vadd.xlane.f32.xlu0 %v1945_v42  ;;  %v1946_v43 = vadd.f32 %v1942_v41, %v2907_v15 }
 0xa7b   : > { %1951 = vadd.xlane.f32.xlu1 %v1946_v43 }
 0xb06   : > { %v1950_v44 = vpop.xlane.xlu0 %1949 }
 0xb07   : > { %v1953_v46 = vmul.f32 0.0078125, %v1950_v44 }
 0xb08   : > { %v1952_v47 = vpop.xlane.xlu1 %1951 }
 0xb09   : > { %v1955_v48 = vsub.f32 %v1945_v42, %v1953_v46  ;;  %v1954_v49 = vmul.f32 0.0078125, %v1952_v47 }
 0xb0b   : > { %v1956_v50 = vsub.f32 %v1946_v43, %v1954_v49  ;;  %v1957_v51 = vmul.f32 %v1955_v48, %v1955_v48 }
 0xb0d   : > { %1959 = vadd.xlane.f32.xlu0 %v1957_v51  ;;  %v1958_v52 = vmul.f32 %v1956_v50, %v1956_v50 }
 0xb0f   : > { %1961 = vadd.xlane.f32.xlu1 %v1958_v52 }
 0xb9a   : > { %v1960_v54 = vpop.xlane.xlu0 %1959 }
 0xb9b   : > { %v1963_v55 = vmul.f32 0.0078125, %v1960_v54 }
 0xb9c   : > { %v1962_v56 = vpop.xlane.xlu1 %1961 }
 0xb9d   : > { %v1965_v57 = vadd.f32 1e-05, %v1963_v55  ;;  %v1964_v14 = vmul.f32 0.0078125, %v1962_v56 }
 0xb9f   : > { %2495 = vrsqrt.f32 %v1965_v57  ;;  %v1966_v58 = vadd.f32 1e-05, %v1964_v14 }
 0xba1   : > { %2497 = vrsqrt.f32 %v1966_v58 }
 0xba9   : > { %v2496_v15 = vpop.eup %2495 }
 0xbaa   : > { %v1969_v59 = vmul.f32 %v2496_v15, %v1955_v48 }
 0xbab   : > { %v2498_v62 = vpop.eup %2497 }
 0xbac   : > { %v1977_v63 = vmul.f32 %v2176_v53, %v1969_v59  ;;  %v1970_v29 = vmul.f32 %v2498_v62, %v1956_v50 }
 0xbae   : > { %v1978_v45 = vmul.f32 %v2176_v53, %v1970_v29  ;;  %v1985_v28 = vadd.f32 %v2177_v3, %v1977_v63 }
 0xbb0   : > { %v1986_v6 = vadd.f32 %v2177_v3, %v1978_v45 }
 0xbb2   : > { %v2189_v7 = vpack.c.bf16 %v1986_v6, %v1985_v28 }
 0xbb4   : > { %2190 = vst [vmem:[%s535_s27] sm:$0xff] %v2189_v7  }
 0xbb5 PF: > { %s26_s19 = sadd.s32 1, %s2505_s19  }
 0xbb6   : > { %p23_p4 = scmp.ge.s32.totalorder %s26_s19, 4  }
 0xbb8   :  { %25 = sbr.rel (!%p23_p4) target bundleno = 2 (0x2), region = 117 }

// kernel: model_forward.3
= control target key start
LH: loop header
LB: loop body
LE: loop exit
PB: predicated region body
PF: predicated region fallthrough
CT: control target
= control target key end

     0   :  { %s3255_s0 = inlined_call_operand.vmem [shape: bf16[2,16,128], index: 0, kind: input, shape index: {}]   ;;  %s3256_s1 = inlined_call_operand.vmem [shape: f32[2,1,16], index: 1, kind: input, shape index: {}]   ;;  %s3257_s2 = inlined_call_operand.vmem [shape: f32[1,128], index: 2, kind: input, shape index: {}]   ;;  %s3258_s3 = inlined_call_operand.vmem [shape: f32[1,128], index: 3, kind: input, shape index: {}]   ;;  %s3259_s4 = inlined_call_operand.vmem [shape: bf16[128,384], index: 4, kind: input, shape index: {}]   ;;  %s3260_s5 = inlined_call_operand.vmem [shape: f32[1,384], index: 5, kind: input, shape index: {}]   ;;  %s3261_s6 = inlined_call_operand.hbm [shape: bf16[128,128], index: 6, kind: input, shape index: {}]   ;;  %s3262_s7 = inlined_call_operand.vmem [shape: f32[1,128], index: 7, kind: input, shape index: {}]   ;;  %s3263_s8 = inlined_call_operand.vmem [shape: f32[1,128], index: 8, kind: input, shape index: {}]   ;;  %s3264_s9 = inlined_call_operand.vmem [shape: f32[1,128], index: 9, kind: input, shape index: {}]   ;;  %s3265_s10 = inlined_call_operand.vmem [shape: bf16[128,512], index: 10, kind: input, shape index: {}]   ;;  %s3266_s11 = inlined_call_operand.vmem [shape: f32[1,512], index: 11, kind: input, shape index: {}]   ;;  %s3267_s12 = inlined_call_operand.hbm [shape: bf16[512,128], index: 12, kind: input, shape index: {}]   ;;  %s3268_s13 = inlined_call_operand.vmem [shape: f32[1,128], index: 13, kind: input, shape index: {}]   ;;  %s3269_s14 = inlined_call_operand.vmem [shape: f32[1,128], index: 14, kind: input, shape index: {}]   ;;  %s3270_s15 = inlined_call_operand.vmem [shape: f32[1,128], index: 15, kind: input, shape index: {}]   ;;  %s3271_s16 = inlined_call_operand.vmem [shape: bf16[2,16,128], index: 16, kind: output, shape index: {}]  }
   0x1   :  { %3275 = sst [smem:[#allocation10_spill]] %s3255_s0 }
   0x2   :  { %3276 = sst [smem:[#allocation11_spill]] %s3271_s16 }
   0x3   :  { %21 = vsyncpa [#allocation4], 0 }
   0x4   :  { %22 = vsyncpa [#allocation6], 0  ;;  %s2785_s21 = smov 0  }
   0x5 LB: > { %3277 = sst [smem:[#allocation9_spill]] %s2690_s21  ;;  %s2791_s22 = sadd.s32 4294967295, %s2690_s21   ;;  %s2690_s21 = sphi %s2785_s21, %s28_s21  }
   0x6   : > { %p2150_p0 = scmp.ge.s32.totalorder %s2690_s21, 1  ;;  %p405_p1 = scmp.lt.s32.totalorder %s2690_s21, 3 }
   0x7   : > { %s2692_s23 = smov [#allocation3]   ;;  %p3272_p3 = scmp.eq.s32.totalorder %s2791_s22, 0 }
   0x8   : > { %s429_s24 = sshll.u32 %s2692_s23, 4  ;;  %p2795_p2 = pnand %p2150_p0, %p405_p1  ;;  %s430_s24 = int_to_ptr.vmem [resolvable:$true] %s429_s24 }
   0x9   : > { %s2693_s26 = smov [#allocation5]   ;;  %s2620_s0 = scalar_lea.hbm %s3261_s6, 1024 }
   0xa   : > { %s3278_s25 = scalar_select %p2795_p2, 1, 0 }
   0xb   : > { %p2429_p4 = pneg %p2795_p2  ;;  %s457_s27 = sshll.u32 %s2693_s26, 4  ;;  %s2808_s27 = int_to_ptr.vmem [resolvable:$true] %s457_s27 }
   0xc   : > { %p2621_p6 = scmp.ne.s32.totalorder %s3261_s6, %s2620_s0  ;;  %p2627_p10 = scmp.lt.u32.totalorder %s2620_s0, %s3261_s6 }
   0xd   : > { %p2804_p5 = pnand %p3272_p3, %p2429_p4 }
   0xf   : > { %p2622_p7 = pneg %p2804_p5 }
  0x11   : > { %p2623_p8 = pnand %p2622_p7, %p2621_p6 }
  0x13   : > { %p2624_p9 = pneg %p2623_p8 }
  0x15   : > { %p2629_p11 = pnand %p2627_p10, %p2624_p9 }
  0x17   : > { %2632 = shalt.err (!%p2629_p11)
}
  0x18   : > { %s2633_s23 = scalar_lea.vmem %s430_s24, 1024  ;;  %p2641_p1 = scmp.lt.s32.totalorder %s430_s24, %s430_s24 }
  0x19   : > { %p2634_p12 = scmp.ne.s32.totalorder %s430_s24, %s2633_s23  ;;  %p2642_p4 = scmp.lt.s32.totalorder %s2633_s23, %s2633_s23 }
  0x1b   : > { %p2636_p13 = pnand %p2634_p12, %p2622_p7  ;;  %p2643_p3 = por %p2642_p4, %p2641_p1 }
  0x1d   : > { %p2637_p0 = pneg %p2636_p13 }
  0x1f   : > { %p2644_p2 = pnand %p2643_p3, %p2637_p0 }
  0x21   : > { %2647 = shalt.err (!%p2644_p2)
}
  0x22   : > { %s2694_s26 = smov 64   ;;  %s2695_s29 = smov 4  }
  0x23   : > { %2432 = dma.hbm_to_vmem [thread:$0]  (!%p2804_p5), %s3261_s6, 1024, %s430_s24, [#allocation4], %s2694_s26, %s2694_s26, %s2695_s29  }
  0x24   : > { %s2648_s19 = scalar_lea.hbm %s3267_s12, 4096 }
  0x25   : > { %p2649_p6 = scmp.ne.s32.totalorder %s3267_s12, %s2648_s19  ;;  %p2655_p8 = scmp.lt.u32.totalorder %s2648_s19, %s3267_s12 }
  0x27   : > { %p2651_p2 = pnand %p2649_p6, %p2622_p7 }
  0x29   : > { %p2652_p3 = pneg %p2651_p2 }
  0x2b   : > { %p2657_p9 = pnand %p2655_p8, %p2652_p3 }
  0x2d   : > { %2660 = shalt.err (!%p2657_p9)
}
  0x2e   : > { %s2661_s24 = scalar_lea.vmem %s2808_s27, 4096  ;;  %p2669_p13 = scmp.lt.s32.totalorder %s2808_s27, %s2808_s27 }
  0x2f   : > { %p2662_p10 = scmp.ne.s32.totalorder %s2808_s27, %s2661_s24  ;;  %p2670_p0 = scmp.lt.s32.totalorder %s2661_s24, %s2661_s24 }
  0x31   : > { %p2664_p11 = pnand %p2662_p10, %p2622_p7  ;;  %p2671_p1 = por %p2670_p0, %p2669_p13 }
  0x33   : > { %p2665_p12 = pneg %p2664_p11 }
  0x35   : > { %p2672_p4 = pnand %p2671_p1, %p2665_p12 }
  0x37   : > { %2675 = shalt.err (!%p2672_p4)
}
  0x38   : > { %2435 = dma.hbm_to_vmem [thread:$0]  (!%p2804_p5), %s3267_s12, 4096, %s2808_s27, [#allocation6], %s2694_s26, %s2694_s26, %s2695_s29  }
  0x39   : > { %p3280_p6 = scmp.ne.s32.totalorder %s3278_s25, 0 }
  0x3a   : > { %p3281_p2 = scmp.eq.s32.totalorder (!%p3280_p6), %s2791_s22, 0 }
  0x3b   : > { %496 = sbr.rel (%p3280_p6) target bundleno = 3353 (0xd19), region = 84 }
  0x42   : > { %2681 = dma.done.wait (%p3281_p2), [#allocation4], 1024   ;;  %p3282_p7 = pmov %p3281_p2 }
  0x43   : > { %p3283_p3 = pmov %p3281_p2 }
  0x44   : > { %2683 = vsyncadd (%p3282_p7), [#allocation4], 4294966272 }
  0x45   : > { %2685 = dma.done.wait (%p3283_p3), [#allocation6], 4096   ;;  %p3284_p8 = pmov %p3281_p2 }
  0x46   : > { %p553_p9 = scmp.lt.s32.totalorder %s2791_s22, 1  ;;  %s3285_s26 = sld [smem:[#allocation10_spill]]  ;;  %v2456_v3 = vld [vmem:[%s3259_s4 + $0x4] ss:$12 sps:$4 sm:$0xff]   ;;  %v2458_v4 = vld [vmem:[%s3259_s4] ss:$12 sps:$4 sm:$0xff]   ;;  %v647_v54 = vlaneseq }
  0x47   : > { %2687 = vsyncadd (%p3284_p8), [#allocation6], 4294963200  ;;  %v2696_v5 = vmov 0.0   ;;  %v2459_v6 = vld [vmem:[%s3259_s4 + $0x8] ss:$12 sps:$4 sm:$0xff]   ;;  %790 = vmatprep.subr.bf16.mxu0 %v2456_v3  ;;  %v2697_v31 = vmov 0  }
  0x48   : > { %s3289_s22 = smov (!%p553_p9, %s2791_s22), 1  ;;  %2357 = vmatprep.subr.bf16.mxu1 %v2696_v5  ;;  %v2460_v7 = vld [vmem:[%s3259_s4 + $0x1c] ss:$12 sps:$4 sm:$0xff]   ;;  %791 = vmatpush1.bf16.msra.mxu0 %v2458_v4  ;;  %v2462_v16 = vld [vmem:[%s3259_s4 + $0x18] ss:$12 sps:$4 sm:$0xff]   ;;  %vm2698_vm0 = vmmov 0  }
  0x49   : > { %s2274_s25 = sshll.u32 %s3289_s22, 3  ;;  %2358 = vmatpush3.bf16.msra.mxu1 %v2459_v6  ;;  %792 = vmatprep.subr.bf16.mxu0 %v2460_v7  ;;  %v2463_v17 = vld [vmem:[%s3259_s4 + $0x20] ss:$12 sps:$4 sm:$0xff]   ;;  %v2466_v19 = vld [vmem:[%s3259_s4 + $0x30] ss:$12 sps:$4 sm:$0xff]   ;;  %v2988_v55 = vshrl.u32 %v647_v54, 7  ;;  %s560_s30 = scalar_lea.vmem %s3256_s1, %s3289_s22 }
  0x4a   : > { %2359 = vmatprep.subr.bf16.mxu1 %v2696_v5  ;;  %v2464_v18 = vld [vmem:[%s3259_s4 + $0x34] ss:$12 sps:$4 sm:$0xff]   ;;  %v2467_v20 = vld [vmem:[%s3259_s4 + $0x38] ss:$12 sps:$4 sm:$0xff]   ;;  %v2471_v23 = vld [vmem:[%s3259_s4 + $0x50] ss:$12 sps:$4 sm:$0xff]   ;;  %822 = vmatprep.mubr.bf16.mxu0 %v2697_v31 }
  0x4b   : > { %v2468_v21 = vld [vmem:[%s3259_s4 + $0x4c] ss:$12 sps:$4 sm:$0xff]   ;;  %v2470_v22 = vld [vmem:[%s3259_s4 + $0x48] ss:$12 sps:$4 sm:$0xff]   ;;  %v2472_v24 = vld [vmem:[%s3259_s4 + $0x64] ss:$12 sps:$4 sm:$0xff]   ;;  %2373 = vmatprep.mubr.msk.bf16.mxu1 %vm2698_vm0, %v2696_v5 }
  0x4c   : > { %s557_s29 = scalar_lea.vmem %s3285_s26, %s2274_s25  ;;  %793 = vmatpush1.bf16.msra.mxu0 %v2462_v16  ;;  %v2474_v25 = vld [vmem:[%s3259_s4 + $0x60] ss:$12 sps:$4 sm:$0xff]   ;;  %v2475_v26 = vld [vmem:[%s3259_s4 + $0x68] ss:$12 sps:$4 sm:$0xff]   ;;  %v2478_v28 = vld [vmem:[%s3259_s4 + $0x78] ss:$12 sps:$4 sm:$0xff]  }
  0x4d   : > { %v2279_v0 = vld [vmem:[%s557_s29] sm:$0xff]   ;;  %2360 = vmatpush3.bf16.msra.mxu1 %v2463_v17  ;;  %794 = vmatprep.subr.bf16.mxu0 %v2464_v18  ;;  %v2476_v27 = vld [vmem:[%s3259_s4 + $0x7c] ss:$12 sps:$4 sm:$0xff]   ;;  %v2484_v34 = vld [vmem:[%s3259_s4 + $0xac] ss:$12 sps:$4 sm:$0xff]   ;;  %v649_v56 = vsub.s32 0, %v2988_v55 }
  0x4e   : > { %v2280_v1 = vunpack.c.l.bf16 %v2279_v0  ;;  %v2281_v2 = vunpack.c.h.bf16 %v2279_v0  ;;  %2361 = vmatprep.subr.bf16.mxu1 %v2696_v5  ;;  %v2479_v29 = vld [vmem:[%s3259_s4 + $0x80] ss:$12 sps:$4 sm:$0xff]   ;;  %v2482_v32 = vld [vmem:[%s3259_s4 + $0x90] ss:$12 sps:$4 sm:$0xff]   ;;  %v2483_v33 = vld [vmem:[%s3259_s4 + $0x98] ss:$12 sps:$4 sm:$0xff]  }
  0x4f   : > { %v2480_v30 = vld [vmem:[%s3259_s4 + $0x94] ss:$12 sps:$4 sm:$0xff]   ;;  %v2487_v36 = vld [vmem:[%s3259_s4 + $0xb0] ss:$12 sps:$4 sm:$0xff]   ;;  %v657_v57 = vsub.s32 2, %v2988_v55  ;;  %v653_v59 = vsub.s32 1, %v2988_v55 }
  0x50   : > { %573 = vadd.xlane.f32.xlu0 %v2280_v1  ;;  %795 = vmatpush1.bf16.msra.mxu0 %v2466_v19  ;;  %v2486_v35 = vld [vmem:[%s3259_s4 + $0xa8] ss:$12 sps:$4 sm:$0xff]   ;;  %v2161_v45 = vld [vmem:[%s3257_s2] ss:$0 sm:$0xff]  ;;  %vm884_vm1 = vcmask 523264   ;;  %vm932_vm2 = vcmask 130048  }
  0x51   : > { %2362 = vmatpush3.bf16.msra.mxu1 %v2467_v20  ;;  %796 = vmatprep.subr.bf16.mxu0 %v2468_v21  ;;  %v2162_v49 = vld [vmem:[%s3258_s3] ss:$0 sm:$0xff]  ;;  %s2699_s0 = smov 64   ;;  %vm1131_vm3 = vcmask 1048064   ;;  %s3286_s26 = sld [smem:[#allocation11_spill]] }
  0x52   : > { %2363 = vmatprep.subr.bf16.mxu1 %v2696_v5  ;;  %v645_v58 = vld [vmem:[%s3260_s5] sm:$0x7] }
  0x53   : > { %v650_v60 = vrot.slane %v645_v58, %v649_v56  ;;  %v658_v61 = vrot.slane %v645_v58, %v657_v57  ;;  %v654_v0 = vrot.slane %v645_v58, %v653_v59  ;;  %v2187_v18 = vld [vmem:[%s560_s30] ss:$0 sm:$0xff] }
  0x54   : > { %575 = vadd.xlane.f32.xlu0 %v2281_v2  ;;  %797 = vmatpush1.bf16.msra.mxu0 %v2470_v22 }
  0x55   : > { %2364 = vmatpush3.bf16.msra.mxu1 %v2471_v23  ;;  %798 = vmatprep.subr.bf16.mxu0 %v2472_v24 }
  0x56   : > { %2365 = vmatprep.subr.bf16.mxu1 %v2696_v5 }
  0x57   : > { %s565_s29 = scalar_lea.vmem %s3286_s26, %s2274_s25 }
  0x58   : > { %799 = vmatpush1.bf16.msra.mxu0 %v2474_v25 }
  0x59   : > { %2366 = vmatpush3.bf16.msra.mxu1 %v2475_v26  ;;  %800 = vmatprep.subr.bf16.mxu0 %v2476_v27 }
  0x5a   : > { %2367 = vmatprep.subr.bf16.mxu1 %v2696_v5 }
  0x5c   : > { %801 = vmatpush1.bf16.msra.mxu0 %v2478_v28 }
  0x5d   : > { %2368 = vmatpush3.bf16.msra.mxu1 %v2479_v29  ;;  %802 = vmatprep.subr.bf16.mxu0 %v2480_v30 }
  0x5e   : > { %2369 = vmatprep.subr.bf16.mxu1 %v2696_v5 }
  0x60   : > { %803 = vmatpush1.bf16.msra.mxu0 %v2482_v32 }
  0x61   : > { %2370 = vmatpush3.bf16.msra.mxu1 %v2483_v33  ;;  %804 = vmatprep.subr.bf16.mxu0 %v2484_v34 }
  0x62   : > { %2371 = vmatprep.subr.bf16.mxu1 %v2696_v5 }
  0x64   : > { %805 = vmatpush1.bf16.msra.mxu0 %v2486_v35 }
  0x65   : > { %2372 = vmatpush3.bf16.msra.mxu1 %v2487_v36  ;;  %2401 = vmatprep.subr.bf16.mxu0 %v2696_v5 }
  0x66   : > { %2377 = vmatprep.subr.bf16.mxu1 %v2696_v5 }
  0xdd   : > { %v574_v8 = vpop.xlane.xlu0 %573 }
  0xde   : > { %v578_v9 = vmul.f32 0.0078125, %v574_v8 }
  0xe0   : > { %v2891_v10 = vsub.f32 %v2280_v1, %v578_v9 }
  0xe1   : > { %v576_v11 = vpop.xlane.xlu0 %575 }
  0xe2   : > { %v579_v12 = vmul.f32 0.0078125, %v576_v11  ;;  %v582_v13 = vmul.f32 %v2891_v10, %v2891_v10 }
  0xe4   : > { %v2895_v14 = vsub.f32 %v2281_v2, %v579_v12  ;;  %584 = vadd.xlane.f32.xlu1 %v582_v13 }
  0xe6   : > { %v583_v15 = vmul.f32 %v2895_v14, %v2895_v14 }
  0xe8   : > { %586 = vadd.xlane.f32.xlu1 %v583_v15 }
 0x171   : > { %v585_v37 = vpop.xlane.xlu1 %584 }
 0x172   : > { %v588_v38 = vmul.f32 0.0078125, %v585_v37 }
 0x174   : > { %v590_v39 = vadd.f32 1e-05, %v588_v38 }
 0x175   : > { %v587_v40 = vpop.xlane.xlu1 %586 }
 0x176   : > { %2576 = vrsqrt.f32 %v590_v39  ;;  %v589_v41 = vmul.f32 0.0078125, %v587_v40 }
 0x178   : > { %v591_v42 = vadd.f32 1e-05, %v589_v41 }
 0x17a   : > { %2578 = vrsqrt.f32 %v591_v42 }
 0x180   : > { %v2577_v43 = vpop.eup %2576 }
 0x181   : > { %v594_v44 = vmul.f32 %v2577_v43, %v2891_v10 }
 0x183   : > { %v602_v48 = vmul.f32 %v2161_v45, %v594_v44 }
 0x184   : > { %v2579_v46 = vpop.eup %2578 }
 0x185   : > { %v595_v47 = vmul.f32 %v2579_v46, %v2895_v14  ;;  %v2978_v51 = vadd.f32 %v2162_v49, %v602_v48 }
 0x187   : > { %v603_v50 = vmul.f32 %v2161_v45, %v595_v47 }
 0x189   : > { %v2980_v52 = vadd.f32 %v2162_v49, %v603_v50 }
 0x18b   : > { %v612_v53 = vpack.c.bf16 %v2980_v52, %v2978_v51 }
 0x18d   : > { %823 = vmatmul.mubr.bf16.vlgmr.msra.gmra.mrb[0].mxu0 %v612_v53  ;;  %2374 = vmatmul.mubr.bf16.vlgmr.msra.gmra.mrb[0].mxu1 %v612_v53 }
 0x18e   : > { %2379 = vmatprep.mubr.msk.bf16.mxu1 %vm2698_vm0, %v2696_v5  ;;  %2417 = vmatprep.mubr.msk.bf16.mxu0 %vm2698_vm0, %v2696_v5 }
 0x260   : > { %v824_v62 = vpop.f32.mrb[0].mxu0  ;;  %v867_v63 = vpop.f32.mrb[0].mxu1 }
 0x261   : > { %v826_v1 = vpop.f32.mrb[1].mxu0  ;;  %v2375_v2 = vpop.f32.mrb[1].mxu1  ;;  %v825_v6 = vadd.f32 %v824_v62, %v650_v60  ;;  %v868_v7 = vadd.f32 %v867_v63, %v658_v61 }
 0x262   : > { %v828_v3 = vpop.f32.mrb[2].mxu0  ;;  %v870_v4 = vpop.f32.mrb[2].mxu1  ;;  %v827_v12 = vadd.f32 %v826_v1, %v654_v0 }
 0x263   : > { %v829_v8 = vadd.f32 %v828_v3, %v650_v60  ;;  %v871_v9 = vadd.f32 %v870_v4, %v658_v61  ;;  %v830_v10 = vpop.f32.mrb[3].mxu0  ;;  %v2376_v11 = vpop.f32.mrb[3].mxu1 }
 0x264   : > { %v831_v13 = vadd.f32 %v830_v10, %v654_v0 }
 0x265   : > { %v875_v14 = vpack.c.bf16 %v829_v8, %v825_v6  ;;  %v3002_v15 = vpack.c.bf16 %v871_v9, %v868_v7 }
 0x266   : > { %v876_v16 = vpack.c.bf16 %v831_v13, %v827_v12 }
 0x268   : > { %v889_v17 = vsel %vm884_vm1, %v876_v16, 0 }
 0x269   : > { %2378 = vmatpush3.bf16.xpose.msra.mxu1 %v889_v17 }
 0x26a   : > { %2383 = vmatprep.subr.bf16.mxu1 %v2696_v5 }
 0x270   : > { %2380 = vmatmul.mubr.msk.bf16.vlgmr.msra.gmra.mrb[4].mxu1 %vm884_vm1, %v875_v14 }
 0x271   : > { %2384 = vmatpush3.bf16.msra.mxu1 %v3002_v15  ;;  %2385 = vmatprep.mubr.msk.bf16.mxu1 %vm2698_vm0, %v2696_v5 }
 0x272   : > { %2389 = vmatprep.subr.bf16.mxu1 %v2696_v5 }
 0x343   : > { %v925_v19 = vpop.f32.mrb[4].mxu1 }
 0x344   : > { %v926_v20 = vadd.f32 %v2187_v18, %v925_v19  ;;  %v2381_v21 = vpop.f32.mrb[5].mxu1 }
 0x345   : > { %v928_v22 = vpop.f32.mrb[6].mxu1 }
 0x346   : > { %v929_v23 = vadd.f32 %v2187_v18, %v928_v22  ;;  %v2382_v24 = vpop.f32.mrb[7].mxu1  ;;  %v933_v25 = vsel %vm932_vm2, %v926_v20, -inf }
 0x347   : > { %934 = vmax.xlane.f32.xlu0 %v933_v25  ;;  %v2489_v24 = vld [vmem:[#allocation3 + $0x8] sm:$0xff]   ;;  %v2491_v25 = vld [vmem:[#allocation3 + $0x18] sm:$0xff]  }
 0x348   : > { %v936_v26 = vsel %vm932_vm2, %v929_v23, -inf }
 0x349   : > { %937 = vmax.xlane.f32.xlu1 %v936_v26  ;;  %v2492_v26 = vld [vmem:[#allocation3 + $0x20] sm:$0xff]  }
 0x3d4   : > { %v935_v27 = vpop.xlane.xlu0 %934 }
 0x3d5   : > { %v939_v28 = vsub.f32 %v926_v20, %v935_v27  ;;  %v2493_v27 = vld [vmem:[#allocation3 + $0x28] sm:$0xff]  }
 0x3d6   : > { %v938_v29 = vpop.xlane.xlu1 %937 }
 0x3d7   : > { %v941_v30 = vmul.f32 1.442695, %v939_v28  ;;  %v940_v32 = vsub.f32 %v929_v23, %v938_v29  ;;  %v2488_v23 = vld [vmem:[#allocation3] sm:$0xff]   ;;  %v2494_v28 = vld [vmem:[#allocation3 + $0x30] sm:$0xff]   ;;  %v2495_v29 = vld [vmem:[#allocation3 + $0x38] sm:$0xff]  }
 0x3d8   : > { %2402 = vmatpush3.bf16.msra.mxu0 %v2488_v23  ;;  %v2540_v23 = vld [vmem:[%s3265_s10 + $0xe4] ss:$16 sps:$4 sm:$0xff]  }
 0x3d9   : > { %2580 = vpow2.f32 %v941_v30  ;;  %v943_v33 = vmul.f32 1.442695, %v940_v32  ;;  %2403 = vmatprep.subr.bf16.mxu0 %v2696_v5 }
 0x3db   : > { %2582 = vpow2.f32 %v943_v33 }
 0x3dc   : > { %2404 = vmatpush3.bf16.msra.mxu0 %v2489_v24  ;;  %v2543_v24 = vld [vmem:[%s3265_s10 + $0xec] ss:$16 sps:$4 sm:$0xff]  }
 0x3dd   : > { %2405 = vmatprep.subr.bf16.mxu0 %v2696_v5 }
 0x3e3   : > { %v2581_v34 = vpop.eup %2580 }
 0x3e4   : > { %v945_v35 = vsel %vm932_vm2, %v2581_v34, 0.0 }
 0x3e5   : > { %v2583_v36 = vpop.eup %2582  ;;  %946 = vadd.xlane.f32.xlu0 %v945_v35 }
 0x3e6   : > { %v948_v37 = vsel %vm932_vm2, %v2583_v36, 0.0 }
 0x3e7   : > { %949 = vadd.xlane.f32.xlu1 %v948_v37 }
 0x3f8   : > { %1003 = vrot.lane.b32.xlu1 %v875_v14, %s2699_s0 }
 0x3fb   : > { %1006 = vrot.lane.b32.xlu0 %v876_v16, %s2699_s0 }
 0x472   : > { %v947_v38 = vpop.xlane.xlu0 %946 }
 0x473   : > { %2584 = vrcp.f32 %v947_v38  ;;  %v2192_v38 = vld [vmem:[%s3262_s7] ss:$0 sm:$0xff] }
 0x474   : > { %v950_v39 = vpop.xlane.xlu1 %949 }
 0x475   : > { %2586 = vrcp.f32 %v950_v39 }
 0x476   : > { %v1007_v44 = vpop.permute.xlu0 %1006 }
 0x477   : > { %v1012_v46 = vsel %vm884_vm1, %v1007_v44, 0 }
 0x478   : > { %v1004_v47 = vpop.permute.xlu1 %1003 }
 0x47d   : > { %v2585_v40 = vpop.eup %2584 }
 0x47e   : > { %v953_v42 = vmul.f32 %v2585_v40, %v2581_v34 }
 0x47f   : > { %v2587_v41 = vpop.eup %2586 }
 0x480   : > { %v954_v43 = vmul.f32 %v2587_v41, %v2583_v36 }
 0x482   : > { %v955_v45 = vpack.c.bf16 %v954_v43, %v953_v42 }
 0x484   : > { %2386 = vmatmul.mubr.msk.bf16.vlgmr.msra.gmra.mrb[8].mxu1 %vm932_vm2, %v955_v45 }
 0x485   : > { %2390 = vmatpush3.bf16.xpose.msra.mxu1 %v1012_v46  ;;  %2391 = vmatprep.mubr.msk.bf16.mxu1 %vm2698_vm0, %v2696_v5  ;;  %v2498_v46 = vld [vmem:[%s3265_s10 + $0x4] ss:$16 sps:$4 sm:$0xff]  }
 0x486   : > { %2395 = vmatprep.subr.bf16.mxu1 %v2696_v5 }
 0x48c   : > { %2392 = vmatmul.mubr.msk.bf16.vlgmr.msra.gmra.mrb[12].mxu1 %vm884_vm1, %v1004_v47  ;;  %v2499_v47 = vld [vmem:[%s3265_s10 + $0x8] ss:$16 sps:$4 sm:$0xff]  }
 0x48d   : > { %2397 = vmatprep.mubr.msk.bf16.mxu1 %vm2698_vm0, %v2696_v5 }
 0x557   : > { %v993_v48 = vpop.f32.mrb[8].mxu1 }
 0x558   : > { %v2387_v49 = vpop.f32.mrb[9].mxu1 }
 0x559   : > { %v996_v50 = vpop.f32.mrb[10].mxu1  ;;  %v2502_v49 = vld [vmem:[%s3265_s10 + $0x20] ss:$16 sps:$4 sm:$0xff]  }
 0x55a   : > { %v1000_v53 = vpack.c.bf16 %v996_v50, %v993_v48  ;;  %v2388_v54 = vpop.f32.mrb[11].mxu1  ;;  %v2507_v48 = vld [vmem:[%s3265_s10 + $0x2c] ss:$16 sps:$4 sm:$0xff]   ;;  %v2505_v50 = vld [vmem:[%s3265_s10 + $0x28] ss:$16 sps:$4 sm:$0xff]  }
 0x55c   : > { %1001 = vst.msk [vmem:[#allocation2] sm:$0xff] %vm884_vm1, %v1000_v53 }
 0x55f   : > { %v1048_v58 = vpop.f32.mrb[12].mxu1 }
 0x560   : > { %v1049_v60 = vadd.f32 %v2187_v18, %v1048_v58  ;;  %v2393_v61 = vpop.f32.mrb[13].mxu1 }
 0x561   : > { %v1051_v62 = vpop.f32.mrb[14].mxu1 }
 0x562   : > { %v1052_v63 = vadd.f32 %v2187_v18, %v1051_v62  ;;  %v2394_v0 = vpop.f32.mrb[15].mxu1  ;;  %v1055_v1 = vsel %vm932_vm2, %v1049_v60, -inf }
 0x563   : > { %1056 = vmax.xlane.f32.xlu1 %v1055_v1  ;;  %v2510_v1 = vld [vmem:[%s3265_s10 + $0x44] ss:$16 sps:$4 sm:$0xff]  }
 0x564   : > { %v1058_v2 = vsel %vm932_vm2, %v1052_v63, -inf }
 0x565   : > { %1059 = vmax.xlane.f32.xlu0 %v1058_v2  ;;  %v2513_v2 = vld [vmem:[%s3265_s10 + $0x4c] ss:$16 sps:$4 sm:$0xff]  }
 0x5f0   : > { %v1057_v3 = vpop.xlane.xlu1 %1056 }
 0x5f1   : > { %v1061_v4 = vsub.f32 %v1049_v60, %v1057_v3  ;;  %v2508_v3 = vld [vmem:[%s3265_s10 + $0x40] ss:$16 sps:$4 sm:$0xff]  }
 0x5f2   : > { %v1060_v6 = vpop.xlane.xlu0 %1059 }
 0x5f3   : > { %v1063_v7 = vmul.f32 1.442695, %v1061_v4  ;;  %v1062_v8 = vsub.f32 %v1052_v63, %v1060_v6  ;;  %v2511_v4 = vld [vmem:[%s3265_s10 + $0x48] ss:$16 sps:$4 sm:$0xff]   ;;  %v2516_v6 = vld [vmem:[%s3265_s10 + $0x64] ss:$16 sps:$4 sm:$0xff]  }
 0x5f5   : > { %2588 = vpow2.f32 %v1063_v7  ;;  %v1065_v9 = vmul.f32 1.442695, %v1062_v8  ;;  %v2519_v7 = vld [vmem:[%s3265_s10 + $0x6c] ss:$16 sps:$4 sm:$0xff]   ;;  %v2514_v8 = vld [vmem:[%s3265_s10 + $0x60] ss:$16 sps:$4 sm:$0xff]  }
 0x5f7   : > { %2590 = vpow2.f32 %v1065_v9  ;;  %v2517_v9 = vld [vmem:[%s3265_s10 + $0x68] ss:$16 sps:$4 sm:$0xff]  }
 0x5ff   : > { %v2589_v10 = vpop.eup %2588 }
 0x600   : > { %v1067_v11 = vsel %vm932_vm2, %v2589_v10, 0.0 }
 0x601   : > { %v2591_v12 = vpop.eup %2590  ;;  %1068 = vadd.xlane.f32.xlu0 %v1067_v11  ;;  %v2525_v11 = vld [vmem:[%s3265_s10 + $0x8c] ss:$16 sps:$4 sm:$0xff]  }
 0x602   : > { %v1070_v13 = vsel %vm932_vm2, %v2591_v12, 0.0 }
 0x603   : > { %1071 = vadd.xlane.f32.xlu1 %v1070_v13  ;;  %v2523_v13 = vld [vmem:[%s3265_s10 + $0x88] ss:$16 sps:$4 sm:$0xff]  }
 0x617   : > { %1079 = vrot.lane.b32.xlu0 %v3002_v15, %s2699_s0  ;;  %v2490_v15 = vld [vmem:[#allocation3 + $0x10] sm:$0xff]  }
 0x618   : > { %2406 = vmatpush3.bf16.msra.mxu0 %v2490_v15  ;;  %v2538_v15 = vld [vmem:[%s3265_s10 + $0xe0] ss:$16 sps:$4 sm:$0xff]  }
 0x619   : > { %2407 = vmatprep.subr.bf16.mxu0 %v2696_v5 }
 0x61c   : > { %2408 = vmatpush3.bf16.msra.mxu0 %v2491_v25  ;;  %v2541_v25 = vld [vmem:[%s3265_s10 + $0xe8] ss:$16 sps:$4 sm:$0xff]  }
 0x61d   : > { %2409 = vmatprep.subr.bf16.mxu0 %v2696_v5 }
 0x620   : > { %2410 = vmatpush3.bf16.msra.mxu0 %v2492_v26 }
 0x621   : > { %2411 = vmatprep.subr.bf16.mxu0 %v2696_v5 }
 0x624   : > { %2412 = vmatpush3.bf16.msra.mxu0 %v2493_v27 }
 0x625   : > { %2413 = vmatprep.subr.bf16.mxu0 %v2696_v5 }
 0x628   : > { %2414 = vmatpush3.bf16.msra.mxu0 %v2494_v28 }
 0x629   : > { %2415 = vmatprep.subr.bf16.mxu0 %v2696_v5 }
 0x62c   : > { %2416 = vmatpush3.bf16.msra.mxu0 %v2495_v29 }
 0x68e   : > { %v1069_v14 = vpop.xlane.xlu0 %1068 }
 0x68f   : > { %2592 = vrcp.f32 %v1069_v14  ;;  %v2528_v14 = vld [vmem:[%s3265_s10 + $0xa4] ss:$16 sps:$4 sm:$0xff]  }
 0x690   : > { %v1072_v16 = vpop.xlane.xlu1 %1071 }
 0x691   : > { %2594 = vrcp.f32 %v1072_v16  ;;  %v2531_v16 = vld [vmem:[%s3265_s10 + $0xac] ss:$16 sps:$4 sm:$0xff]  }
 0x692   : > { %v1080_v17 = vpop.permute.xlu0 %1079 }
 0x693   : > { %2396 = vmatpush3.bf16.msra.mxu1 %v1080_v17  ;;  %v2526_v17 = vld [vmem:[%s3265_s10 + $0xa0] ss:$16 sps:$4 sm:$0xff]  }
 0x694   : > { %1503 = vmatprep.subr.bf16.mxu1 %v2498_v46  ;;  %v2548_v46 = vld [vmem:[#allocation5 + $0x48] sm:$0xff]  }
 0x699   : > { %v2593_v18 = vpop.eup %2592 }
 0x69a   : > { %v1075_v20 = vmul.f32 %v2593_v18, %v2589_v10  ;;  %v2522_v10 = vld [vmem:[%s3265_s10 + $0x84] ss:$16 sps:$4 sm:$0xff]   ;;  %v2529_v18 = vld [vmem:[%s3265_s10 + $0xa8] ss:$16 sps:$4 sm:$0xff]  }
 0x69b   : > { %v2595_v19 = vpop.eup %2594 }
 0x69c   : > { %v1076_v21 = vmul.f32 %v2595_v19, %v2591_v12  ;;  %v2520_v12 = vld [vmem:[%s3265_s10 + $0x80] ss:$16 sps:$4 sm:$0xff]   ;;  %v2534_v19 = vld [vmem:[%s3265_s10 + $0xc4] ss:$16 sps:$4 sm:$0xff]  }
 0x69e   : > { %v1077_v22 = vpack.c.bf16 %v1076_v21, %v1075_v20  ;;  %v2537_v20 = vld [vmem:[%s3265_s10 + $0xcc] ss:$16 sps:$4 sm:$0xff]   ;;  %v2532_v21 = vld [vmem:[%s3265_s10 + $0xc0] ss:$16 sps:$4 sm:$0xff]  }
 0x6a0   : > { %2398 = vmatmul.mubr.msk.bf16.vlgmr.msra.gmra.mrb[16].mxu1 %vm932_vm2, %v1077_v22  ;;  %v2535_v22 = vld [vmem:[%s3265_s10 + $0xc8] ss:$16 sps:$4 sm:$0xff]  }
 0x6a1   : > { %1535 = vmatprep.mubr.bf16.mxu1 %v2697_v31 }
 0x773   : > { %v1119_v30 = vpop.f32.mrb[16].mxu1 }
 0x774   : > { %v2399_v32 = vpop.f32.mrb[17].mxu1 }
 0x775   : > { %v1122_v33 = vpop.f32.mrb[18].mxu1 }
 0x776   : > { %v1126_v34 = vpack.c.bf16 %v1122_v33, %v1119_v30  ;;  %v2400_v35 = vpop.f32.mrb[19].mxu1 }
 0x778   : > { %1128 = vrot.lane.b32.xlu1 %v1126_v34, %s2699_s0  ;;  %v2201_v34 = vld [vmem:[%s3263_s8] ss:$0 sm:$0xff] }
 0x7ea   : > { %v1129_v36 = vpop.permute.xlu1 %1128 }
 0x7eb   : > { %1132 = vst.msk [vmem:[#allocation2] sm:$0xff] %vm1131_vm3, %v1129_v36 }
 0x7f2   : > { %v1133_v37 = vld [vmem:[#allocation2] sm:$0xff] }
 0x7f3   : > { %2418 = vmatmul.mubr.bf16.vlgmr.msra.gmra.mrb[4].mxu0 %v1133_v37 }
 0x7f4   : > { %1578 = vmatprep.mubr.bf16.mxu0 %v2697_v31  ;;  %v2496_v31 = vld [vmem:[%s3265_s10] ss:$16 sps:$4 sm:$0xff]  }
 0x7f5   : > { %1504 = vmatpush1.bf16.msra.mxu1 %v2496_v31  ;;  %v2547_v31 = vld [vmem:[#allocation5 + $0x80] sm:$0xff]  }
 0x8c6   : > { %v1239_v5 = vpop.f32.mrb[4].mxu0 }
 0x8c7   : > { %v1240_v39 = vadd.f32 %v2192_v38, %v1239_v5  ;;  %v2419_v40 = vpop.f32.mrb[5].mxu0  ;;  %v2202_v5 = vld [vmem:[%s3264_s9] ss:$0 sm:$0xff] }
 0x8c8   : > { %v1242_v41 = vpop.f32.mrb[6].mxu0 }
 0x8c9   : > { %v1243_v42 = vadd.f32 %v2192_v38, %v1242_v41  ;;  %v2420_v43 = vpop.f32.mrb[7].mxu0  ;;  %v1246_v44 = vadd.f32 %v1240_v39, %v2978_v51  ;;  %v2501_v51 = vld [vmem:[%s3265_s10 + $0xc] ss:$16 sps:$4 sm:$0xff]  }
 0x8ca   : > { %1546 = vmatprep.subr.bf16.mxu0 %v2501_v51  ;;  %v2544_v43 = vld [vmem:[#allocation5 + $0x40] sm:$0xff]   ;;  %v2550_v51 = vld [vmem:[#allocation5 + $0x8] sm:$0xff]  }
 0x8cb   : > { %1250 = vadd.xlane.f32.xlu1 %v1246_v44  ;;  %v1247_v45 = vadd.f32 %v1243_v42, %v2980_v52  ;;  %v2504_v52 = vld [vmem:[%s3265_s10 + $0x24] ss:$16 sps:$4 sm:$0xff]   ;;  %1547 = vmatpush1.bf16.msra.mxu0 %v2499_v47 }
 0x8cc   : > { %1505 = vmatprep.subr.bf16.mxu1 %v2504_v52  ;;  %1548 = vmatprep.subr.bf16.mxu0 %v2507_v48  ;;  %v2549_v47 = vld [vmem:[#allocation5 + $0xc8] sm:$0xff]   ;;  %v2552_v48 = vld [vmem:[#allocation5 + $0x50] sm:$0xff]  }
 0x8cd   : > { %1252 = vadd.xlane.f32.xlu0 %v1247_v45  ;;  %1506 = vmatpush1.bf16.msra.mxu1 %v2502_v49  ;;  %v2551_v52 = vld [vmem:[#allocation5 + $0x88] sm:$0xff]   ;;  %v2553_v49 = vld [vmem:[#allocation5 + $0xd0] sm:$0xff]  }
 0x8ce   : > { %1507 = vmatprep.subr.bf16.mxu1 %v2510_v1  ;;  %v2563_v1 = vld [vmem:[#allocation5 + $0xa0] sm:$0xff]  }
 0x8cf   : > { %1549 = vmatpush1.bf16.msra.mxu0 %v2505_v50  ;;  %v2554_v50 = vld [vmem:[#allocation5 + $0x10] sm:$0xff]  }
 0x8d0   : > { %1550 = vmatprep.subr.bf16.mxu0 %v2513_v2  ;;  %v2564_v2 = vld [vmem:[#allocation5 + $0x68] sm:$0xff]  }
 0x8d1   : > { %1508 = vmatpush1.bf16.msra.mxu1 %v2508_v3  ;;  %v2565_v3 = vld [vmem:[#allocation5 + $0xe8] sm:$0xff]  }
 0x8d2   : > { %1509 = vmatprep.subr.bf16.mxu1 %v2516_v6  ;;  %v2567_v6 = vld [vmem:[#allocation5 + $0xa8] sm:$0xff]  }
 0x8d3   : > { %1551 = vmatpush1.bf16.msra.mxu0 %v2511_v4  ;;  %v2566_v4 = vld [vmem:[#allocation5 + $0x28] sm:$0xff]  }
 0x8d4   : > { %1552 = vmatprep.subr.bf16.mxu0 %v2519_v7  ;;  %v2568_v7 = vld [vmem:[#allocation5 + $0x70] sm:$0xff]  }
 0x8d5   : > { %1510 = vmatpush1.bf16.msra.mxu1 %v2514_v8  ;;  %v2569_v8 = vld [vmem:[#allocation5 + $0xf0] sm:$0xff]  }
 0x8d6   : > { %1511 = vmatprep.subr.bf16.mxu1 %v2522_v10  ;;  %v2571_v10 = vld [vmem:[#allocation5 + $0xb0] sm:$0xff]  }
 0x8d7   : > { %1553 = vmatpush1.bf16.msra.mxu0 %v2517_v9  ;;  %v2570_v9 = vld [vmem:[#allocation5 + $0x30] sm:$0xff]  }
 0x8d8   : > { %1554 = vmatprep.subr.bf16.mxu0 %v2525_v11  ;;  %v2572_v11 = vld [vmem:[#allocation5 + $0x78] sm:$0xff]  }
 0x8d9   : > { %1512 = vmatpush1.bf16.msra.mxu1 %v2520_v12  ;;  %v2573_v12 = vld [vmem:[#allocation5 + $0xf8] sm:$0xff]  }
 0x8da   : > { %1513 = vmatprep.subr.bf16.mxu1 %v2528_v14  ;;  %v2575_v14 = vld [vmem:[#allocation5 + $0xb8] sm:$0xff]  }
 0x8db   : > { %1555 = vmatpush1.bf16.msra.mxu0 %v2523_v13  ;;  %v2574_v13 = vld [vmem:[#allocation5 + $0x38] sm:$0xff]  }
 0x8dc   : > { %1556 = vmatprep.subr.bf16.mxu0 %v2531_v16  ;;  %v1321_v16 = vld [vmem:[%s3266_s11] sm:$0xf] }
 0x8dd   : > { %1514 = vmatpush1.bf16.msra.mxu1 %v2526_v17  ;;  %v1337_v17 = vsub.s32 3, %v2988_v55 }
 0x8de   : > { %1515 = vmatprep.subr.bf16.mxu1 %v2534_v19  ;;  %v1334_v19 = vrot.slane %v1321_v16, %v657_v57 }
 0x8df   : > { %1557 = vmatpush1.bf16.msra.mxu0 %v2529_v18  ;;  %v1326_v18 = vrot.slane %v1321_v16, %v649_v56 }
 0x8e0   : > { %1558 = vmatprep.subr.bf16.mxu0 %v2537_v20  ;;  %v1330_v20 = vrot.slane %v1321_v16, %v653_v59 }
 0x8e1   : > { %1516 = vmatpush1.bf16.msra.mxu1 %v2532_v21  ;;  %v1338_v21 = vrot.slane %v1321_v16, %v1337_v17 }
 0x8e2   : > { %1517 = vmatprep.subr.bf16.mxu1 %v2540_v23 }
 0x8e3   : > { %1559 = vmatpush1.bf16.msra.mxu0 %v2535_v22 }
 0x8e4   : > { %1560 = vmatprep.subr.bf16.mxu0 %v2543_v24 }
 0x8e5   : > { %1518 = vmatpush1.bf16.msra.mxu1 %v2538_v15 }
 0x8e6   : > { %2313 = vmatprep.subr.bf16.mxu1 %v2544_v43 }
 0x8e7   : > { %1561 = vmatpush1.bf16.msra.mxu0 %v2541_v25 }
 0x958   : > { %v1251_v53 = vpop.xlane.xlu1 %1250 }
 0x959   : > { %v1254_v54 = vmul.f32 0.0078125, %v1251_v53  ;;  %v2555_v53 = vld [vmem:[#allocation5 + $0x90] sm:$0xff]  }
 0x95a   : > { %v1253_v58 = vpop.xlane.xlu0 %1252 }
 0x95b   : > { %v3076_v60 = vsub.f32 %v1246_v44, %v1254_v54  ;;  %v1255_v61 = vmul.f32 0.0078125, %v1253_v58  ;;  %v2545_v44 = vld [vmem:[#allocation5 + $0xc0] sm:$0xff]   ;;  %v2556_v54 = vld [vmem:[#allocation5 + $0x58] sm:$0xff]  }
 0x95c   : > { %2335 = vmatprep.subr.bf16.mxu0 %v2545_v44  ;;  %v2557_v58 = vld [vmem:[#allocation5 + $0xd8] sm:$0xff]  }
 0x95d   : > { %v3078_v62 = vsub.f32 %v1247_v45, %v1255_v61  ;;  %v1258_v63 = vmul.f32 %v3076_v60, %v3076_v60  ;;  %v2546_v45 = vld [vmem:[#allocation5] sm:$0xff]   ;;  %v2559_v61 = vld [vmem:[#allocation5 + $0x98] sm:$0xff]  }
 0x95f   : > { %1260 = vadd.xlane.f32.xlu0 %v1258_v63  ;;  %v1259_v0 = vmul.f32 %v3078_v62, %v3078_v62  ;;  %v2561_v63 = vld [vmem:[#allocation5 + $0xe0] sm:$0xff]  }
 0x961   : > { %1262 = vadd.xlane.f32.xlu1 %v1259_v0  ;;  %v2562_v0 = vld [vmem:[#allocation5 + $0x20] sm:$0xff]  }
 0x9ec   : > { %v1261_v26 = vpop.xlane.xlu0 %1260 }
 0x9ed   : > { %v1264_v27 = vmul.f32 0.0078125, %v1261_v26 }
 0x9ee   : > { %v1263_v28 = vpop.xlane.xlu1 %1262 }
 0x9ef   : > { %v1266_v29 = vadd.f32 1e-05, %v1264_v27  ;;  %v1265_v30 = vmul.f32 0.0078125, %v1263_v28 }
 0x9f1   : > { %2596 = vrsqrt.f32 %v1266_v29  ;;  %v1267_v32 = vadd.f32 1e-05, %v1265_v30 }
 0x9f3   : > { %2598 = vrsqrt.f32 %v1267_v32 }
 0x9fb   : > { %v2597_v33 = vpop.eup %2596 }
 0x9fc   : > { %v1270_v35 = vmul.f32 %v2597_v33, %v3076_v60  ;;  %v2558_v60 = vld [vmem:[#allocation5 + $0x18] sm:$0xff]  }
 0x9fd   : > { %v2599_v36 = vpop.eup %2598 }
 0x9fe   : > { %v1271_v37 = vmul.f32 %v2599_v36, %v3078_v62  ;;  %v1278_v38 = vmul.f32 %v2201_v34, %v1270_v35  ;;  %v2560_v62 = vld [vmem:[#allocation5 + $0x60] sm:$0xff]  }
 0xa00   : > { %v1279_v39 = vmul.f32 %v2201_v34, %v1271_v37  ;;  %v3164_v40 = vadd.f32 %v2202_v5, %v1278_v38 }
 0xa02   : > { %v3166_v41 = vadd.f32 %v2202_v5, %v1279_v39 }
 0xa04   : > { %v1288_v42 = vpack.c.bf16 %v3166_v41, %v3164_v40 }
 0xa06   : > { %1536 = vmatmul.mubr.bf16.vlgmr.msra.gmra.mrb[20].mxu1 %v1288_v42  ;;  %1579 = vmatmul.mubr.bf16.vlgmr.msra.gmra.mrb[8].mxu0 %v1288_v42 }
 0xa07   : > { %2314 = vmatpush3.bf16.msra.mxu1 %v2546_v45  ;;  %2336 = vmatpush3.bf16.msra.mxu0 %v2547_v31 }
 0xa08   : > { %2315 = vmatprep.subr.bf16.mxu1 %v2548_v46  ;;  %2337 = vmatprep.subr.bf16.mxu0 %v2549_v47 }
 0xa0b   : > { %2316 = vmatpush3.bf16.msra.mxu1 %v2550_v51  ;;  %2338 = vmatpush3.bf16.msra.mxu0 %v2551_v52 }
 0xa0c   : > { %2317 = vmatprep.subr.bf16.mxu1 %v2552_v48  ;;  %2339 = vmatprep.subr.bf16.mxu0 %v2553_v49 }
 0xa0f   : > { %2318 = vmatpush3.bf16.msra.mxu1 %v2554_v50  ;;  %2340 = vmatpush3.bf16.msra.mxu0 %v2555_v53 }
 0xa10   : > { %2319 = vmatprep.subr.bf16.mxu1 %v2556_v54  ;;  %2341 = vmatprep.subr.bf16.mxu0 %v2557_v58 }
 0xa13   : > { %2320 = vmatpush3.bf16.msra.mxu1 %v2558_v60  ;;  %2342 = vmatpush3.bf16.msra.mxu0 %v2559_v61 }
 0xa14   : > { %2321 = vmatprep.subr.bf16.mxu1 %v2560_v62  ;;  %2343 = vmatprep.subr.bf16.mxu0 %v2561_v63 }
 0xa17   : > { %2322 = vmatpush3.bf16.msra.mxu1 %v2562_v0  ;;  %2344 = vmatpush3.bf16.msra.mxu0 %v2563_v1 }
 0xa18   : > { %2323 = vmatprep.subr.bf16.mxu1 %v2564_v2  ;;  %2345 = vmatprep.subr.bf16.mxu0 %v2565_v3 }
 0xa1b   : > { %2324 = vmatpush3.bf16.msra.mxu1 %v2566_v4  ;;  %2346 = vmatpush3.bf16.msra.mxu0 %v2567_v6 }
 0xa1c   : > { %2325 = vmatprep.subr.bf16.mxu1 %v2568_v7  ;;  %2347 = vmatprep.subr.bf16.mxu0 %v2569_v8 }
 0xa1f   : > { %2326 = vmatpush3.bf16.msra.mxu1 %v2570_v9  ;;  %2348 = vmatpush3.bf16.msra.mxu0 %v2571_v10 }
 0xa20   : > { %2327 = vmatprep.subr.bf16.mxu1 %v2572_v11  ;;  %2349 = vmatprep.subr.bf16.mxu0 %v2573_v12 }
 0xa23   : > { %2328 = vmatpush3.bf16.msra.mxu1 %v2574_v13  ;;  %2350 = vmatpush3.bf16.msra.mxu0 %v2575_v14 }
 0xad9   : > { %v1537_v22 = vpop.f32.mrb[20].mxu1  ;;  %v1580_v23 = vpop.f32.mrb[8].mxu0 }
 0xada   : > { %v3180_v24 = vadd.f32 %v1537_v22, %v1326_v18  ;;  %v3182_v15 = vadd.f32 %v1580_v23, %v1334_v19  ;;  %v1539_v25 = vpop.f32.mrb[21].mxu1  ;;  %v1582_v26 = vpop.f32.mrb[9].mxu0 }
 0xadb   : > { %v3184_v27 = vadd.f32 %v1539_v25, %v1330_v20  ;;  %v3186_v28 = vadd.f32 %v1582_v26, %v1338_v21  ;;  %v1541_v56 = vpop.f32.mrb[22].mxu1  ;;  %v1584_v29 = vpop.f32.mrb[10].mxu0 }
 0xadc   : > { %v1589_v57 = vmul.f32 %v3180_v24, %v3180_v24  ;;  %v1591_v55 = vmul.f32 %v3182_v15, %v3182_v15  ;;  %v3192_v59 = vadd.f32 %v1541_v56, %v1326_v18  ;;  %v3194_v30 = vadd.f32 %v1584_v29, %v1334_v19  ;;  %v1543_v32 = vpop.f32.mrb[23].mxu1  ;;  %v1586_v33 = vpop.f32.mrb[11].mxu0 }
 0xadd   : > { %v1590_v34 = vmul.f32 %v3184_v27, %v3184_v27  ;;  %v1592_v35 = vmul.f32 %v3186_v28, %v3186_v28  ;;  %v3200_v36 = vadd.f32 %v1543_v32, %v1330_v20  ;;  %v3202_v37 = vadd.f32 %v1586_v33, %v1338_v21 }
 0xade   : > { %v1597_v38 = vmul.f32 %v1589_v57, %v3180_v24  ;;  %v1599_v5 = vmul.f32 %v1591_v55, %v3182_v15  ;;  %v1593_v39 = vmul.f32 %v3192_v59, %v3192_v59  ;;  %v1595_v42 = vmul.f32 %v3194_v30, %v3194_v30 }
 0xadf   : > { %v1598_v43 = vmul.f32 %v1590_v34, %v3184_v27  ;;  %v1600_v44 = vmul.f32 %v1592_v35, %v3186_v28  ;;  %v1594_v45 = vmul.f32 %v3200_v36, %v3200_v36  ;;  %v1596_v31 = vmul.f32 %v3202_v37, %v3202_v37 }
 0xae0   : > { %v1605_v46 = vmul.f32 0.044715, %v1597_v38  ;;  %v1607_v47 = vmul.f32 0.044715, %v1599_v5  ;;  %v1601_v51 = vmul.f32 %v1593_v39, %v3192_v59  ;;  %v1603_v52 = vmul.f32 %v1595_v42, %v3194_v30 }
 0xae1   : > { %v1606_v48 = vmul.f32 0.044715, %v1598_v43  ;;  %v1608_v49 = vmul.f32 0.044715, %v1600_v44  ;;  %v1602_v50 = vmul.f32 %v1594_v45, %v3200_v36  ;;  %v1604_v53 = vmul.f32 %v1596_v31, %v3202_v37 }
 0xae2   : > { %v1613_v54 = vadd.f32 %v1605_v46, %v3180_v24  ;;  %v1615_v58 = vadd.f32 %v1607_v47, %v3182_v15  ;;  %v1609_v60 = vmul.f32 0.044715, %v1601_v51  ;;  %v1611_v61 = vmul.f32 0.044715, %v1603_v52 }
 0xae3   : > { %v1614_v62 = vadd.f32 %v1606_v48, %v3184_v27  ;;  %v1616_v63 = vadd.f32 %v1608_v49, %v3186_v28  ;;  %v1610_v0 = vmul.f32 0.044715, %v1602_v50  ;;  %v1612_v1 = vmul.f32 0.044715, %v1604_v53 }
 0xae4   : > { %v1621_v2 = vmul.f32 0.7978846, %v1613_v54  ;;  %v1623_v3 = vmul.f32 0.7978846, %v1615_v58  ;;  %v1617_v4 = vadd.f32 %v1609_v60, %v3192_v59  ;;  %v1619_v6 = vadd.f32 %v1611_v61, %v3194_v30 }
 0xae5   : > { %v1622_v7 = vmul.f32 0.7978846, %v1614_v62  ;;  %v1624_v8 = vmul.f32 0.7978846, %v1616_v63  ;;  %v1618_v9 = vadd.f32 %v1610_v0, %v3200_v36  ;;  %v1620_v10 = vadd.f32 %v1612_v1, %v3202_v37 }
 0xae6   : > { %2600 = vtanh.f32 %v1621_v2  ;;  %v1625_v11 = vmul.f32 0.7978846, %v1617_v4  ;;  %v1627_v12 = vmul.f32 0.7978846, %v1619_v6 }
 0xae7   : > { %2602 = vtanh.f32 %v1623_v3  ;;  %v1626_v13 = vmul.f32 0.7978846, %v1618_v9  ;;  %v1628_v14 = vmul.f32 0.7978846, %v1620_v10 }
 0xae8   : > { %2604 = vtanh.f32 %v1622_v7 }
 0xae9   : > { %2606 = vtanh.f32 %v1624_v8 }
 0xaea   : > { %2608 = vtanh.f32 %v1625_v11 }
 0xaeb   : > { %2610 = vtanh.f32 %v1627_v12 }
 0xaec   : > { %2612 = vtanh.f32 %v1626_v13 }
 0xaed   : > { %2614 = vtanh.f32 %v1628_v14 }
 0xaf0   : > { %v2601_v16 = vpop.eup %2600 }
 0xaf1   : > { %v2603_v17 = vpop.eup %2602  ;;  %v1637_v18 = vadd.f32 1.0, %v2601_v16 }
 0xaf2   : > { %v2605_v19 = vpop.eup %2604  ;;  %v1639_v20 = vadd.f32 1.0, %v2603_v17 }
 0xaf3   : > { %v2607_v21 = vpop.eup %2606  ;;  %v1638_v22 = vadd.f32 1.0, %v2605_v19  ;;  %v1645_v56 = vmul.f32 0.5, %v1637_v18 }
 0xaf4   : > { %v2609_v23 = vpop.eup %2608  ;;  %v1640_v25 = vadd.f32 1.0, %v2607_v21  ;;  %v1647_v55 = vmul.f32 0.5, %v1639_v20 }
 0xaf5   : > { %v2611_v26 = vpop.eup %2610  ;;  %v1641_v29 = vadd.f32 1.0, %v2609_v23  ;;  %v1646_v38 = vmul.f32 0.5, %v1638_v22  ;;  %v1653_v43 = vmul.f32 %v1645_v56, %v3180_v24  ;;  %v2268_v22 = vld [vmem:[%s3269_s14] ss:$0 sm:$0xff] }
 0xaf6   : > { %v2613_v57 = vpop.eup %2612  ;;  %v1643_v32 = vadd.f32 1.0, %v2611_v26  ;;  %v1648_v42 = vmul.f32 0.5, %v1640_v25  ;;  %v1655_v31 = vmul.f32 %v1647_v55, %v3182_v15 }
 0xaf7   : > { %v2615_v33 = vpop.eup %2614  ;;  %v1649_v34 = vmul.f32 0.5, %v1641_v29  ;;  %v1642_v35 = vadd.f32 1.0, %v2613_v57  ;;  %v1654_v51 = vmul.f32 %v1646_v38, %v3184_v27  ;;  %v2235_v27 = vld [vmem:[%s3268_s13] ss:$0 sm:$0xff] }
 0xaf8   : > { %v1651_v5 = vmul.f32 0.5, %v1643_v32  ;;  %v1644_v39 = vadd.f32 1.0, %v2615_v33  ;;  %v1656_v49 = vmul.f32 %v1648_v42, %v3186_v28  ;;  %v2269_v29 = vld [vmem:[%s3270_s15] ss:$0 sm:$0xff] }
 0xaf9   : > { %v1657_v44 = vmul.f32 %v1649_v34, %v3192_v59  ;;  %v1650_v45 = vmul.f32 0.5, %v1642_v35 }
 0xafa   : > { %v1659_v46 = vmul.f32 %v1651_v5, %v3194_v30  ;;  %v1652_v47 = vmul.f32 0.5, %v1644_v39 }
 0xafb   : > { %v1658_v52 = vmul.f32 %v1650_v45, %v3200_v36  ;;  %v1661_v48 = vpack.c.bf16 %v1657_v44, %v1653_v43 }
 0xafc   : > { %v1660_v50 = vmul.f32 %v1652_v47, %v3202_v37  ;;  %v1663_v53 = vpack.c.bf16 %v1659_v46, %v1655_v31 }
 0xafd   : > { %v1662_v54 = vpack.c.bf16 %v1658_v52, %v1654_v51 }
 0xafe   : > { %v1664_v24 = vpack.c.bf16 %v1660_v50, %v1656_v49 }
 0xaff   : > { %1960 = vmatprep.mubr.bf16.mxu1 %v1662_v54 }
 0xb00   : > { %2001 = vmatprep.mubr.bf16.mxu0 %v1664_v24  ;;  %1961 = vmatmul.mubr.bf16.vlgmr.msra.gmra.mrb[24].mxu1 %v1661_v48 }
 0xb01   : > { %2002 = vmatmul.mubr.bf16.vlgmr.msra.gmra.mrb[12].mxu0 %v1663_v53 }
 0xbd3   : > { %v2329_v15 = vpop.f32.mrb[24].mxu1 }
 0xbd4   : > { %v2351_v59 = vpop.f32.mrb[12].mxu0  ;;  %v2330_v30 = vpop.f32.mrb[25].mxu1 }
 0xbd5   : > { %v2331_v36 = vadd.f32 %v2330_v30, %v2329_v15  ;;  %v2352_v58 = vpop.f32.mrb[13].mxu0  ;;  %v2332_v60 = vpop.f32.mrb[26].mxu1 }
 0xbd6   : > { %v2353_v28 = vadd.f32 %v2352_v58, %v2351_v59  ;;  %v2354_v61 = vpop.f32.mrb[14].mxu0  ;;  %v2333_v37 = vpop.f32.mrb[27].mxu1 }
 0xbd7   : > { %v1963_v62 = vadd.f32 %v2331_v36, %v2235_v27  ;;  %v2334_v63 = vadd.f32 %v2333_v37, %v2332_v60  ;;  %v2355_v0 = vpop.f32.mrb[15].mxu0 }
 0xbd8   : > { %v2356_v1 = vadd.f32 %v2355_v0, %v2354_v61 }
 0xbd9   : > { %v2004_v2 = vadd.f32 %v2353_v28, %v1963_v62  ;;  %v1966_v3 = vadd.f32 %v2334_v63, %v2235_v27 }
 0xbdb   : > { %v2007_v4 = vadd.f32 %v2356_v1, %v1966_v3  ;;  %v2010_v6 = vadd.f32 %v2004_v2, %v3164_v40 }
 0xbdd   : > { %2014 = vadd.xlane.f32.xlu0 %v2010_v6  ;;  %v2011_v7 = vadd.f32 %v2007_v4, %v3166_v41 }
 0xbdf   : > { %2016 = vadd.xlane.f32.xlu1 %v2011_v7 }
 0xc6a   : > { %v2015_v8 = vpop.xlane.xlu0 %2014 }
 0xc6b   : > { %v2018_v9 = vmul.f32 0.0078125, %v2015_v8 }
 0xc6c   : > { %v2017_v10 = vpop.xlane.xlu1 %2016 }
 0xc6d   : > { %v2020_v11 = vsub.f32 %v2010_v6, %v2018_v9  ;;  %v2019_v12 = vmul.f32 0.0078125, %v2017_v10 }
 0xc6f   : > { %v2021_v13 = vsub.f32 %v2011_v7, %v2019_v12  ;;  %v2022_v14 = vmul.f32 %v2020_v11, %v2020_v11 }
 0xc71   : > { %2024 = vadd.xlane.f32.xlu0 %v2022_v14  ;;  %v2023_v16 = vmul.f32 %v2021_v13, %v2021_v13 }
 0xc73   : > { %2026 = vadd.xlane.f32.xlu1 %v2023_v16 }
 0xcfe   : > { %v2025_v17 = vpop.xlane.xlu0 %2024 }
 0xcff   : > { %v2028_v18 = vmul.f32 0.0078125, %v2025_v17 }
 0xd00   : > { %v2027_v19 = vpop.xlane.xlu1 %2026 }
 0xd01   : > { %v2030_v20 = vadd.f32 1e-05, %v2028_v18  ;;  %v2029_v40 = vmul.f32 0.0078125, %v2027_v19 }
 0xd03   : > { %2616 = vrsqrt.f32 %v2030_v20  ;;  %v2031_v21 = vadd.f32 1e-05, %v2029_v40 }
 0xd05   : > { %2618 = vrsqrt.f32 %v2031_v21 }
 0xd0d   : > { %v2617_v41 = vpop.eup %2616 }
 0xd0e   : > { %v2034_v23 = vmul.f32 %v2617_v41, %v2020_v11 }
 0xd0f   : > { %v2619_v25 = vpop.eup %2618 }
 0xd10   : > { %v2042_v26 = vmul.f32 %v2268_v22, %v2034_v23  ;;  %v2035_v56 = vmul.f32 %v2619_v25, %v2021_v13 }
 0xd12   : > { %v2043_v57 = vmul.f32 %v2268_v22, %v2035_v56  ;;  %v2050_v55 = vadd.f32 %v2269_v29, %v2042_v26 }
 0xd14   : > { %v2051_v32 = vadd.f32 %v2269_v29, %v2043_v57 }
 0xd16   : > { %v2285_v33 = vpack.c.bf16 %v2051_v32, %v2050_v55 }
 0xd18   : > { %2286 = vst [vmem:[%s565_s29] sm:$0xff] %v2285_v33  }
 0xd19 PF: > { %s3287_s30 = sld [smem:[#allocation9_spill]] }
 0xd1f   : > { %s28_s21 = sadd.s32 1, %s3287_s30  }
 0xd20   : > { %p25_p5 = scmp.ge.s32.totalorder %s28_s21, 4  }
 0xd22   :  { %27 = sbr.rel (!%p25_p5) target bundleno = 5 (0x5), region = 126 }
 0xd29   :  { %2083 = vsyncpa [#allocation4], 1 }
 0xd2a   :  { %2085 = vsyncpa [#allocation4 + $0x1], 1 }
 0xd2b   :  { %2086 = vsyncpa [#allocation6], 1 }

</bundles_post_ra>
